<compile_context>
chip_gen: v5e
topology: v5e:2x2
jax: 0.10.0
libtpu: 0.0.40
codegen_flags: <defaults>
</compile_context>

<pallas_src>
import functools

import jax
import jax.numpy as jnp
from jax.experimental import pallas as pl
from jax.experimental.pallas import tpu as pltpu


def attention_kernel(vtok_ref, tfeat_ref, wq_ref, wk_ref, wv_ref, wp_ref, bp_ref,
                     x_ref, attn_ref, *, num_heads, scale):
    vtok = vtok_ref[0]                       # (Nv, C)  visual tokens of this image
    tq = tfeat_ref[0]                        # (Nt, C)  text tokens of this image
    Nv, C = vtok.shape
    Nt = tq.shape[0]
    hd = C // num_heads

    # ---- shared Q/K/V projections (one matmul each, reused by every head) ----
    wq = wq_ref[...]
    wk = wk_ref[...]
    wv = wv_ref[...]
    q = jnp.dot(tq, wq, preferred_element_type=jnp.float32)      # (Nt, C)
    k = jnp.dot(vtok, wk, preferred_element_type=jnp.float32)    # (Nv, C)
    v = jnp.dot(vtok, wv, preferred_element_type=jnp.float32)    # (Nv, C)

    # ---- per-head attention (heads statically unrolled; num_heads is small) ----
    out_heads = []
    for h in range(num_heads):
        lo = h * hd
        qh = q[:, lo:lo + hd]                # (Nt, hd)
        kh = k[:, lo:lo + hd]                # (Nv, hd)
        vh = v[:, lo:lo + hd]                # (Nv, hd)

        # scores = qh @ kh^T * scale  (contract head_dim of both operands),
        # result (Nt, Nv) is lane-dense on Nv.
        s = jax.lax.dot_general(qh, kh, (((1,), (1,)), ((), ())),
                                preferred_element_type=jnp.float32) * scale

        # numerically-stable softmax over the visual-token (lane) axis
        m = jnp.max(s, axis=-1, keepdims=True)
        e = jnp.exp(s - m)                                   # EUP
        p = e / jnp.sum(e, axis=-1, keepdims=True)           # (Nt, Nv)

        attn_ref[0, h] = p.astype(attn_ref.dtype)            # lane-dense store

        out_heads.append(jnp.dot(p, vh, preferred_element_type=jnp.float32))  # (Nt, hd)

    # ---- merge heads + output projection ----
    o = jnp.concatenate(out_heads, axis=-1)                  # (Nt, C)
    x = jnp.dot(o, wp_ref[...], preferred_element_type=jnp.float32) + bp_ref[...]
    x_ref[0] = x.astype(x_ref.dtype)


@functools.partial(jax.jit, static_argnames=("num_heads",))
def attention_forward(vfeat, tfeat, wq, wk, wv, wp, bp, num_heads):
    B, C, H, W = vfeat.shape
    Nv = H * W
    Nt = tfeat.shape[1]
    hd = C // num_heads
    scale = float(hd) ** -0.5

    # The module's own tokenization: permute(0,3,1,2).contiguous().reshape(B,H*W,C).
    # This exact index scramble is part of the reference semantics, so it is
    # reproduced here (outside the kernel) as a single small XLA copy.
    vtok = jnp.transpose(vfeat, (0, 3, 1, 2)).reshape(B, Nv, C)

    kernel = functools.partial(attention_kernel, num_heads=num_heads, scale=scale)

    x, attn = pl.pallas_call(
        kernel,
        out_shape=(
            jax.ShapeDtypeStruct((B, Nt, C), vfeat.dtype),
            jax.ShapeDtypeStruct((B, num_heads, Nt, Nv), jnp.float32),
        ),
        grid_spec=pltpu.PrefetchScalarGridSpec(
            num_scalar_prefetch=0,
            grid=(B,),
            in_specs=[
                pl.BlockSpec((1, Nv, C), lambda b: (b, 0, 0)),        # visual tokens
                pl.BlockSpec((1, Nt, C), lambda b: (b, 0, 0)),        # text tokens
                pl.BlockSpec((C, C), lambda b: (0, 0)),               # Wq
                pl.BlockSpec((C, C), lambda b: (0, 0)),               # Wk
                pl.BlockSpec((C, C), lambda b: (0, 0)),               # Wv
                pl.BlockSpec((C, C), lambda b: (0, 0)),               # Wproj
                pl.BlockSpec((1, C), lambda b: (0, 0)),               # proj bias
            ],
            out_specs=(
                pl.BlockSpec((1, Nt, C), lambda b: (b, 0, 0)),                    # x
                pl.BlockSpec((1, num_heads, Nt, Nv), lambda b: (b, 0, 0, 0)),     # attn
            ),
        ),
        compiler_params=pltpu.CompilerParams(
            dimension_semantics=("parallel",),
            vmem_limit_bytes=32 * 1024 * 1024,
        ),
    )(vtok, tfeat, wq, wk, wv, wp, bp)
    return x, attn


def attention_reference(vfeat, tfeat, wq, wk, wv, wp, bp, num_heads):
    """Pure-JAX reference with the exact module semantics (dropout p=0 -> identity)."""
    B, C, H, W = vfeat.shape
    Nv = H * W
    Nt = tfeat.shape[1]
    hd = C // num_heads
    scale = hd ** -0.5
    hp = jax.lax.Precision.HIGHEST
    vtok = jnp.transpose(vfeat, (0, 3, 1, 2)).reshape(B, Nv, C)
    q = jnp.einsum('btc,cd->btd', tfeat, wq, precision=hp)
    k = jnp.einsum('bvc,cd->bvd', vtok, wk, precision=hp)
    v = jnp.einsum('bvc,cd->bvd', vtok, wv, precision=hp)
    q = q.reshape(B, Nt, num_heads, hd).transpose(0, 2, 1, 3)
    k = k.reshape(B, Nv, num_heads, hd).transpose(0, 2, 1, 3)
    v = v.reshape(B, Nv, num_heads, hd).transpose(0, 2, 1, 3)
    attn = jnp.einsum('bhtd,bhvd->bhtv', q, k, precision=hp) * scale
    attn = jax.nn.softmax(attn, axis=-1)
    x = jnp.einsum('bhtv,bhvd->bhtd', attn, v, precision=hp)
    x = x.transpose(0, 2, 1, 3).reshape(B, Nt, C)
    x = jnp.einsum('btc,cd->btd', x, wp, precision=hp) + bp[0]
    return x, attn


if __name__ == "__main__":
    # Small shapes consistent with the module: dim=32, num_heads=8 (head_dim=4),
    # B=2, visual H=W=16 (Nv=256 visual tokens), Nt=8 text tokens.
    B, C, H, W = 2, 32, 16, 16
    Nt = 8
    num_heads = 8

    key = jax.random.PRNGKey(0)
    kv, kt, k1, k2, k3, k4, k5 = jax.random.split(key, 7)

    vfeat = jax.random.normal(kv, (B, C, H, W), jnp.float32)
    tfeat = jax.random.normal(kt, (B, Nt, C), jnp.float32)

    # Weights in (in, out) layout (i.e. the transpose of torch.nn.Linear.weight).
    # qkv_bias=False (module default) -> no q/k/v bias; proj always has a bias.
    wq = 0.2 * jax.random.normal(k1, (C, C), jnp.float32)
    wk = 0.2 * jax.random.normal(k2, (C, C), jnp.float32)
    wv = 0.2 * jax.random.normal(k3, (C, C), jnp.float32)
    wp = 0.2 * jax.random.normal(k4, (C, C), jnp.float32)
    bp = 0.1 * jax.random.normal(k5, (1, C), jnp.float32)

    x, attn = attention_forward(vfeat, tfeat, wq, wk, wv, wp, bp, num_heads=num_heads)
    x = jax.block_until_ready(x)
    attn = jax.block_until_ready(attn)

    x_ref, attn_ref_val = attention_reference(vfeat, tfeat, wq, wk, wv, wp, bp, num_heads)
    x_ref = jax.block_until_ready(x_ref)

    assert x.shape == (B, Nt, C), x.shape
    assert attn.shape == (B, num_heads, Nt, H * W), attn.shape
    err_x = float(jnp.max(jnp.abs(x - x_ref)))
    err_a = float(jnp.max(jnp.abs(attn - attn_ref_val)))
    assert err_x < 5e-4, f"x max abs err {err_x}"
    assert err_a < 5e-4, f"attn max abs err {err_a}"

    print("KERNEL_OK")
</pallas_src>

<mosaic_0001>
module attributes {stable_mosaic.version = 11 : i64} {
  func.func @attention_kernel(%arg0: i32, %arg1: memref<1x256x32xf32, #tpu.memory_space<vmem>>, %arg2: memref<1x8x32xf32, #tpu.memory_space<vmem>>, %arg3: memref<32x32xf32, #tpu.memory_space<vmem>>, %arg4: memref<32x32xf32, #tpu.memory_space<vmem>>, %arg5: memref<32x32xf32, #tpu.memory_space<vmem>>, %arg6: memref<32x32xf32, #tpu.memory_space<vmem>>, %arg7: memref<1x32xf32, #tpu.memory_space<vmem>>, %arg8: memref<1x8x32xf32, #tpu.memory_space<vmem>>, %arg9: memref<1x8x8x256xf32, #tpu.memory_space<vmem>>) attributes {dimension_semantics = [#tpu.dimension_semantics<parallel>], iteration_bounds = array<i64: 2>, scalar_prefetch = 0 : i64, scratch_operands = 0 : i64, tpu.core_type = #tpu.core_type<tc>, window_params = [{transform_indices = @transform_0, window_bounds = array<i64: 1, 256, 32>}, {transform_indices = @transform_1, window_bounds = array<i64: 1, 8, 32>}, {pipeline_mode = #tpu.pipeline_mode<synchronous>, transform_indices = @transform_2, window_bounds = array<i64: 32, 32>}, {pipeline_mode = #tpu.pipeline_mode<synchronous>, transform_indices = @transform_3, window_bounds = array<i64: 32, 32>}, {pipeline_mode = #tpu.pipeline_mode<synchronous>, transform_indices = @transform_4, window_bounds = array<i64: 32, 32>}, {pipeline_mode = #tpu.pipeline_mode<synchronous>, transform_indices = @transform_5, window_bounds = array<i64: 32, 32>}, {pipeline_mode = #tpu.pipeline_mode<synchronous>, transform_indices = @transform_6, window_bounds = array<i64: 1, 32>}, {transform_indices = @transform_7, window_bounds = array<i64: 1, 8, 32>}, {transform_indices = @transform_8, window_bounds = array<i64: 1, 8, 8, 256>}]} {
    %c0 = arith.constant 0 : index
    %c0_0 = arith.constant 0 : index
    %c0_1 = arith.constant 0 : index
    %0 = vector.load %arg1[%c0, %c0_0, %c0_1] : memref<1x256x32xf32, #tpu.memory_space<vmem>>, vector<1x256x32xf32>
    %1 = vector.shape_cast %0 : vector<1x256x32xf32> to vector<256x32xf32>
    %c0_2 = arith.constant 0 : index
    %c0_3 = arith.constant 0 : index
    %c0_4 = arith.constant 0 : index
    %2 = vector.load %arg2[%c0_2, %c0_3, %c0_4] : memref<1x8x32xf32, #tpu.memory_space<vmem>>, vector<1x8x32xf32>
    %3 = vector.shape_cast %2 : vector<1x8x32xf32> to vector<8x32xf32>
    %c0_5 = arith.constant 0 : index
    %c0_6 = arith.constant 0 : index
    %4 = vector.load %arg3[%c0_5, %c0_6] : memref<32x32xf32, #tpu.memory_space<vmem>>, vector<32x32xf32>
    %c0_7 = arith.constant 0 : index
    %c0_8 = arith.constant 0 : index
    %5 = vector.load %arg4[%c0_7, %c0_8] : memref<32x32xf32, #tpu.memory_space<vmem>>, vector<32x32xf32>
    %c0_9 = arith.constant 0 : index
    %c0_10 = arith.constant 0 : index
    %6 = vector.load %arg5[%c0_9, %c0_10] : memref<32x32xf32, #tpu.memory_space<vmem>>, vector<32x32xf32>
    %cst = arith.constant dense<0.000000e+00> : vector<8x32xf32>
    %7 = tpu.matmul %3, %4, %cst {dimension_numbers = #tpu.dot_dimension_numbers<[1], [0], [0], [1], [0, 0, 1, 1], [], []>} : vector<8x32xf32>, vector<32x32xf32>, vector<8x32xf32> -> vector<8x32xf32>
    %cst_11 = arith.constant dense<0.000000e+00> : vector<256x32xf32>
    %8 = tpu.matmul %1, %5, %cst_11 {dimension_numbers = #tpu.dot_dimension_numbers<[1], [0], [0], [1], [0, 0, 1, 1], [], []>} : vector<256x32xf32>, vector<32x32xf32>, vector<256x32xf32> -> vector<256x32xf32>
    %cst_12 = arith.constant dense<0.000000e+00> : vector<256x32xf32>
    %9 = tpu.matmul %1, %6, %cst_12 {dimension_numbers = #tpu.dot_dimension_numbers<[1], [0], [0], [1], [0, 0, 1, 1], [], []>} : vector<256x32xf32>, vector<32x32xf32>, vector<256x32xf32> -> vector<256x32xf32>
    %10 = vector.extract_strided_slice %7 {offsets = [0, 0], sizes = [8, 4], strides = [1, 1]} : vector<8x32xf32> to vector<8x4xf32>
    %11 = vector.extract_strided_slice %8 {offsets = [0, 0], sizes = [256, 4], strides = [1, 1]} : vector<256x32xf32> to vector<256x4xf32>
    %12 = vector.extract_strided_slice %9 {offsets = [0, 0], sizes = [256, 4], strides = [1, 1]} : vector<256x32xf32> to vector<256x4xf32>
    %cst_13 = arith.constant dense<0.000000e+00> : vector<8x256xf32>
    %13 = tpu.matmul %10, %11, %cst_13 {dimension_numbers = #tpu.dot_dimension_numbers<[1], [1], [0], [0], [0, 0, 1, 0], [], []>} : vector<8x4xf32>, vector<256x4xf32>, vector<8x256xf32> -> vector<8x256xf32>
    %cst_14 = arith.constant 5.000000e-01 : f32
    %14 = vector.broadcast %cst_14 : f32 to vector<8x256xf32>
    %15 = arith.mulf %13, %14 : vector<8x256xf32>
    %cst_15 = arith.constant dense<0xFF800000> : vector<8xf32>
    %16 = vector.multi_reduction <maximumf>, %15, %cst_15 [1] : vector<8x256xf32> to vector<8xf32>
    %17 = vector.shape_cast %16 : vector<8xf32> to vector<8x1xf32>
    %18 = vector.broadcast %17 : vector<8x1xf32> to vector<8x256xf32>
    %19 = arith.subf %15, %18 : vector<8x256xf32>
    %20 = math.exp %19 : vector<8x256xf32>
    %cst_16 = arith.constant dense<0.000000e+00> : vector<8xf32>
    %21 = vector.multi_reduction <add>, %20, %cst_16 [1] : vector<8x256xf32> to vector<8xf32>
    %22 = vector.shape_cast %21 : vector<8xf32> to vector<8x1xf32>
    %23 = vector.broadcast %22 : vector<8x1xf32> to vector<8x256xf32>
    %24 = arith.divf %20, %23 : vector<8x256xf32>
    %c0_17 = arith.constant 0 : index
    %c0_18 = arith.constant 0 : index
    %c0_19 = arith.constant 0 : index
    %c0_20 = arith.constant 0 : index
    %25 = vector.load %arg9[%c0_17, %c0_18, %c0_19, %c0_20] : memref<1x8x8x256xf32, #tpu.memory_space<vmem>>, vector<1x1x8x256xf32>
    %26 = vector.shape_cast %25 : vector<1x1x8x256xf32> to vector<8x256xf32>
    %27 = vector.shape_cast %24 : vector<8x256xf32> to vector<1x1x8x256xf32>
    tpu.vector_store %arg9[%c0_17, %c0_18, %c0_19, %c0_20], %27 {strides = array<i32>} : memref<1x8x8x256xf32, #tpu.memory_space<vmem>>, vector<1x1x8x256xf32>,
    %cst_21 = arith.constant dense<0.000000e+00> : vector<8x4xf32>
    %28 = tpu.matmul %24, %12, %cst_21 {dimension_numbers = #tpu.dot_dimension_numbers<[1], [0], [0], [1], [0, 0, 1, 1], [], []>} : vector<8x256xf32>, vector<256x4xf32>, vector<8x4xf32> -> vector<8x4xf32>
    %29 = vector.extract_strided_slice %7 {offsets = [0, 4], sizes = [8, 4], strides = [1, 1]} : vector<8x32xf32> to vector<8x4xf32>
    %30 = vector.extract_strided_slice %8 {offsets = [0, 4], sizes = [256, 4], strides = [1, 1]} : vector<256x32xf32> to vector<256x4xf32>
    %31 = vector.extract_strided_slice %9 {offsets = [0, 4], sizes = [256, 4], strides = [1, 1]} : vector<256x32xf32> to vector<256x4xf32>
    %cst_22 = arith.constant dense<0.000000e+00> : vector<8x256xf32>
    %32 = tpu.matmul %29, %30, %cst_22 {dimension_numbers = #tpu.dot_dimension_numbers<[1], [1], [0], [0], [0, 0, 1, 0], [], []>} : vector<8x4xf32>, vector<256x4xf32>, vector<8x256xf32> -> vector<8x256xf32>
    %cst_23 = arith.constant 5.000000e-01 : f32
    %33 = vector.broadcast %cst_23 : f32 to vector<8x256xf32>
    %34 = arith.mulf %32, %33 : vector<8x256xf32>
    %cst_24 = arith.constant dense<0xFF800000> : vector<8xf32>
    %35 = vector.multi_reduction <maximumf>, %34, %cst_24 [1] : vector<8x256xf32> to vector<8xf32>
    %36 = vector.shape_cast %35 : vector<8xf32> to vector<8x1xf32>
    %37 = vector.broadcast %36 : vector<8x1xf32> to vector<8x256xf32>
    %38 = arith.subf %34, %37 : vector<8x256xf32>
    %39 = math.exp %38 : vector<8x256xf32>
    %cst_25 = arith.constant dense<0.000000e+00> : vector<8xf32>
    %40 = vector.multi_reduction <add>, %39, %cst_25 [1] : vector<8x256xf32> to vector<8xf32>
    %41 = vector.shape_cast %40 : vector<8xf32> to vector<8x1xf32>
    %42 = vector.broadcast %41 : vector<8x1xf32> to vector<8x256xf32>
    %43 = arith.divf %39, %42 : vector<8x256xf32>
    %c0_26 = arith.constant 0 : index
    %c1 = arith.constant 1 : index
    %c0_27 = arith.constant 0 : index
    %c0_28 = arith.constant 0 : index
    %44 = vector.load %arg9[%c0_26, %c1, %c0_27, %c0_28] : memref<1x8x8x256xf32, #tpu.memory_space<vmem>>, vector<1x1x8x256xf32>
    %45 = vector.shape_cast %44 : vector<1x1x8x256xf32> to vector<8x256xf32>
    %46 = vector.shape_cast %43 : vector<8x256xf32> to vector<1x1x8x256xf32>
    tpu.vector_store %arg9[%c0_26, %c1, %c0_27, %c0_28], %46 {strides = array<i32>} : memref<1x8x8x256xf32, #tpu.memory_space<vmem>>, vector<1x1x8x256xf32>,
    %cst_29 = arith.constant dense<0.000000e+00> : vector<8x4xf32>
    %47 = tpu.matmul %43, %31, %cst_29 {dimension_numbers = #tpu.dot_dimension_numbers<[1], [0], [0], [1], [0, 0, 1, 1], [], []>} : vector<8x256xf32>, vector<256x4xf32>, vector<8x4xf32> -> vector<8x4xf32>
    %48 = vector.extract_strided_slice %7 {offsets = [0, 8], sizes = [8, 4], strides = [1, 1]} : vector<8x32xf32> to vector<8x4xf32>
    %49 = vector.extract_strided_slice %8 {offsets = [0, 8], sizes = [256, 4], strides = [1, 1]} : vector<256x32xf32> to vector<256x4xf32>
    %50 = vector.extract_strided_slice %9 {offsets = [0, 8], sizes = [256, 4], strides = [1, 1]} : vector<256x32xf32> to vector<256x4xf32>
    %cst_30 = arith.constant dense<0.000000e+00> : vector<8x256xf32>
    %51 = tpu.matmul %48, %49, %cst_30 {dimension_numbers = #tpu.dot_dimension_numbers<[1], [1], [0], [0], [0, 0, 1, 0], [], []>} : vector<8x4xf32>, vector<256x4xf32>, vector<8x256xf32> -> vector<8x256xf32>
    %cst_31 = arith.constant 5.000000e-01 : f32
    %52 = vector.broadcast %cst_31 : f32 to vector<8x256xf32>
    %53 = arith.mulf %51, %52 : vector<8x256xf32>
    %cst_32 = arith.constant dense<0xFF800000> : vector<8xf32>
    %54 = vector.multi_reduction <maximumf>, %53, %cst_32 [1] : vector<8x256xf32> to vector<8xf32>
    %55 = vector.shape_cast %54 : vector<8xf32> to vector<8x1xf32>
    %56 = vector.broadcast %55 : vector<8x1xf32> to vector<8x256xf32>
    %57 = arith.subf %53, %56 : vector<8x256xf32>
    %58 = math.exp %57 : vector<8x256xf32>
    %cst_33 = arith.constant dense<0.000000e+00> : vector<8xf32>
    %59 = vector.multi_reduction <add>, %58, %cst_33 [1] : vector<8x256xf32> to vector<8xf32>
    %60 = vector.shape_cast %59 : vector<8xf32> to vector<8x1xf32>
    %61 = vector.broadcast %60 : vector<8x1xf32> to vector<8x256xf32>
    %62 = arith.divf %58, %61 : vector<8x256xf32>
    %c0_34 = arith.constant 0 : index
    %c2 = arith.constant 2 : index
    %c0_35 = arith.constant 0 : index
    %c0_36 = arith.constant 0 : index
    %63 = vector.load %arg9[%c0_34, %c2, %c0_35, %c0_36] : memref<1x8x8x256xf32, #tpu.memory_space<vmem>>, vector<1x1x8x256xf32>
    %64 = vector.shape_cast %63 : vector<1x1x8x256xf32> to vector<8x256xf32>
    %65 = vector.shape_cast %62 : vector<8x256xf32> to vector<1x1x8x256xf32>
    tpu.vector_store %arg9[%c0_34, %c2, %c0_35, %c0_36], %65 {strides = array<i32>} : memref<1x8x8x256xf32, #tpu.memory_space<vmem>>, vector<1x1x8x256xf32>,
    %cst_37 = arith.constant dense<0.000000e+00> : vector<8x4xf32>
    %66 = tpu.matmul %62, %50, %cst_37 {dimension_numbers = #tpu.dot_dimension_numbers<[1], [0], [0], [1], [0, 0, 1, 1], [], []>} : vector<8x256xf32>, vector<256x4xf32>, vector<8x4xf32> -> vector<8x4xf32>
    %67 = vector.extract_strided_slice %7 {offsets = [0, 12], sizes = [8, 4], strides = [1, 1]} : vector<8x32xf32> to vector<8x4xf32>
    %68 = vector.extract_strided_slice %8 {offsets = [0, 12], sizes = [256, 4], strides = [1, 1]} : vector<256x32xf32> to vector<256x4xf32>
    %69 = vector.extract_strided_slice %9 {offsets = [0, 12], sizes = [256, 4], strides = [1, 1]} : vector<256x32xf32> to vector<256x4xf32>
    %cst_38 = arith.constant dense<0.000000e+00> : vector<8x256xf32>
    %70 = tpu.matmul %67, %68, %cst_38 {dimension_numbers = #tpu.dot_dimension_numbers<[1], [1], [0], [0], [0, 0, 1, 0], [], []>} : vector<8x4xf32>, vector<256x4xf32>, vector<8x256xf32> -> vector<8x256xf32>
    %cst_39 = arith.constant 5.000000e-01 : f32
    %71 = vector.broadcast %cst_39 : f32 to vector<8x256xf32>
    %72 = arith.mulf %70, %71 : vector<8x256xf32>
    %cst_40 = arith.constant dense<0xFF800000> : vector<8xf32>
    %73 = vector.multi_reduction <maximumf>, %72, %cst_40 [1] : vector<8x256xf32> to vector<8xf32>
    %74 = vector.shape_cast %73 : vector<8xf32> to vector<8x1xf32>
    %75 = vector.broadcast %74 : vector<8x1xf32> to vector<8x256xf32>
    %76 = arith.subf %72, %75 : vector<8x256xf32>
    %77 = math.exp %76 : vector<8x256xf32>
    %cst_41 = arith.constant dense<0.000000e+00> : vector<8xf32>
    %78 = vector.multi_reduction <add>, %77, %cst_41 [1] : vector<8x256xf32> to vector<8xf32>
    %79 = vector.shape_cast %78 : vector<8xf32> to vector<8x1xf32>
    %80 = vector.broadcast %79 : vector<8x1xf32> to vector<8x256xf32>
    %81 = arith.divf %77, %80 : vector<8x256xf32>
    %c0_42 = arith.constant 0 : index
    %c3 = arith.constant 3 : index
    %c0_43 = arith.constant 0 : index
    %c0_44 = arith.constant 0 : index
    %82 = vector.load %arg9[%c0_42, %c3, %c0_43, %c0_44] : memref<1x8x8x256xf32, #tpu.memory_space<vmem>>, vector<1x1x8x256xf32>
    %83 = vector.shape_cast %82 : vector<1x1x8x256xf32> to vector<8x256xf32>
    %84 = vector.shape_cast %81 : vector<8x256xf32> to vector<1x1x8x256xf32>
    tpu.vector_store %arg9[%c0_42, %c3, %c0_43, %c0_44], %84 {strides = array<i32>} : memref<1x8x8x256xf32, #tpu.memory_space<vmem>>, vector<1x1x8x256xf32>,
    %cst_45 = arith.constant dense<0.000000e+00> : vector<8x4xf32>
    %85 = tpu.matmul %81, %69, %cst_45 {dimension_numbers = #tpu.dot_dimension_numbers<[1], [0], [0], [1], [0, 0, 1, 1], [], []>} : vector<8x256xf32>, vector<256x4xf32>, vector<8x4xf32> -> vector<8x4xf32>
    %86 = vector.extract_strided_slice %7 {offsets = [0, 16], sizes = [8, 4], strides = [1, 1]} : vector<8x32xf32> to vector<8x4xf32>
    %87 = vector.extract_strided_slice %8 {offsets = [0, 16], sizes = [256, 4], strides = [1, 1]} : vector<256x32xf32> to vector<256x4xf32>
    %88 = vector.extract_strided_slice %9 {offsets = [0, 16], sizes = [256, 4], strides = [1, 1]} : vector<256x32xf32> to vector<256x4xf32>
    %cst_46 = arith.constant dense<0.000000e+00> : vector<8x256xf32>
    %89 = tpu.matmul %86, %87, %cst_46 {dimension_numbers = #tpu.dot_dimension_numbers<[1], [1], [0], [0], [0, 0, 1, 0], [], []>} : vector<8x4xf32>, vector<256x4xf32>, vector<8x256xf32> -> vector<8x256xf32>
    %cst_47 = arith.constant 5.000000e-01 : f32
    %90 = vector.broadcast %cst_47 : f32 to vector<8x256xf32>
    %91 = arith.mulf %89, %90 : vector<8x256xf32>
    %cst_48 = arith.constant dense<0xFF800000> : vector<8xf32>
    %92 = vector.multi_reduction <maximumf>, %91, %cst_48 [1] : vector<8x256xf32> to vector<8xf32>
    %93 = vector.shape_cast %92 : vector<8xf32> to vector<8x1xf32>
    %94 = vector.broadcast %93 : vector<8x1xf32> to vector<8x256xf32>
    %95 = arith.subf %91, %94 : vector<8x256xf32>
    %96 = math.exp %95 : vector<8x256xf32>
    %cst_49 = arith.constant dense<0.000000e+00> : vector<8xf32>
    %97 = vector.multi_reduction <add>, %96, %cst_49 [1] : vector<8x256xf32> to vector<8xf32>
    %98 = vector.shape_cast %97 : vector<8xf32> to vector<8x1xf32>
    %99 = vector.broadcast %98 : vector<8x1xf32> to vector<8x256xf32>
    %100 = arith.divf %96, %99 : vector<8x256xf32>
    %c0_50 = arith.constant 0 : index
    %c4 = arith.constant 4 : index
    %c0_51 = arith.constant 0 : index
    %c0_52 = arith.constant 0 : index
    %101 = vector.load %arg9[%c0_50, %c4, %c0_51, %c0_52] : memref<1x8x8x256xf32, #tpu.memory_space<vmem>>, vector<1x1x8x256xf32>
    %102 = vector.shape_cast %101 : vector<1x1x8x256xf32> to vector<8x256xf32>
    %103 = vector.shape_cast %100 : vector<8x256xf32> to vector<1x1x8x256xf32>
    tpu.vector_store %arg9[%c0_50, %c4, %c0_51, %c0_52], %103 {strides = array<i32>} : memref<1x8x8x256xf32, #tpu.memory_space<vmem>>, vector<1x1x8x256xf32>,
    %cst_53 = arith.constant dense<0.000000e+00> : vector<8x4xf32>
    %104 = tpu.matmul %100, %88, %cst_53 {dimension_numbers = #tpu.dot_dimension_numbers<[1], [0], [0], [1], [0, 0, 1, 1], [], []>} : vector<8x256xf32>, vector<256x4xf32>, vector<8x4xf32> -> vector<8x4xf32>
    %105 = vector.extract_strided_slice %7 {offsets = [0, 20], sizes = [8, 4], strides = [1, 1]} : vector<8x32xf32> to vector<8x4xf32>
    %106 = vector.extract_strided_slice %8 {offsets = [0, 20], sizes = [256, 4], strides = [1, 1]} : vector<256x32xf32> to vector<256x4xf32>
    %107 = vector.extract_strided_slice %9 {offsets = [0, 20], sizes = [256, 4], strides = [1, 1]} : vector<256x32xf32> to vector<256x4xf32>
    %cst_54 = arith.constant dense<0.000000e+00> : vector<8x256xf32>
    %108 = tpu.matmul %105, %106, %cst_54 {dimension_numbers = #tpu.dot_dimension_numbers<[1], [1], [0], [0], [0, 0, 1, 0], [], []>} : vector<8x4xf32>, vector<256x4xf32>, vector<8x256xf32> -> vector<8x256xf32>
    %cst_55 = arith.constant 5.000000e-01 : f32
    %109 = vector.broadcast %cst_55 : f32 to vector<8x256xf32>
    %110 = arith.mulf %108, %109 : vector<8x256xf32>
    %cst_56 = arith.constant dense<0xFF800000> : vector<8xf32>
    %111 = vector.multi_reduction <maximumf>, %110, %cst_56 [1] : vector<8x256xf32> to vector<8xf32>
    %112 = vector.shape_cast %111 : vector<8xf32> to vector<8x1xf32>
    %113 = vector.broadcast %112 : vector<8x1xf32> to vector<8x256xf32>
    %114 = arith.subf %110, %113 : vector<8x256xf32>
    %115 = math.exp %114 : vector<8x256xf32>
    %cst_57 = arith.constant dense<0.000000e+00> : vector<8xf32>
    %116 = vector.multi_reduction <add>, %115, %cst_57 [1] : vector<8x256xf32> to vector<8xf32>
    %117 = vector.shape_cast %116 : vector<8xf32> to vector<8x1xf32>
    %118 = vector.broadcast %117 : vector<8x1xf32> to vector<8x256xf32>
    %119 = arith.divf %115, %118 : vector<8x256xf32>
    %c0_58 = arith.constant 0 : index
    %c5 = arith.constant 5 : index
    %c0_59 = arith.constant 0 : index
    %c0_60 = arith.constant 0 : index
    %120 = vector.load %arg9[%c0_58, %c5, %c0_59, %c0_60] : memref<1x8x8x256xf32, #tpu.memory_space<vmem>>, vector<1x1x8x256xf32>
    %121 = vector.shape_cast %120 : vector<1x1x8x256xf32> to vector<8x256xf32>
    %122 = vector.shape_cast %119 : vector<8x256xf32> to vector<1x1x8x256xf32>
    tpu.vector_store %arg9[%c0_58, %c5, %c0_59, %c0_60], %122 {strides = array<i32>} : memref<1x8x8x256xf32, #tpu.memory_space<vmem>>, vector<1x1x8x256xf32>,
    %cst_61 = arith.constant dense<0.000000e+00> : vector<8x4xf32>
    %123 = tpu.matmul %119, %107, %cst_61 {dimension_numbers = #tpu.dot_dimension_numbers<[1], [0], [0], [1], [0, 0, 1, 1], [], []>} : vector<8x256xf32>, vector<256x4xf32>, vector<8x4xf32> -> vector<8x4xf32>
    %124 = vector.extract_strided_slice %7 {offsets = [0, 24], sizes = [8, 4], strides = [1, 1]} : vector<8x32xf32> to vector<8x4xf32>
    %125 = vector.extract_strided_slice %8 {offsets = [0, 24], sizes = [256, 4], strides = [1, 1]} : vector<256x32xf32> to vector<256x4xf32>
    %126 = vector.extract_strided_slice %9 {offsets = [0, 24], sizes = [256, 4], strides = [1, 1]} : vector<256x32xf32> to vector<256x4xf32>
    %cst_62 = arith.constant dense<0.000000e+00> : vector<8x256xf32>
    %127 = tpu.matmul %124, %125, %cst_62 {dimension_numbers = #tpu.dot_dimension_numbers<[1], [1], [0], [0], [0, 0, 1, 0], [], []>} : vector<8x4xf32>, vector<256x4xf32>, vector<8x256xf32> -> vector<8x256xf32>
    %cst_63 = arith.constant 5.000000e-01 : f32
    %128 = vector.broadcast %cst_63 : f32 to vector<8x256xf32>
    %129 = arith.mulf %127, %128 : vector<8x256xf32>
    %cst_64 = arith.constant dense<0xFF800000> : vector<8xf32>
    %130 = vector.multi_reduction <maximumf>, %129, %cst_64 [1] : vector<8x256xf32> to vector<8xf32>
    %131 = vector.shape_cast %130 : vector<8xf32> to vector<8x1xf32>
    %132 = vector.broadcast %131 : vector<8x1xf32> to vector<8x256xf32>
    %133 = arith.subf %129, %132 : vector<8x256xf32>
    %134 = math.exp %133 : vector<8x256xf32>
    %cst_65 = arith.constant dense<0.000000e+00> : vector<8xf32>
    %135 = vector.multi_reduction <add>, %134, %cst_65 [1] : vector<8x256xf32> to vector<8xf32>
    %136 = vector.shape_cast %135 : vector<8xf32> to vector<8x1xf32>
    %137 = vector.broadcast %136 : vector<8x1xf32> to vector<8x256xf32>
    %138 = arith.divf %134, %137 : vector<8x256xf32>
    %c0_66 = arith.constant 0 : index
    %c6 = arith.constant 6 : index
    %c0_67 = arith.constant 0 : index
    %c0_68 = arith.constant 0 : index
    %139 = vector.load %arg9[%c0_66, %c6, %c0_67, %c0_68] : memref<1x8x8x256xf32, #tpu.memory_space<vmem>>, vector<1x1x8x256xf32>
    %140 = vector.shape_cast %139 : vector<1x1x8x256xf32> to vector<8x256xf32>
    %141 = vector.shape_cast %138 : vector<8x256xf32> to vector<1x1x8x256xf32>
    tpu.vector_store %arg9[%c0_66, %c6, %c0_67, %c0_68], %141 {strides = array<i32>} : memref<1x8x8x256xf32, #tpu.memory_space<vmem>>, vector<1x1x8x256xf32>,
    %cst_69 = arith.constant dense<0.000000e+00> : vector<8x4xf32>
    %142 = tpu.matmul %138, %126, %cst_69 {dimension_numbers = #tpu.dot_dimension_numbers<[1], [0], [0], [1], [0, 0, 1, 1], [], []>} : vector<8x256xf32>, vector<256x4xf32>, vector<8x4xf32> -> vector<8x4xf32>
    %143 = vector.extract_strided_slice %7 {offsets = [0, 28], sizes = [8, 4], strides = [1, 1]} : vector<8x32xf32> to vector<8x4xf32>
    %144 = vector.extract_strided_slice %8 {offsets = [0, 28], sizes = [256, 4], strides = [1, 1]} : vector<256x32xf32> to vector<256x4xf32>
    %145 = vector.extract_strided_slice %9 {offsets = [0, 28], sizes = [256, 4], strides = [1, 1]} : vector<256x32xf32> to vector<256x4xf32>
    %cst_70 = arith.constant dense<0.000000e+00> : vector<8x256xf32>
    %146 = tpu.matmul %143, %144, %cst_70 {dimension_numbers = #tpu.dot_dimension_numbers<[1], [1], [0], [0], [0, 0, 1, 0], [], []>} : vector<8x4xf32>, vector<256x4xf32>, vector<8x256xf32> -> vector<8x256xf32>
    %cst_71 = arith.constant 5.000000e-01 : f32
    %147 = vector.broadcast %cst_71 : f32 to vector<8x256xf32>
    %148 = arith.mulf %146, %147 : vector<8x256xf32>
    %cst_72 = arith.constant dense<0xFF800000> : vector<8xf32>
    %149 = vector.multi_reduction <maximumf>, %148, %cst_72 [1] : vector<8x256xf32> to vector<8xf32>
    %150 = vector.shape_cast %149 : vector<8xf32> to vector<8x1xf32>
    %151 = vector.broadcast %150 : vector<8x1xf32> to vector<8x256xf32>
    %152 = arith.subf %148, %151 : vector<8x256xf32>
    %153 = math.exp %152 : vector<8x256xf32>
    %cst_73 = arith.constant dense<0.000000e+00> : vector<8xf32>
    %154 = vector.multi_reduction <add>, %153, %cst_73 [1] : vector<8x256xf32> to vector<8xf32>
    %155 = vector.shape_cast %154 : vector<8xf32> to vector<8x1xf32>
    %156 = vector.broadcast %155 : vector<8x1xf32> to vector<8x256xf32>
    %157 = arith.divf %153, %156 : vector<8x256xf32>
    %c0_74 = arith.constant 0 : index
    %c7 = arith.constant 7 : index
    %c0_75 = arith.constant 0 : index
    %c0_76 = arith.constant 0 : index
    %158 = vector.load %arg9[%c0_74, %c7, %c0_75, %c0_76] : memref<1x8x8x256xf32, #tpu.memory_space<vmem>>, vector<1x1x8x256xf32>
    %159 = vector.shape_cast %158 : vector<1x1x8x256xf32> to vector<8x256xf32>
    %160 = vector.shape_cast %157 : vector<8x256xf32> to vector<1x1x8x256xf32>
    tpu.vector_store %arg9[%c0_74, %c7, %c0_75, %c0_76], %160 {strides = array<i32>} : memref<1x8x8x256xf32, #tpu.memory_space<vmem>>, vector<1x1x8x256xf32>,
    %cst_77 = arith.constant dense<0.000000e+00> : vector<8x4xf32>
    %161 = tpu.matmul %157, %145, %cst_77 {dimension_numbers = #tpu.dot_dimension_numbers<[1], [0], [0], [1], [0, 0, 1, 1], [], []>} : vector<8x256xf32>, vector<256x4xf32>, vector<8x4xf32> -> vector<8x4xf32>
    %162 = tpu.concatenate %28, %47, %66, %85, %104, %123, %142, %161 in 1 : vector<8x4xf32>, vector<8x4xf32>, vector<8x4xf32>, vector<8x4xf32>, vector<8x4xf32>, vector<8x4xf32>, vector<8x4xf32>, vector<8x4xf32> -> vector<8x32xf32>
    %c0_78 = arith.constant 0 : index
    %c0_79 = arith.constant 0 : index
    %163 = vector.load %arg6[%c0_78, %c0_79] : memref<32x32xf32, #tpu.memory_space<vmem>>, vector<32x32xf32>
    %cst_80 = arith.constant dense<0.000000e+00> : vector<8x32xf32>
    %164 = tpu.matmul %162, %163, %cst_80 {dimension_numbers = #tpu.dot_dimension_numbers<[1], [0], [0], [1], [0, 0, 1, 1], [], []>} : vector<8x32xf32>, vector<32x32xf32>, vector<8x32xf32> -> vector<8x32xf32>
    %c0_81 = arith.constant 0 : index
    %c0_82 = arith.constant 0 : index
    %165 = vector.load %arg7[%c0_81, %c0_82] : memref<1x32xf32, #tpu.memory_space<vmem>>, vector<1x32xf32>
    %166 = vector.broadcast %165 : vector<1x32xf32> to vector<8x32xf32>
    %167 = arith.addf %164, %166 : vector<8x32xf32>
    %c0_83 = arith.constant 0 : index
    %c0_84 = arith.constant 0 : index
    %c0_85 = arith.constant 0 : index
    %168 = vector.load %arg8[%c0_83, %c0_84, %c0_85] : memref<1x8x32xf32, #tpu.memory_space<vmem>>, vector<1x8x32xf32>
    %169 = vector.shape_cast %168 : vector<1x8x32xf32> to vector<8x32xf32>
    %170 = vector.shape_cast %167 : vector<8x32xf32> to vector<1x8x32xf32>
    tpu.vector_store %arg8[%c0_83, %c0_84, %c0_85], %170 {strides = array<i32>} : memref<1x8x32xf32, #tpu.memory_space<vmem>>, vector<1x8x32xf32>,
    return
  }
  func.func @transform_0(%arg0: i32) -> (i32, i32, i32) {
    %c0_i32 = arith.constant 0 : i32
    %c0_i32_0 = arith.constant 0 : i32
    %c0_i32_1 = arith.constant 0 : i32
    return %arg0, %c0_i32, %c0_i32_0 : i32, i32, i32
  }
  func.func @transform_1(%arg0: i32) -> (i32, i32, i32) {
    %c0_i32 = arith.constant 0 : i32
    %c0_i32_0 = arith.constant 0 : i32
    %c0_i32_1 = arith.constant 0 : i32
    return %arg0, %c0_i32, %c0_i32_0 : i32, i32, i32
  }
  func.func @transform_2(%arg0: i32) -> (i32, i32) {
    %c0_i32 = arith.constant 0 : i32
    %c0_i32_0 = arith.constant 0 : i32
    %c0_i32_1 = arith.constant 0 : i32
    return %c0_i32, %c0_i32_0 : i32, i32
  }
  func.func @transform_3(%arg0: i32) -> (i32, i32) {
    %c0_i32 = arith.constant 0 : i32
    %c0_i32_0 = arith.constant 0 : i32
    %c0_i32_1 = arith.constant 0 : i32
    return %c0_i32, %c0_i32_0 : i32, i32
  }
  func.func @transform_4(%arg0: i32) -> (i32, i32) {
    %c0_i32 = arith.constant 0 : i32
    %c0_i32_0 = arith.constant 0 : i32
    %c0_i32_1 = arith.constant 0 : i32
    return %c0_i32, %c0_i32_0 : i32, i32
  }
  func.func @transform_5(%arg0: i32) -> (i32, i32) {
    %c0_i32 = arith.constant 0 : i32
    %c0_i32_0 = arith.constant 0 : i32
    %c0_i32_1 = arith.constant 0 : i32
    return %c0_i32, %c0_i32_0 : i32, i32
  }
  func.func @transform_6(%arg0: i32) -> (i32, i32) {
    %c0_i32 = arith.constant 0 : i32
    %c0_i32_0 = arith.constant 0 : i32
    %c0_i32_1 = arith.constant 0 : i32
    return %c0_i32, %c0_i32_0 : i32, i32
  }
  func.func @transform_7(%arg0: i32) -> (i32, i32, i32) {
    %c0_i32 = arith.constant 0 : i32
    %c0_i32_0 = arith.constant 0 : i32
    %c0_i32_1 = arith.constant 0 : i32
    return %arg0, %c0_i32, %c0_i32_0 : i32, i32, i32
  }
  func.func @transform_8(%arg0: i32) -> (i32, i32, i32, i32) {
    %c0_i32 = arith.constant 0 : i32
    %c0_i32_0 = arith.constant 0 : i32
    %c0_i32_1 = arith.constant 0 : i32
    %c0_i32_2 = arith.constant 0 : i32
    return %arg0, %c0_i32, %c0_i32_0, %c0_i32_1 : i32, i32, i32, i32
  }
}

</mosaic_0001>

<bundles_post_ra>
// kernel: attention_forward.1
= control target key start
LH: loop header
LB: loop body
LE: loop exit
PB: predicated region body
PF: predicated region fallthrough
CT: control target
= control target key end

     0   :  { %s6895_s0 = inlined_call_operand.vmem [shape: f32[2,256,32], index: 0, kind: input, shape index: {}]   ;;  %s6896_s1 = inlined_call_operand.vmem [shape: f32[2,8,32], index: 1, kind: input, shape index: {}]   ;;  %s6897_s2 = inlined_call_operand.vmem [shape: f32[32,32], index: 2, kind: input, shape index: {}]   ;;  %s6898_s3 = inlined_call_operand.vmem [shape: f32[32,32], index: 3, kind: input, shape index: {}]   ;;  %s6899_s4 = inlined_call_operand.vmem [shape: f32[32,32], index: 4, kind: input, shape index: {}]   ;;  %s6900_s5 = inlined_call_operand.vmem [shape: f32[32,32], index: 5, kind: input, shape index: {}]   ;;  %s6901_s6 = inlined_call_operand.vmem [shape: f32[1,32], index: 6, kind: input, shape index: {}]   ;;  %s6902_s7 = inlined_call_operand.hbm [shape: f32[2,8,32], index: 7, kind: output, shape index: {0}]   ;;  %s6903_s8 = inlined_call_operand.hbm [shape: f32[2,8,8,256], index: 8, kind: output, shape index: {1}]  }
   0x1   :  { %7054 = sst [smem:[#allocation79_spill]] %s6895_s0 }
   0x2   :  { %7055 = sst [smem:[#allocation80_spill]] %s6896_s1 }
   0x3   :  { %7056 = sst [smem:[#allocation81_spill]] %s6897_s2 }
   0x4   :  { %14 = vsyncpa [#allocation3], 0 }
   0x5   :  { %16 = vsyncpa [#allocation3 + $0x1], 0 }
   0x6   :  { %17 = vsyncpa [#allocation5], 0 }
   0x7   :  { %19 = vsyncpa [#allocation5 + $0x1], 0  ;;  %s4763_s27 = smov 0   ;;  %s4765_s28 = smov 0  }
   0x8   :  { %s4767_s29 = smov 0   ;;  %s4769_s30 = smov 0  }
   0x9 LB: > { %s4784_s9 = sadd.s32 4294967295, %s4701_s30   ;;  %s3569_s10 = sadd.s32 4294967294, %s4701_s30   ;;  %s4701_s30 = sphi %s4769_s30, %s7313_s30   ;;  %s4697_s29 = sphi %s4767_s29, %s7312_s29   ;;  %s4693_s28 = sphi %s4765_s28, %s7311_s28   ;;  %s4689_s27 = sphi %s4763_s27, %s7310_s27  }
   0xa   : > { %s4788_s11 = sadd.s32 1, %s4701_s30   ;;  %s189_s12 = sadd.s32 1, %s4697_s29 }
   0xb   : > { %s186_s13 = ssub.s32 %s4701_s30, %s4788_s11  ;;  %p199_p0 = scmp.ne.s32.totalorder %s4697_s29, %s4693_s28 }
   0xc   : > { %p187_p1 = scmp.eq.s32.totalorder %s186_s13, 0  ;;  %p200_p2 = scmp.eq.s32.totalorder %s4784_s9, 1 }
   0xd   : > { %p205_p3 = scmp.ne.s32.totalorder %s4693_s28, %s4689_s27  ;;  %p206_p4 = scmp.eq.s32.totalorder %s3569_s10, 1 }
   0xe   : > { %s4799_s14 = scalar_select %p187_p1, %s4697_s29, %s189_s12  }
   0xf   : > { %p4801_p5 = por %p200_p2, %p199_p0  ;;  %p4805_p6 = por %p206_p4, %p205_p3 }
  0x10   : > { %p3572_p7 = scmp.ge.s32.totalorder %s4701_s30, 1  ;;  %p280_p8 = scmp.lt.s32.totalorder %s4701_s30, 3 }
  0x12   : > { %p281_p9 = pnand %p3572_p7, %p280_p8 }
  0x14   : > { %284 = sbr.rel (%p281_p9) target bundleno = 3767 (0xeb7), region = 48 }
  0x19   : > { %v372_v0 = vld [vmem:[%s6898_s3 + $0x18] sm:$0xff]  ;;  %v371_v1 = vld [vmem:[%s6898_s3 + $0x10] sm:$0xff]  ;;  %p323_p10 = scmp.lt.s32.totalorder %s4784_s9, 1  ;;  %v370_v2 = vld [vmem:[%s6898_s3 + $0x8] sm:$0xff]  ;;  %s7059_s0 = sld [smem:[#allocation79_spill]]  ;;  %vm377_vm0 = vcmask 261120  }
  0x1a   : > { %509 = vmatpush.msra.mxu1 %v372_v0  ;;  %v369_v3 = vld [vmem:[%s6898_s3] sm:$0xff]  ;;  %s7060_s2 = sld [smem:[#allocation81_spill]]  ;;  %v376_v14 = vld [vmem:[%s6899_s4 + $0x18] sm:$0xff]  ;;  %v375_v16 = vld [vmem:[%s6899_s4 + $0x10] sm:$0xff]  ;;  %vm723_vm1 = vcmask 31744   ;;  %s5434_s12 = sand.u32 1, %s4693_s28  }
  0x1b   : > { %s324_s23 = scalar_select %p323_p10, %s4784_s9, 1  ;;  %v374_v17 = vld [vmem:[%s6899_s4 + $0x8] sm:$0xff]  ;;  %v373_v18 = vld [vmem:[%s6899_s4] sm:$0xff] }
  0x1c   : > { %510 = vmatpush.msra.mxu1 %v371_v1  ;;  %s7061_s1 = sld [smem:[#allocation80_spill]]  ;;  %s3574_s17 = sshll.u32 %s5434_s12, 7 }
  0x1d   : > { %s3937_s26 = sshll.u32 %s324_s23, 8  ;;  %s3577_s19 = sshll.u32 %s324_s23, 3 }
  0x1e   : > { %511 = vmatpush.msra.mxu1 %v370_v2  ;;  %s5444_s23 = scalar_lea.vmem [#allocation4], %s3574_s17  ;;  %s4706_s18 = smov 112  }
  0x1f   : > { %s4828_s13 = scalar_lea.vmem %s7059_s0, %s3937_s26  ;;  %s4703_s26 = smov 124  }
  0x20   : > { %v332_v4 = vld [vmem:[%s4828_s13] sm:$0xff]  ;;  %512 = vmatpush.msra.mxu1 %v369_v3  ;;  %v333_v5 = vld [vmem:[%s4828_s13 + $0x8] sm:$0xff]  ;;  %v334_v6 = vld [vmem:[%s4828_s13 + $0x10] sm:$0xff]  ;;  %s4708_s20 = smov 104   ;;  %s4709_s21 = smov 100  }
  0x21   : > { %3579 = vmatmul.msk.f32.vlgmr.msra.gmra.mxu1 %vm377_vm0, %v332_v4  ;;  %v335_v7 = vld [vmem:[%s4828_s13 + $0x18] sm:$0xff]  ;;  %v336_v9 = vld [vmem:[%s4828_s13 + $0x20] sm:$0xff]  ;;  %v367_v10 = vld [vmem:[%s7060_s2 + $0x10] sm:$0xff]  ;;  %s4710_s22 = smov 8   ;;  %s4711_s24 = smov 20  }
  0x22   : > { %v368_v8 = vld [vmem:[%s7060_s2 + $0x18] sm:$0xff]  ;;  %v366_v11 = vld [vmem:[%s7060_s2 + $0x8] sm:$0xff]  ;;  %s331_s10 = scalar_lea.vmem %s7061_s1, %s3577_s19  ;;  %v365_v12 = vld [vmem:[%s7060_s2] sm:$0xff]  ;;  %s4707_s19 = smov 108  }
  0x23   : > { %393 = vmatpush.msra.mxu2 %v368_v8  ;;  %v364_v13 = vld [vmem:[%s331_s10] sm:$0xff]  ;;  %v337_v15 = vld [vmem:[%s4828_s13 + $0x28] sm:$0xff]  ;;  %v338_v19 = vld [vmem:[%s4828_s13 + $0x30] sm:$0xff]  ;;  %s4705_s10 = smov 116   ;;  %s4712_s25 = smov 4  }
  0x24   : > { %v339_v20 = vld [vmem:[%s4828_s13 + $0x38] sm:$0xff]  ;;  %v340_v21 = vld [vmem:[%s4828_s13 + $0x40] sm:$0xff]  ;;  %v341_v22 = vld [vmem:[%s4828_s13 + $0x48] sm:$0xff]  ;;  %s4627_s0 = scalar_lea.hbm %s6903_s8, 256 }
  0x25   : > { %394 = vmatpush.msra.mxu2 %v367_v10  ;;  %v342_v23 = vld [vmem:[%s4828_s13 + $0x50] sm:$0xff]  ;;  %v343_v24 = vld [vmem:[%s4828_s13 + $0x58] sm:$0xff]  ;;  %v344_v25 = vld [vmem:[%s4828_s13 + $0x60] sm:$0xff] }
  0x26   : > { %v345_v26 = vld [vmem:[%s4828_s13 + $0x68] sm:$0xff]  ;;  %v346_v27 = vld [vmem:[%s4828_s13 + $0x70] sm:$0xff]  ;;  %v347_v28 = vld [vmem:[%s4828_s13 + $0x78] sm:$0xff] }
  0x27   : > { %395 = vmatpush.msra.mxu2 %v366_v11  ;;  %v348_v30 = vld [vmem:[%s4828_s13 + $0x80] sm:$0xff]  ;;  %v349_v32 = vld [vmem:[%s4828_s13 + $0x88] sm:$0xff]  ;;  %v350_v34 = vld [vmem:[%s4828_s13 + $0x90] sm:$0xff] }
  0x28   : > { %v351_v36 = vld [vmem:[%s4828_s13 + $0x98] sm:$0xff]  ;;  %v352_v38 = vld [vmem:[%s4828_s13 + $0xa0] sm:$0xff]  ;;  %v353_v40 = vld [vmem:[%s4828_s13 + $0xa8] sm:$0xff] }
  0x29   : > { %3580 = vmatmul.msk.f32.gmra.mxu1 %vm377_vm0, %v333_v5  ;;  %396 = vmatpush.msra.mxu2 %v365_v12  ;;  %v354_v43 = vld [vmem:[%s4828_s13 + $0xb0] sm:$0xff]  ;;  %v355_v46 = vld [vmem:[%s4828_s13 + $0xb8] sm:$0xff]  ;;  %v356_v49 = vld [vmem:[%s4828_s13 + $0xc0] sm:$0xff] }
  0x2a   : > { %3578 = vmatmul.msk.f32.vlgmr.msra.gmra.mxu2 %vm377_vm0, %v364_v13  ;;  %v357_v52 = vld [vmem:[%s4828_s13 + $0xc8] sm:$0xff]  ;;  %v358_v55 = vld [vmem:[%s4828_s13 + $0xd0] sm:$0xff]  ;;  %v359_v58 = vld [vmem:[%s4828_s13 + $0xd8] sm:$0xff] }
  0x2b   : > { %622 = vmatpush.msrb.mxu2 %v376_v14  ;;  %v360_v61 = vld [vmem:[%s4828_s13 + $0xe0] sm:$0xff]  ;;  %v361_v0 = vld [vmem:[%s4828_s13 + $0xe8] sm:$0xff]  ;;  %v362_v3 = vld [vmem:[%s4828_s13 + $0xf0] sm:$0xff] }
  0x2d   : > { %623 = vmatpush.msrb.mxu2 %v375_v16 }
  0x2f   : > { %624 = vmatpush.msrb.mxu2 %v374_v17 }
  0x31   : > { %3581 = vmatmul.msk.f32.gmra.mxu1 %vm377_vm0, %v334_v6  ;;  %625 = vmatpush.msrb.mxu2 %v373_v18 }
  0x32   : > { %3611 = vmatmul.msk.f32.vlgmr.msrb.gmra.mxu2 %vm377_vm0, %v332_v4 }
  0x39   : > { %3582 = vmatmul.msk.f32.gmra.mxu1 %vm377_vm0, %v335_v7 }
  0x3a   : > { %3612 = vmatmul.msk.f32.gmra.mxu2 %vm377_vm0, %v333_v5 }
  0x41   : > { %3583 = vmatmul.msk.f32.gmra.mxu1 %vm377_vm0, %v336_v9 }
  0x42   : > { %3613 = vmatmul.msk.f32.gmra.mxu2 %vm377_vm0, %v334_v6  ;;  %v363_v6 = vld [vmem:[%s4828_s13 + $0xf8] sm:$0xff]  ;;  %s4704_s13 = smov 120  }
  0x49   : > { %3584 = vmatmul.msk.f32.gmra.mxu1 %vm377_vm0, %v337_v15 }
  0x4a   : > { %3614 = vmatmul.msk.f32.gmra.mxu2 %vm377_vm0, %v335_v7 }
  0x51   : > { %3585 = vmatmul.msk.f32.gmra.mxu1 %vm377_vm0, %v338_v19 }
  0x52   : > { %3615 = vmatmul.msk.f32.gmra.mxu2 %vm377_vm0, %v336_v9 }
  0x59   : > { %3586 = vmatmul.msk.f32.gmra.mxu1 %vm377_vm0, %v339_v20 }
  0x5a   : > { %3616 = vmatmul.msk.f32.gmra.mxu2 %vm377_vm0, %v337_v15 }
  0x61   : > { %3587 = vmatmul.msk.f32.gmra.mxu1 %vm377_vm0, %v340_v21 }
  0x62   : > { %3617 = vmatmul.msk.f32.gmra.mxu2 %vm377_vm0, %v338_v19 }
  0x69   : > { %3588 = vmatmul.msk.f32.gmra.mxu1 %vm377_vm0, %v341_v22 }
  0x6a   : > { %3618 = vmatmul.msk.f32.gmra.mxu2 %vm377_vm0, %v339_v20 }
  0x71   : > { %3589 = vmatmul.msk.f32.gmra.mxu1 %vm377_vm0, %v342_v23 }
  0x72   : > { %3619 = vmatmul.msk.f32.gmra.mxu2 %vm377_vm0, %v340_v21 }
  0x79   : > { %3590 = vmatmul.msk.f32.gmra.mxu1 %vm377_vm0, %v343_v24 }
  0x7a   : > { %3620 = vmatmul.msk.f32.gmra.mxu2 %vm377_vm0, %v341_v22 }
  0x81   : > { %3591 = vmatmul.msk.f32.gmra.mxu1 %vm377_vm0, %v344_v25 }
  0x82   : > { %3621 = vmatmul.msk.f32.gmra.mxu2 %vm377_vm0, %v342_v23 }
  0x89   : > { %3592 = vmatmul.msk.f32.gmra.mxu1 %vm377_vm0, %v345_v26 }
  0x8a   : > { %3622 = vmatmul.msk.f32.gmra.mxu2 %vm377_vm0, %v343_v24 }
  0x91   : > { %3593 = vmatmul.msk.f32.gmra.mxu1 %vm377_vm0, %v346_v27 }
  0x92   : > { %3623 = vmatmul.msk.f32.gmra.mxu2 %vm377_vm0, %v344_v25 }
  0x99   : > { %3594 = vmatmul.msk.f32.gmra.mxu1 %vm377_vm0, %v347_v28 }
  0x9a   : > { %3624 = vmatmul.msk.f32.gmra.mxu2 %vm377_vm0, %v345_v26 }
  0x9e   : > { %v4900_v29 = vpop.f32.mrf.mxu1 }
  0x9f   : > { %7062 = vst [vmem:[#allocation8_spill] sm:$0xff] %v4900_v29 }
  0xa1   : > { %3595 = vmatmul.msk.f32.gmra.mxu1 %vm377_vm0, %v348_v30 }
  0xa2   : > { %3625 = vmatmul.msk.f32.gmra.mxu2 %vm377_vm0, %v346_v27 }
  0xa6   : > { %v4905_v31 = vpop.f32.mrf.mxu1 }
  0xa7   : > { %7063 = vst [vmem:[#allocation9_spill] sm:$0xff] %v4905_v31 }
  0xa9   : > { %3596 = vmatmul.msk.f32.gmra.mxu1 %vm377_vm0, %v349_v32 }
  0xaa   : > { %3626 = vmatmul.msk.f32.gmra.mxu2 %vm377_vm0, %v347_v28 }
  0xad   : > { %v4930_v41 = vpop.f32.mrf.mxu2 }
  0xae   : > { %v4910_v33 = vpop.f32.mrf.mxu1  ;;  %7067 = vst [vmem:[#allocation13_spill] sm:$0xff] %v4930_v41 }
  0xaf   : > { %7064 = vst [vmem:[#allocation10_spill] sm:$0xff] %v4910_v33 }
  0xb1   : > { %3597 = vmatmul.msk.f32.gmra.mxu1 %vm377_vm0, %v350_v34 }
  0xb2   : > { %3627 = vmatmul.msk.f32.gmra.mxu2 %vm377_vm0, %v348_v30 }
  0xb5   : > { %v4937_v44 = vpop.f32.mrf.mxu2 }
  0xb6   : > { %v4915_v35 = vpop.f32.mrf.mxu1 }
  0xb7   : > { %7065 = vst [vmem:[#allocation11_spill] sm:$0xff] %v4915_v35 }
  0xb9   : > { %3598 = vmatmul.msk.f32.gmra.mxu1 %vm377_vm0, %v351_v36 }
  0xba   : > { %3628 = vmatmul.msk.f32.gmra.mxu2 %vm377_vm0, %v349_v32 }
  0xbd   : > { %v4946_v47 = vpop.f32.mrf.mxu2 }
  0xbe   : > { %v4920_v37 = vpop.f32.mrf.mxu1 }
  0xc1   : > { %3599 = vmatmul.msk.f32.gmra.mxu1 %vm377_vm0, %v352_v38 }
  0xc2   : > { %3629 = vmatmul.msk.f32.gmra.mxu2 %vm377_vm0, %v350_v34 }
  0xc5   : > { %v4955_v50 = vpop.f32.mrf.mxu2 }
  0xc6   : > { %v4925_v39 = vpop.f32.mrf.mxu1 }
  0xc7   : > { %7066 = vst [vmem:[#allocation12_spill] sm:$0xff] %v4925_v39 }
  0xc9   : > { %3600 = vmatmul.msk.f32.gmra.mxu1 %vm377_vm0, %v353_v40 }
  0xca   : > { %3630 = vmatmul.msk.f32.gmra.mxu2 %vm377_vm0, %v351_v36 }
  0xcd   : > { %v4964_v53 = vpop.f32.mrf.mxu2 }
  0xce   : > { %v4932_v42 = vpop.f32.mrf.mxu1  ;;  %7071 = vst [vmem:[#allocation17_spill] sm:$0xff] %v4964_v53 }
  0xcf   : > { %7068 = vst [vmem:[#allocation14_spill] sm:$0xff] %v4932_v42 }
  0xd1   : > { %3601 = vmatmul.msk.f32.gmra.mxu1 %vm377_vm0, %v354_v43 }
  0xd2   : > { %3631 = vmatmul.msk.f32.gmra.mxu2 %vm377_vm0, %v352_v38 }
  0xd5   : > { %v4973_v56 = vpop.f32.mrf.mxu2 }
  0xd6   : > { %v4939_v45 = vpop.f32.mrf.mxu1  ;;  %7073 = vst [vmem:[#allocation19_spill] sm:$0xff] %v4973_v56 }
  0xd7   : > { %7069 = vst [vmem:[#allocation15_spill] sm:$0xff] %v4939_v45  ;;  %951 = vrot.lane.b32.xlu0 %v4939_v45, %s4703_s26 }
  0xd9   : > { %3602 = vmatmul.msk.f32.gmra.mxu1 %vm377_vm0, %v355_v46 }
  0xda   : > { %3632 = vmatmul.msk.f32.gmra.mxu2 %vm377_vm0, %v353_v40 }
  0xdd   : > { %v4982_v59 = vpop.f32.mrf.mxu2 }
  0xde   : > { %v4948_v48 = vpop.f32.mrf.mxu1  ;;  %7075 = vst [vmem:[#allocation21_spill] sm:$0xff] %v4982_v59 }
  0xdf   : > { %7070 = vst [vmem:[#allocation16_spill] sm:$0xff] %v4948_v48  ;;  %953 = vrot.lane.b32.xlu1 %v4948_v48, %s4703_s26 }
  0xe1   : > { %3603 = vmatmul.msk.f32.gmra.mxu1 %vm377_vm0, %v356_v49 }
  0xe2   : > { %3633 = vmatmul.msk.f32.gmra.mxu2 %vm377_vm0, %v354_v43 }
  0xe5   : > { %v4991_v62 = vpop.f32.mrf.mxu2 }
  0xe6   : > { %v4957_v51 = vpop.f32.mrf.mxu1  ;;  %7077 = vst [vmem:[#allocation23_spill] sm:$0xff] %v4991_v62 }
  0xe7   : > { %955 = vrot.lane.b32.xlu2 %v4957_v51, %s4703_s26 }
  0xe9   : > { %3604 = vmatmul.msk.f32.gmra.mxu1 %vm377_vm0, %v357_v52 }
  0xea   : > { %3634 = vmatmul.msk.f32.gmra.mxu2 %vm377_vm0, %v355_v46 }
  0xed   : > { %v5000_v1 = vpop.f32.mrf.mxu2 }
  0xee   : > { %v4966_v54 = vpop.f32.mrf.mxu1 }
  0xef   : > { %7072 = vst [vmem:[#allocation18_spill] sm:$0xff] %v4966_v54  ;;  %957 = vrot.lane.b32.xlu0 %v4966_v54, %s4703_s26 }
  0xf1   : > { %3605 = vmatmul.msk.f32.gmra.mxu1 %vm377_vm0, %v358_v55 }
  0xf2   : > { %3635 = vmatmul.msk.f32.gmra.mxu2 %vm377_vm0, %v356_v49 }
  0xf5   : > { %v5009_v4 = vpop.f32.mrf.mxu2 }
  0xf6   : > { %v4975_v57 = vpop.f32.mrf.mxu1  ;;  %7080 = vst [vmem:[#allocation26_spill] sm:$0xff] %v5009_v4 }
  0xf7   : > { %7074 = vst [vmem:[#allocation20_spill] sm:$0xff] %v4975_v57  ;;  %959 = vrot.lane.b32.xlu1 %v4975_v57, %s4703_s26 }
  0xf9   : > { %3606 = vmatmul.msk.f32.gmra.mxu1 %vm377_vm0, %v359_v58 }
  0xfa   : > { %3636 = vmatmul.msk.f32.gmra.mxu2 %vm377_vm0, %v357_v52 }
  0xfd   : > { %v5020_v7 = vpop.f32.mrf.mxu2 }
  0xfe   : > { %v4984_v60 = vpop.f32.mrf.mxu1 }
  0xff   : > { %7076 = vst [vmem:[#allocation22_spill] sm:$0xff] %v4984_v60  ;;  %961 = vrot.lane.b32.xlu1 %v4984_v60, %s4703_s26 }
 0x101   : > { %3607 = vmatmul.msk.f32.gmra.mxu1 %vm377_vm0, %v360_v61 }
 0x102   : > { %3637 = vmatmul.msk.f32.gmra.mxu2 %vm377_vm0, %v358_v55 }
 0x105   : > { %v5029_v9 = vpop.f32.mrf.mxu2 }
 0x106   : > { %v4993_v63 = vpop.f32.mrf.mxu1  ;;  %7083 = vst [vmem:[#allocation29_spill] sm:$0xff] %v5029_v9 }
 0x107   : > { %7078 = vst [vmem:[#allocation24_spill] sm:$0xff] %v4993_v63  ;;  %963 = vrot.lane.b32.xlu2 %v4993_v63, %s4703_s26 }
 0x109   : > { %3608 = vmatmul.msk.f32.gmra.mxu1 %vm377_vm0, %v361_v0 }
 0x10a   : > { %3638 = vmatmul.msk.f32.gmra.mxu2 %vm377_vm0, %v359_v58 }
 0x10d   : > { %v5038_v11 = vpop.f32.mrf.mxu2 }
 0x10e   : > { %v5002_v2 = vpop.f32.mrf.mxu1  ;;  %7085 = vst [vmem:[#allocation31_spill] sm:$0xff] %v5038_v11 }
 0x10f   : > { %7079 = vst [vmem:[#allocation25_spill] sm:$0xff] %v5002_v2  ;;  %965 = vrot.lane.b32.xlu1 %v5002_v2, %s4703_s26 }
 0x111   : > { %3609 = vmatmul.msk.f32.gmra.mxu1 %vm377_vm0, %v362_v3 }
 0x112   : > { %3639 = vmatmul.msk.f32.gmra.mxu2 %vm377_vm0, %v360_v61 }
 0x115   : > { %v5047_v13 = vpop.f32.mrf.mxu2 }
 0x116   : > { %v5011_v5 = vpop.f32.mrf.mxu1  ;;  %7086 = vst [vmem:[#allocation32_spill] sm:$0xff] %v5047_v13 }
 0x117   : > { %7081 = vst [vmem:[#allocation27_spill] sm:$0xff] %v5011_v5  ;;  %967 = vrot.lane.b32.xlu0 %v5011_v5, %s4703_s26  ;;  %3643 = vmatpush.xpose.msk.msra.mxu3 %vm723_vm1, %v5011_v5 }
 0x119   : > { %3610 = vmatmul.msk.f32.gmra.mxu1 %vm377_vm0, %v363_v6 }
 0x11a   : > { %3640 = vmatmul.msk.f32.gmra.mxu2 %vm377_vm0, %v361_v0 }
 0x11b   : > { %3644 = vmatpush.xpose.msk.msra.mxu3 %vm723_vm1, %v5002_v2 }
 0x11d   : > { %v5056_v15 = vpop.f32.mrf.mxu2 }
 0x11e   : > { %v5024_v8 = vpop.f32.mrf.mxu1  ;;  %7088 = vst [vmem:[#allocation34_spill] sm:$0xff] %v5056_v15 }
 0x11f   : > { %7082 = vst [vmem:[#allocation28_spill] sm:$0xff] %v5024_v8  ;;  %3645 = vmatpush.xpose.msk.msra.mxu3 %vm723_vm1, %v4993_v63 }
 0x122   : > { %3641 = vmatmul.msk.f32.gmra.mxu2 %vm377_vm0, %v362_v3 }
 0x123   : > { %3646 = vmatpush.xpose.msk.msra.mxu3 %vm723_vm1, %v4984_v60 }
 0x125   : > { %v5065_v17 = vpop.f32.mrf.mxu2 }
 0x126   : > { %v5033_v10 = vpop.f32.mrf.mxu1  ;;  %7090 = vst [vmem:[#allocation36_spill] sm:$0xff] %v5065_v17 }
 0x127   : > { %7084 = vst [vmem:[#allocation30_spill] sm:$0xff] %v5033_v10  ;;  %3647 = vmatpush.xpose.msk.msra.mxu3 %vm723_vm1, %v4975_v57 }
 0x12a   : > { %3642 = vmatmul.msk.f32.gmra.mxu2 %vm377_vm0, %v363_v6 }
 0x12b   : > { %3648 = vmatpush.xpose.msk.msra.mxu3 %vm723_vm1, %v4966_v54 }
 0x12d   : > { %v5074_v19 = vpop.f32.mrf.mxu2 }
 0x12e   : > { %v5042_v12 = vpop.f32.mrf.mxu1  ;;  %7092 = vst [vmem:[#allocation38_spill] sm:$0xff] %v5074_v19 }
 0x12f   : > { %3649 = vmatpush.xpose.msk.msra.mxu3 %vm723_vm1, %v4957_v51 }
 0x133   : > { %3650 = vmatpush.xpose.msk.msra.mxu3 %vm723_vm1, %v4948_v48 }
 0x135   : > { %v5082_v21 = vpop.f32.mrf.mxu2 }
 0x136   : > { %v5051_v14 = vpop.f32.mrf.mxu1 }
 0x137   : > { %7087 = vst [vmem:[#allocation33_spill] sm:$0xff] %v5051_v14  ;;  %3651 = vmatpush.xpose.msk.msra.mxu3 %vm723_vm1, %v4939_v45 }
 0x13b   : > { %3652 = vmatpush.xpose.msk.msra.mxu3 %vm723_vm1, %v4932_v42 }
 0x13d   : > { %v5094_v23 = vpop.f32.mrf.mxu2 }
 0x13e   : > { %v5060_v16 = vpop.f32.mrf.mxu1  ;;  %7095 = vst [vmem:[#allocation41_spill] sm:$0xff] %v5094_v23 }
 0x13f   : > { %7089 = vst [vmem:[#allocation35_spill] sm:$0xff] %v5060_v16  ;;  %3653 = vmatpush.xpose.msk.msra.mxu3 %vm723_vm1, %v4925_v39 }
 0x141   : > { %v956_v58 = vpop.permute.xlu2 %955 }
 0x143   : > { %3654 = vmatpush.xpose.msk.msra.mxu3 %vm723_vm1, %v4920_v37 }
 0x145   : > { %v5102_v25 = vpop.f32.mrf.mxu2 }
 0x146   : > { %v5069_v18 = vpop.f32.mrf.mxu1  ;;  %7097 = vst [vmem:[#allocation43_spill] sm:$0xff] %v5102_v25 }
 0x147   : > { %7091 = vst [vmem:[#allocation37_spill] sm:$0xff] %v5069_v18  ;;  %3655 = vmatpush.xpose.msk.msra.mxu3 %vm723_vm1, %v4915_v35 }
 0x149   : > { %v952_v36 = vpop.permute.xlu0 %951 }
 0x14b   : > { %3656 = vmatpush.xpose.msk.msra.mxu3 %vm723_vm1, %v4910_v33 }
 0x14d   : > { %v5112_v27 = vpop.f32.mrf.mxu2 }
 0x14e   : > { %v5078_v20 = vpop.f32.mrf.mxu1 }
 0x14f   : > { %7093 = vst [vmem:[#allocation39_spill] sm:$0xff] %v5078_v20  ;;  %3657 = vmatpush.xpose.msk.msra.mxu3 %vm723_vm1, %v4905_v31 }
 0x151   : > { %v954_v32 = vpop.permute.xlu1 %953 }
 0x153   : > { %3658 = vmatpush.xpose.msk.msra.mxu3 %vm723_vm1, %v4900_v29 }
 0x155   : > { %v5122_v30 = vpop.f32.mrf.mxu2 }
 0x156   : > { %v5087_v22 = vpop.f32.mrf.mxu1  ;;  %3659 = vmatmul.msk.f32.vlgmr.msra.gmra.mxu3 %vm723_vm1, %v4930_v41 }
 0x157   : > { %895 = vmatpush.msrb.mxu3 %v5074_v19  ;;  %7094 = vst [vmem:[#allocation40_spill] sm:$0xff] %v5087_v22 }
 0x159   : > { %896 = vmatpush.msrb.mxu3 %v5065_v17 }
 0x15b   : > { %897 = vmatpush.msrb.mxu3 %v5056_v15 }
 0x15d   : > { %898 = vmatpush.msrb.mxu3 %v5047_v13  ;;  %v5130_v38 = vpop.f32.mrf.mxu2 }
 0x15e   : > { %v5097_v24 = vpop.f32.mrf.mxu1 }
 0x15f   : > { %899 = vmatpush.msrb.mxu3 %v5038_v11  ;;  %7096 = vst [vmem:[#allocation42_spill] sm:$0xff] %v5097_v24 }
 0x161   : > { %900 = vmatpush.msrb.mxu3 %v5029_v9  ;;  %v958_v46 = vpop.permute.xlu0 %957 }
 0x163   : > { %901 = vmatpush.msrb.mxu3 %v5020_v7 }
 0x165   : > { %902 = vmatpush.msrb.mxu3 %v5009_v4  ;;  %v5136_v49 = vpop.f32.mrf.mxu2 }
 0x166   : > { %v5105_v26 = vpop.f32.mrf.mxu1  ;;  %7102 = vst [vmem:[#allocation48_spill] sm:$0xff] %v5136_v49 }
 0x167   : > { %903 = vmatpush.msrb.mxu3 %v5000_v1  ;;  %7098 = vst [vmem:[#allocation44_spill] sm:$0xff] %v5105_v26  ;;  %987 = vrot.lane.b32.xlu2 %v5105_v26, %s4703_s26 }
 0x169   : > { %904 = vmatpush.msrb.mxu3 %v4991_v62  ;;  %v960_v40 = vpop.permute.xlu1 %959 }
 0x16b   : > { %905 = vmatpush.msrb.mxu3 %v4982_v59 }
 0x16d   : > { %906 = vmatpush.msrb.mxu3 %v4973_v56  ;;  %v5143_v0 = vpop.f32.mrf.mxu2  ;;  %v964_v56 = vpop.permute.xlu2 %963 }
 0x16e   : > { %v5115_v28 = vpop.f32.mrf.mxu1 }
 0x16f   : > { %907 = vmatpush.msrb.mxu3 %v4964_v53  ;;  %7099 = vst [vmem:[#allocation45_spill] sm:$0xff] %v5115_v28  ;;  %989 = vrot.lane.b32.xlu0 %v5115_v28, %s4703_s26 }
 0x171   : > { %908 = vmatpush.msrb.mxu3 %v4955_v50  ;;  %v962_v52 = vpop.permute.xlu1 %961 }
 0x173   : > { %909 = vmatpush.msrb.mxu3 %v4946_v47 }
 0x175   : > { %910 = vmatpush.msrb.mxu3 %v4937_v44  ;;  %v5151_v59 = vpop.f32.mrf.mxu2 }
 0x176   : > { %v5124_v34 = vpop.f32.mrf.mxu1  ;;  %7105 = vst [vmem:[#allocation51_spill] sm:$0xff] %v5151_v59 }
 0x177   : > { %7100 = vst [vmem:[#allocation46_spill] sm:$0xff] %v5124_v34  ;;  %949 = vrot.lane.b32.xlu0 %v4932_v42, %s4703_s26  ;;  %991 = vrot.lane.b32.xlu1 %v5124_v34, %s4703_s26 }
 0x17e   : > { %v5132_v43 = vpop.f32.mrf.mxu1 }
 0x17f   : > { %7101 = vst [vmem:[#allocation47_spill] sm:$0xff] %v5132_v43  ;;  %993 = vrot.lane.b32.xlu2 %v5132_v43, %s4703_s26 }
 0x181   : > { %v966_v3 = vpop.permute.xlu1 %965 }
 0x186   : > { %v5138_v55 = vpop.f32.mrf.mxu1 }
 0x187   : > { %7103 = vst [vmem:[#allocation49_spill] sm:$0xff] %v5138_v55  ;;  %995 = vrot.lane.b32.xlu2 %v5138_v55, %s4703_s26 }
 0x189   : > { %v968_v61 = vpop.permute.xlu0 %967 }
 0x18a   : > { %3677 = vmatpush.xpose.msk.msra.mxu3 %vm723_vm1, %v968_v61  ;;  %v5163_v61 = vpop.f32.mrf.mxu2 }
 0x18b   : > { %7107 = vst [vmem:[#allocation53_spill] sm:$0xff] %v5163_v61 }
 0x18e   : > { %v5145_v6 = vpop.f32.mrf.mxu1  ;;  %3678 = vmatpush.xpose.msk.msra.mxu3 %vm723_vm1, %v966_v3 }
 0x18f   : > { %7104 = vst [vmem:[#allocation50_spill] sm:$0xff] %v5145_v6  ;;  %997 = vrot.lane.b32.xlu2 %v5145_v6, %s4703_s26 }
 0x192   : > { %3679 = vmatpush.xpose.msk.msra.mxu3 %vm723_vm1, %v964_v56  ;;  %v5173_v56 = vpop.f32.mrf.mxu2 }
 0x193   : > { %7108 = vst [vmem:[#allocation54_spill] sm:$0xff] %v5173_v56 }
 0x196   : > { %v5153_v62 = vpop.f32.mrf.mxu1  ;;  %3680 = vmatpush.xpose.msk.msra.mxu3 %vm723_vm1, %v962_v52 }
 0x197   : > { %7106 = vst [vmem:[#allocation52_spill] sm:$0xff] %v5153_v62  ;;  %999 = vrot.lane.b32.xlu1 %v5153_v62, %s4703_s26  ;;  %3660 = vmatpush.xpose.msk.msra.mxu0 %vm723_vm1, %v5153_v62 }
 0x19a   : > { %3681 = vmatpush.xpose.msk.msra.mxu3 %vm723_vm1, %v960_v40  ;;  %v5183_v40 = vpop.f32.mrf.mxu2 }
 0x19b   : > { %3661 = vmatpush.xpose.msk.msra.mxu0 %vm723_vm1, %v5145_v6  ;;  %7109 = vst [vmem:[#allocation55_spill] sm:$0xff] %v5183_v40 }
 0x19e   : > { %3682 = vmatpush.xpose.msk.msra.mxu3 %vm723_vm1, %v958_v46 }
 0x19f   : > { %985 = vrot.lane.b32.xlu1 %v5097_v24, %s4703_s26  ;;  %3662 = vmatpush.xpose.msk.msra.mxu0 %vm723_vm1, %v5138_v55 }
 0x1a2   : > { %3683 = vmatpush.xpose.msk.msra.mxu3 %vm723_vm1, %v956_v58  ;;  %v5232_v58 = vpack.i.bf16 %v5065_v17, %v5074_v19 }
 0x1a3   : > { %3663 = vmatpush.xpose.msk.msra.mxu0 %vm723_vm1, %v5132_v43 }
 0x1a4   : > { %7114 = vst [vmem:[#allocation60_spill] sm:$0xff] %v5232_v58 }
 0x1a6   : > { %3684 = vmatpush.xpose.msk.msra.mxu3 %vm723_vm1, %v954_v32  ;;  %v5191_v32 = vpop.f32.mrf.mxu2 }
 0x1a7   : > { %983 = vrot.lane.b32.xlu1 %v5087_v22, %s4703_s26  ;;  %3664 = vmatpush.xpose.msk.msra.mxu0 %vm723_vm1, %v5124_v34  ;;  %7110 = vst [vmem:[#allocation56_spill] sm:$0xff] %v5191_v32 }
 0x1aa   : > { %3685 = vmatpush.xpose.msk.msra.mxu3 %vm723_vm1, %v952_v36 }
 0x1ab   : > { %3665 = vmatpush.xpose.msk.msra.mxu0 %vm723_vm1, %v5115_v28 }
 0x1ae   : > { %v5199_v36 = vpop.f32.mrf.mxu2 }
 0x1af   : > { %981 = vrot.lane.b32.xlu1 %v5078_v20, %s4703_s26  ;;  %3666 = vmatpush.xpose.msk.msra.mxu0 %vm723_vm1, %v5105_v26  ;;  %7111 = vst [vmem:[#allocation57_spill] sm:$0xff] %v5199_v36 }
 0x1b3   : > { %3667 = vmatpush.xpose.msk.msra.mxu0 %vm723_vm1, %v5097_v24 }
 0x1b6   : > { %v5211_v46 = vpop.f32.mrf.mxu2 }
 0x1b7   : > { %979 = vrot.lane.b32.xlu1 %v5069_v18, %s4703_s26  ;;  %3668 = vmatpush.xpose.msk.msra.mxu0 %vm723_vm1, %v5087_v22  ;;  %7112 = vst [vmem:[#allocation58_spill] sm:$0xff] %v5211_v46 }
 0x1bb   : > { %3669 = vmatpush.xpose.msk.msra.mxu0 %vm723_vm1, %v5078_v20 }
 0x1be   : > { %v5219_v52 = vpop.f32.mrf.mxu2 }
 0x1bf   : > { %977 = vrot.lane.b32.xlu1 %v5060_v16, %s4703_s26  ;;  %3670 = vmatpush.xpose.msk.msra.mxu0 %vm723_vm1, %v5069_v18  ;;  %7113 = vst [vmem:[#allocation59_spill] sm:$0xff] %v5219_v52 }
 0x1c3   : > { %3671 = vmatpush.xpose.msk.msra.mxu0 %vm723_vm1, %v5060_v16  ;;  %v5242_v16 = vpack.i.bf16 %v5029_v9, %v5211_v46 }
 0x1c5   : > { %7115 = vst [vmem:[#allocation61_spill] sm:$0xff] %v5242_v16 }
 0x1c7   : > { %975 = vrot.lane.b32.xlu1 %v5051_v14, %s4703_s26  ;;  %3672 = vmatpush.xpose.msk.msra.mxu0 %vm723_vm1, %v5051_v14 }
 0x1cb   : > { %3673 = vmatpush.xpose.msk.msra.mxu0 %vm723_vm1, %v5042_v12 }
 0x1cf   : > { %937 = vrot.lane.b32.xlu1 %v4900_v29, %s4703_s26  ;;  %3674 = vmatpush.xpose.msk.msra.mxu0 %vm723_vm1, %v5033_v10 }
 0x1d3   : > { %3675 = vmatpush.xpose.msk.msra.mxu0 %vm723_vm1, %v5024_v8 }
 0x1d6   : > { %3676 = vmatmul.msk.f32.vlgmr.msra.gmra.mxu0 %vm723_vm1, %v4930_v41 }
 0x1d7   : > { %915 = vmatpush.msrb.mxu0 %v5219_v52  ;;  %935 = vrot.lane.b32.xlu1 %v4930_v41, %s4703_s26 }
 0x1d9   : > { %916 = vmatpush.msrb.mxu0 %v5211_v46 }
 0x1db   : > { %917 = vmatpush.msrb.mxu0 %v5199_v36 }
 0x1dd   : > { %918 = vmatpush.msrb.mxu0 %v5191_v32 }
 0x1df   : > { %919 = vmatpush.msrb.mxu0 %v5183_v40  ;;  %3999 = vrot.lane.b32.xlu1 %v5232_v58, %s4703_s26  ;;  %v988_v58 = vpop.permute.xlu2 %987 }
 0x1e1   : > { %920 = vmatpush.msrb.mxu0 %v5173_v56  ;;  %v990_v3 = vpop.permute.xlu0 %989 }
 0x1e3   : > { %921 = vmatpush.msrb.mxu0 %v5163_v61 }
 0x1e5   : > { %922 = vmatpush.msrb.mxu0 %v5151_v59 }
 0x1e7   : > { %923 = vmatpush.msrb.mxu0 %v5143_v0  ;;  %4014 = vrot.lane.b32.xlu1 %v5242_v16, %s4703_s26  ;;  %v994_v16 = vpop.permute.xlu2 %993 }
 0x1e9   : > { %924 = vmatpush.msrb.mxu0 %v5136_v49  ;;  %v950_v17 = vpop.permute.xlu0 %949 }
 0x1ea   : > { %3686 = vmatpush.xpose.msk.msra.mxu3 %vm723_vm1, %v950_v17  ;;  %v992_v17 = vpop.permute.xlu1 %991 }
 0x1eb   : > { %925 = vmatpush.msrb.mxu0 %v5130_v38 }
 0x1ed   : > { %926 = vmatpush.msrb.mxu0 %v5122_v30 }
 0x1ef   : > { %927 = vmatpush.msrb.mxu0 %v5112_v27  ;;  %1358 = vrot.lane.b32.xlu1 %v5097_v24, %s4704_s13  ;;  %v996_v9 = vpop.permute.xlu2 %995 }
 0x1f1   : > { %928 = vmatpush.msrb.mxu0 %v5102_v25 }
 0x1f3   : > { %929 = vmatpush.msrb.mxu0 %v5094_v23 }
 0x1f5   : > { %930 = vmatpush.msrb.mxu0 %v5082_v21 }
 0x1f7   : > { %1322 = vrot.lane.b32.xlu1 %v4932_v42, %s4704_s13  ;;  %v998_v19 = vpop.permute.xlu2 %997 }
 0x1ff   : > { %1356 = vrot.lane.b32.xlu1 %v5087_v22, %s4704_s13 }
 0x207   : > { %1320 = vrot.lane.b32.xlu1 %v4925_v39, %s4704_s13 }
 0x209   : > { %v1000_v46 = vpop.permute.xlu1 %999 }
 0x20a   : > { %3694 = vmatpush.xpose.msk.msra.mxu0 %vm723_vm1, %v1000_v46  ;;  %v5275_v46 = vpack.i.bf16 %v4955_v50, %v5136_v49 }
 0x20c   : > { %7116 = vst [vmem:[#allocation62_spill] sm:$0xff] %v5275_v46 }
 0x20e   : > { %3695 = vmatpush.xpose.msk.msra.mxu0 %vm723_vm1, %v998_v19 }
 0x20f   : > { %1354 = vrot.lane.b32.xlu1 %v5078_v20, %s4704_s13 }
 0x211   : > { %v986_v24 = vpop.permute.xlu1 %985 }
 0x212   : > { %3696 = vmatpush.xpose.msk.msra.mxu0 %vm723_vm1, %v996_v9  ;;  %v5283_v9 = vpack.i.bf16 %v4946_v47, %v5130_v38 }
 0x214   : > { %7117 = vst [vmem:[#allocation63_spill] sm:$0xff] %v5283_v9 }
 0x216   : > { %3697 = vmatpush.xpose.msk.msra.mxu0 %vm723_vm1, %v994_v16 }
 0x217   : > { %1318 = vrot.lane.b32.xlu1 %v4920_v37, %s4704_s13 }
 0x219   : > { %v984_v42 = vpop.permute.xlu1 %983 }
 0x21a   : > { %3698 = vmatpush.xpose.msk.msra.mxu0 %vm723_vm1, %v992_v17 }
 0x21e   : > { %3699 = vmatpush.xpose.msk.msra.mxu0 %vm723_vm1, %v990_v3 }
 0x21f   : > { %4054 = vrot.lane.b32.xlu1 %v5275_v46, %s4703_s26 }
 0x221   : > { %v982_v19 = vpop.permute.xlu1 %981 }
 0x222   : > { %3700 = vmatpush.xpose.msk.msra.mxu0 %vm723_vm1, %v988_v58 }
 0x226   : > { %3701 = vmatpush.xpose.msk.msra.mxu0 %vm723_vm1, %v986_v24  ;;  %v840_v24 = vpop.f32.mrf.mxu3 }
 0x227   : > { %4059 = vrot.lane.b32.xlu1 %v5283_v9, %s4703_s26  ;;  %v863_v17 = vmul.f32 0.5, %v840_v24 }
 0x229   : > { %v980_v16 = vpop.permute.xlu1 %979 }
 0x22a   : > { %3702 = vmatpush.xpose.msk.msra.mxu0 %vm723_vm1, %v984_v42 }
 0x22e   : > { %3703 = vmatpush.xpose.msk.msra.mxu0 %vm723_vm1, %v982_v19 }
 0x22f   : > { %1314 = vrot.lane.b32.xlu1 %v4910_v33, %s4704_s13 }
 0x231   : > { %v978_v3 = vpop.permute.xlu1 %977 }
 0x232   : > { %3704 = vmatpush.xpose.msk.msra.mxu0 %vm723_vm1, %v980_v16 }
 0x236   : > { %3705 = vmatpush.xpose.msk.msra.mxu0 %vm723_vm1, %v978_v3  ;;  %v5323_v3 = vpack.i.bf16 %v5047_v13, %v5056_v15 }
 0x238   : > { %7118 = vst [vmem:[#allocation64_spill] sm:$0xff] %v5323_v3 }
 0x239   : > { %v976_v58 = vpop.permute.xlu1 %975 }
 0x23a   : > { %3706 = vmatpush.xpose.msk.msra.mxu0 %vm723_vm1, %v976_v58 }
 0x253   : > { %v860_v46 = vpop.f32.mrf.mxu0 }
 0x254   : > { %v864_v9 = vmul.f32 0.5, %v860_v46 }
 0x256   : > { %v865_v49 = vmax.f32 %v863_v17, %v864_v9 }
 0x258   : > { %866 = vmax.xlane.f32.xlu0 %v865_v49 }
 0x26c   : > { %947 = vrot.lane.b32.xlu0 %v4925_v39, %s4703_s26 }
 0x274   : > { %945 = vrot.lane.b32.xlu0 %v4920_v37, %s4703_s26 }
 0x27c   : > { %943 = vrot.lane.b32.xlu0 %v4915_v35, %s4703_s26 }
 0x284   : > { %941 = vrot.lane.b32.xlu0 %v4910_v33, %s4703_s26 }
 0x28c   : > { %973 = vrot.lane.b32.xlu0 %v5042_v12, %s4703_s26 }
 0x294   : > { %971 = vrot.lane.b32.xlu0 %v5033_v10, %s4703_s26 }
 0x29c   : > { %969 = vrot.lane.b32.xlu0 %v5024_v8, %s4703_s26 }
 0x2a4   : > { %1338 = vrot.lane.b32.xlu0 %v5002_v2, %s4704_s13 }
 0x2ac   : > { %1336 = vrot.lane.b32.xlu0 %v4993_v63, %s4704_s13 }
 0x2b4   : > { %1334 = vrot.lane.b32.xlu0 %v4984_v60, %s4704_s13 }
 0x2bc   : > { %1332 = vrot.lane.b32.xlu0 %v4975_v57, %s4704_s13 }
 0x2c4   : > { %1330 = vrot.lane.b32.xlu0 %v4966_v54, %s4704_s13 }
 0x2cb   : > { %v867_v42 = vpop.xlane.xlu0 %866 }
 0x2cc   : > { %v868_v49 = vsub.f32 %v863_v17, %v867_v42  ;;  %v869_v46 = vsub.f32 %v864_v9, %v867_v42  ;;  %1328 = vrot.lane.b32.xlu0 %v4957_v51, %s4704_s13  ;;  %v5335_v17 = vpack.i.bf16 %v5038_v11, %v5219_v52 }
 0x2ce   : > { %v870_v19 = vmul.f32 1.442695, %v868_v49  ;;  %v872_v16 = vmul.f32 1.442695, %v869_v46  ;;  %7119 = vst [vmem:[#allocation65_spill] sm:$0xff] %v5335_v17  ;;  %v5345_v46 = vpack.i.bf16 %v4964_v53, %v5143_v0 }
 0x2d0   : > { %4559 = vpow2.f32 %v870_v19  ;;  %7120 = vst [vmem:[#allocation66_spill] sm:$0xff] %v5345_v46 }
 0x2d1   : > { %4561 = vpow2.f32 %v872_v16  ;;  %v5354_v16 = vpack.i.bf16 %v4937_v44, %v5122_v30 }
 0x2d3   : > { %7121 = vst [vmem:[#allocation67_spill] sm:$0xff] %v5354_v16 }
 0x2d4   : > { %4004 = vrot.lane.b32.xlu0 %v5323_v3, %s4703_s26  ;;  %v5416_v3 = vpack.i.bf16 %v5009_v4, %v5191_v32 }
 0x2d6   : > { %v5327_v58 = vpop.eup %4559  ;;  %7124 = vst [vmem:[#allocation70_spill] sm:$0xff] %v5416_v3 }
 0x2d7   : > { %v5329_v24 = vpop.eup %4561 }
 0x2d8   : > { %v874_v9 = vadd.f32 %v5329_v24, %v5327_v58 }
 0x2da   : > { %875 = vadd.xlane.f32.xlu2 %v874_v9 }
 0x2dc   : > { %4009 = vrot.lane.b32.xlu0 %v5335_v17, %s4703_s26  ;;  %v938_v17 = vpop.permute.xlu1 %937 }
 0x2de   : > { %v948_v42 = vpop.permute.xlu0 %947 }
 0x2df   : > { %3687 = vmatpush.xpose.msk.msra.mxu3 %vm723_vm1, %v948_v42 }
 0x2e4   : > { %1324 = vrot.lane.b32.xlu0 %v4939_v45, %s4704_s13  ;;  %v936_v13 = vpop.permute.xlu1 %935 }
 0x2e6   : > { %v946_v49 = vpop.permute.xlu0 %945 }
 0x2e7   : > { %3688 = vmatpush.xpose.msk.msra.mxu3 %vm723_vm1, %v946_v49  ;;  %v5368_v49 = vpack.i.bf16 %v5082_v21, %v5094_v23 }
 0x2e9   : > { %7122 = vst [vmem:[#allocation68_spill] sm:$0xff] %v5368_v49 }
 0x2ec   : > { %4049 = vrot.lane.b32.xlu0 %v5345_v46, %s4703_s26  ;;  %v5410_v46 = vpack.i.bf16 %v5020_v7, %v5199_v36  ;;  %v4000_v33 = vpop.permute.xlu1 %3999 }
 0x2ee   : > { %v944_v19 = vpop.permute.xlu0 %943  ;;  %7123 = vst [vmem:[#allocation69_spill] sm:$0xff] %v5410_v46 }
 0x2ef   : > { %3689 = vmatpush.xpose.msk.msra.mxu3 %vm723_vm1, %v944_v19 }
 0x2f2   : > { %939 = vrot.lane.b32.xlu2 %v4905_v31, %s4703_s26 }
 0x2f4   : > { %4064 = vrot.lane.b32.xlu0 %v5354_v16, %s4703_s26 }
 0x2f6   : > { %v942_v9 = vpop.permute.xlu0 %941 }
 0x2f7   : > { %3690 = vmatpush.xpose.msk.msra.mxu3 %vm723_vm1, %v942_v9 }
 0x2fa   : > { %1340 = vrot.lane.b32.xlu2 %v5011_v5, %s4704_s13 }
 0x2fc   : > { %1348 = vrot.lane.b32.xlu0 %v5051_v14, %s4704_s13 }
 0x2fe   : > { %v974_v42 = vpop.permute.xlu0 %973 }
 0x2ff   : > { %3707 = vmatpush.xpose.msk.msra.mxu0 %vm723_vm1, %v974_v42 }
 0x302   : > { %1372 = vrot.lane.b32.xlu2 %v5153_v62, %s4704_s13 }
 0x304   : > { %4074 = vrot.lane.b32.xlu0 %v5368_v49, %s4703_s26 }
 0x306   : > { %v972_v19 = vpop.permute.xlu0 %971 }
 0x307   : > { %3708 = vmatpush.xpose.msk.msra.mxu0 %vm723_vm1, %v972_v19 }
 0x30a   : > { %1370 = vrot.lane.b32.xlu2 %v5145_v6, %s4704_s13 }
 0x30c   : > { %1310 = vrot.lane.b32.xlu0 %v4900_v29, %s4704_s13 }
 0x30e   : > { %v970_v9 = vpop.permute.xlu0 %969 }
 0x30f   : > { %3709 = vmatpush.xpose.msk.msra.mxu0 %vm723_vm1, %v970_v9 }
 0x312   : > { %1368 = vrot.lane.b32.xlu2 %v5138_v55, %s4704_s13 }
 0x314   : > { %1308 = vrot.lane.b32.xlu0 %v4930_v41, %s4704_s13 }
 0x316   : > { %v5382_v42 = vpop.permute.xlu0 %1338 }
 0x31a   : > { %1366 = vrot.lane.b32.xlu2 %v5132_v43, %s4704_s13 }
 0x31c   : > { %1342 = vrot.lane.b32.xlu0 %v5024_v8, %s4704_s13  ;;  %v4001_v8 = vunpack.i.l.bf16 %v4000_v33 }
 0x31e   : > { %v5388_v19 = vpop.permute.xlu0 %1336 }
 0x322   : > { %1364 = vrot.lane.b32.xlu2 %v5124_v34, %s4704_s13 }
 0x324   : > { %1673 = vrot.lane.b32.xlu0 %v4975_v57, %s4705_s10  ;;  %v5424_v57 = vpack.i.bf16 %v5000_v1, %v5183_v40 }
 0x326   : > { %v5396_v9 = vpop.permute.xlu0 %1334  ;;  %7125 = vst [vmem:[#allocation71_spill] sm:$0xff] %v5424_v57 }
 0x32a   : > { %1362 = vrot.lane.b32.xlu2 %v5115_v28, %s4704_s13 }
 0x32c   : > { %1705 = vrot.lane.b32.xlu0 %v5124_v34, %s4705_s10 }
 0x32e   : > { %v5402_v16 = vpop.permute.xlu0 %1332 }
 0x332   : > { %1326 = vrot.lane.b32.xlu2 %v4948_v48, %s4704_s13 }
 0x336   : > { %v5406_v49 = vpop.permute.xlu0 %1330 }
 0x33a   : > { %1360 = vrot.lane.b32.xlu2 %v5105_v26, %s4704_s13 }
 0x33e   : > { %v5418_v11 = vpop.permute.xlu0 %1328 }
 0x342   : > { %4019 = vrot.lane.b32.xlu2 %v5410_v46, %s4703_s26 }
 0x346   : > { %v4005_v46 = vpop.permute.xlu0 %4004 }
 0x34a   : > { %4024 = vrot.lane.b32.xlu2 %v5416_v3, %s4703_s26  ;;  %v7126_v3 = vld [vmem:[#allocation23_spill] sm:$0xff] }
 0x34b   : > { %v5431_v53 = vpack.i.bf16 %v7126_v3, %v5173_v56 }
 0x34d   : > { %v876_v52 = vpop.xlane.xlu2 %875  ;;  %7127 = vst [vmem:[#allocation23_spill] sm:$0xff] %v5431_v53 }
 0x34e   : > { %4563 = vrcp.f32 %v876_v52  ;;  %v888_v23 = vand.u32 2147483648, %v876_v52  ;;  %v886_v48 = vand.u32 2147483647, %v876_v52  ;;  %vm882_vm3 = vweird.f32 %v876_v52 }
 0x350   : > { %vm887_vm5 = vcmp.eq.f32.partialorder %v886_v48, 8.507059e+37 }
 0x352   : > { %4029 = vrot.lane.b32.xlu2 %v5424_v57, %s4703_s26  ;;  %v4010_v57 = vpop.permute.xlu0 %4009 }
 0x353   : > { %v4011_v29 = vunpack.i.l.bf16 %v4010_v57 }
 0x354   : > { %v4564_v41 = vpop.eup %4563 }
 0x355   : > { %v878_v32 = vmul.f32 %v4564_v41, %v876_v52  ;;  %v940_v34 = vpop.permute.xlu2 %939  ;;  %vm883_vm2 = vweird.f32 %v4564_v41  ;;  %v4007_v52 = vunpack.i.h.bf16 %v4005_v46 }
 0x356   : > { %3691 = vmatpush.xpose.msk.msra.mxu3 %vm723_vm1, %v940_v34  ;;  %vm884_vm4 = vmor %vm882_vm3, %vm883_vm2 }
 0x357   : > { %v879_v39 = vsub.f32 1.0, %v878_v32  ;;  %v889_v32 = vor.u32 1.1754944e-38, %v888_v23 }
 0x359   : > { %v880_v4 = vmul.f32 %v4564_v41, %v879_v39 }
 0x35a   : > { %4034 = vrot.lane.b32.xlu2 %v5431_v53, %s4703_s26  ;;  %3692 = vmatpush.xpose.msk.msra.mxu3 %vm723_vm1, %v938_v17  ;;  %v4015_v53 = vpop.permute.xlu1 %4014  ;;  %v5480_v17 = vpack.i.bf16 %v5102_v25, %v5112_v27 }
 0x35b   : > { %v881_v34 = vadd.f32 %v4564_v41, %v880_v4  ;;  %v7128_v4 = vld [vmem:[#allocation21_spill] sm:$0xff]  ;;  %v4016_v48 = vunpack.i.l.bf16 %v4015_v53 }
 0x35c   : > { %v5449_v23 = vpack.i.bf16 %v7128_v4, %v5163_v61  ;;  %7133 = vst [vmem:[#allocation73_spill] sm:$0xff] %v5480_v17 }
 0x35d   : > { %v5440_v56 = vpop.permute.xlu2 %1340  ;;  %v885_v15 = vsel %vm884_vm4, %v4564_v41, %v881_v34  ;;  %v4002_v41 = vunpack.i.h.bf16 %v4000_v33  ;;  %v7130_v33 = vld [vmem:[#allocation19_spill] sm:$0xff] }
 0x35e   : > { %v890_v40 = vsel %vm887_vm5, %v889_v32, %v885_v15  ;;  %7129 = vst [vmem:[#allocation21_spill] sm:$0xff] %v5449_v23  ;;  %v4006_v15 = vunpack.i.l.bf16 %v4005_v46 }
 0x35f   : > { %v891_v39 = vmul.f32 %v5327_v58, %v890_v40  ;;  %v892_v36 = vmul.f32 %v5329_v24, %v890_v40  ;;  %v4012_v58 = vunpack.i.h.bf16 %v4010_v57  ;;  %v7132_v24 = vld [vmem:[#allocation35_spill] sm:$0xff] }
 0x361   : > { %893 = vst [vmem:[%s5444_s23] sm:$0xff] %v891_v39  ;;  %911 = vmatmul.f32.vlgmr.msrb.gmra.mxu3 %v891_v39  ;;  %931 = vmatmul.f32.vlgmr.msrb.gmra.mxu0 %v892_v36 }
 0x362   : > { %894 = vst [vmem:[%s5444_s23 + $0x8] sm:$0xff] %v892_v36  ;;  %1268 = vmatpush.msrb.mxu3 %v4001_v8  ;;  %1288 = vmatpush.msrb.mxu0 %v4011_v29  ;;  %v5460_v8 = vpack.i.bf16 %v7130_v33, %v5151_v59  ;;  %v4017_v29 = vunpack.i.h.bf16 %v4015_v53  ;;  %v5482_v46 = vpop.permute.xlu1 %1358 }
 0x363   : > { %4039 = vrot.lane.b32.xlu2 %v5449_v23, %s4703_s26 }
 0x364   : > { %1269 = vmatpush.msrb.mxu3 %v4002_v41  ;;  %1289 = vmatpush.msrb.mxu0 %v4016_v48  ;;  %7131 = vst [vmem:[#allocation72_spill] sm:$0xff] %v5460_v8 }
 0x365   : > { %v5454_v40 = vpop.permute.xlu2 %1372 }
 0x366   : > { %1270 = vmatpush.msrb.mxu3 %v4006_v15 }
 0x368   : > { %1271 = vmatpush.msrb.mxu3 %v4007_v52 }
 0x369   : > { %3693 = vmatmul.msk.f32.vlgmr.msra.gmra.mxu3 %vm723_vm1, %v936_v13  ;;  %3710 = vmatmul.msk.f32.vlgmr.msra.gmra.mxu0 %vm723_vm1, %v936_v13 }
 0x36a   : > { %1272 = vmatpush.msrb.mxu3 %v4012_v58  ;;  %v5490_v32 = vpop.permute.xlu1 %1322 }
 0x36b   : > { %4044 = vrot.lane.b32.xlu2 %v5460_v8, %s4703_s26 }
 0x36c   : > { %1273 = vmatpush.msrb.mxu3 %v4017_v29 }
 0x36d   : > { %v5464_v36 = vpop.permute.xlu2 %1370 }
 0x372   : > { %v5498_v48 = vpop.permute.xlu1 %1356 }
 0x373   : > { %1352 = vrot.lane.b32.xlu2 %v5069_v18, %s4704_s13 }
 0x375   : > { %v5468_v57 = vpop.permute.xlu2 %1368 }
 0x37a   : > { %v5502_v29 = vpop.permute.xlu1 %1320 }
 0x37b   : > { %1316 = vrot.lane.b32.xlu2 %v4915_v35, %s4704_s13 }
 0x37d   : > { %v5472_v13 = vpop.permute.xlu2 %1366 }
 0x382   : > { %v5506_v33 = vpop.permute.xlu1 %1354 }
 0x383   : > { %1350 = vrot.lane.b32.xlu2 %v7132_v24, %s4704_s13 }
 0x385   : > { %v5476_v53 = vpop.permute.xlu2 %1364 }
 0x38b   : > { %4069 = vrot.lane.b32.xlu2 %v5480_v17, %s4703_s26  ;;  %s7053_s26 = smov 16  }
 0x38d   : > { %v5486_v34 = vpop.permute.xlu2 %1362 }
 0x393   : > { %1312 = vrot.lane.b32.xlu2 %v4905_v31, %s4704_s13 }
 0x395   : > { %v5492_v39 = vpop.permute.xlu2 %1326 }
 0x39b   : > { %1679 = vrot.lane.b32.xlu2 %v5002_v2, %s4705_s10 }
 0x39d   : > { %v5496_v41 = vpop.permute.xlu2 %1360 }
 0x3a3   : > { %1344 = vrot.lane.b32.xlu2 %v5033_v10, %s4704_s13 }
 0x3a5   : > { %v4020_v15 = vpop.permute.xlu2 %4019 }
 0x3a6   : > { %v4022_v52 = vunpack.i.h.bf16 %v4020_v15  ;;  %v4021_v58 = vunpack.i.l.bf16 %v4020_v15 }
 0x3a8   : > { %1274 = vmatpush.msrb.mxu3 %v4022_v52  ;;  %1290 = vmatpush.msrb.mxu0 %v4021_v58  ;;  %v5512_v52 = vpop.permute.xlu1 %1318 }
 0x3ab   : > { %1711 = vrot.lane.b32.xlu2 %v5145_v6, %s4705_s10 }
 0x3ad   : > { %v4025_v17 = vpop.permute.xlu2 %4024 }
 0x3ae   : > { %v4027_v8 = vunpack.i.h.bf16 %v4025_v17  ;;  %v4026_v23 = vunpack.i.l.bf16 %v4025_v17 }
 0x3b0   : > { %1275 = vmatpush.msrb.mxu3 %v4027_v8  ;;  %1291 = vmatpush.msrb.mxu0 %v4026_v23  ;;  %v5514_v8 = vpop.permute.xlu0 %1324 }
 0x3b3   : > { %1709 = vrot.lane.b32.xlu2 %v5138_v55, %s4705_s10 }
 0x3b5   : > { %v4030_v25 = vpop.permute.xlu2 %4029 }
 0x3b6   : > { %v4032_v59 = vunpack.i.h.bf16 %v4030_v25  ;;  %v4031_v15 = vunpack.i.l.bf16 %v4030_v25 }
 0x3b8   : > { %1276 = vmatpush.msrb.mxu3 %v4032_v59  ;;  %1292 = vmatpush.msrb.mxu0 %v4031_v15  ;;  %v4055_v59 = vpop.permute.xlu1 %4054  ;;  %v4050_v15 = vpop.permute.xlu0 %4049 }
 0x3b9   : > { %v4052_v18 = vunpack.i.h.bf16 %v4050_v15  ;;  %v4051_v14 = vunpack.i.l.bf16 %v4050_v15  ;;  %v4056_v35 = vunpack.i.l.bf16 %v4055_v59 }
 0x3bb   : > { %1671 = vrot.lane.b32.xlu2 %v4966_v54, %s4705_s10 }
 0x3bd   : > { %v4035_v58 = vpop.permute.xlu2 %4034 }
 0x3be   : > { %v4037_v61 = vunpack.i.h.bf16 %v4035_v58  ;;  %v4036_v17 = vunpack.i.l.bf16 %v4035_v58 }
 0x3c0   : > { %1277 = vmatpush.msrb.mxu3 %v4037_v61  ;;  %1293 = vmatpush.msrb.mxu0 %v4036_v17  ;;  %v4060_v61 = vpop.permute.xlu1 %4059  ;;  %v4057_v17 = vunpack.i.h.bf16 %v4055_v59 }
 0x3c3   : > { %1703 = vrot.lane.b32.xlu2 %v5115_v28, %s4705_s10 }
 0x3c5   : > { %v4040_v23 = vpop.permute.xlu2 %4039 }
 0x3c6   : > { %v4042_v2 = vunpack.i.h.bf16 %v4040_v23  ;;  %v4041_v25 = vunpack.i.l.bf16 %v4040_v23  ;;  %v4065_v23 = vpop.permute.xlu0 %4064 }
 0x3c7   : > { %v4066_v20 = vunpack.i.l.bf16 %v4065_v23 }
 0x3c8   : > { %1278 = vmatpush.msrb.mxu3 %v4042_v2  ;;  %1294 = vmatpush.msrb.mxu0 %v4041_v25  ;;  %v4062_v2 = vunpack.i.h.bf16 %v4060_v61  ;;  %v4061_v25 = vunpack.i.l.bf16 %v4060_v61 }
 0x3cb   : > { %1665 = vrot.lane.b32.xlu2 %v4939_v45, %s4705_s10 }
 0x3cd   : > { %v4045_v54 = vpop.permute.xlu2 %4044 }
 0x3ce   : > { %v4047_v6 = vunpack.i.h.bf16 %v4045_v54  ;;  %v4046_v58 = vunpack.i.l.bf16 %v4045_v54  ;;  %v4067_v54 = vunpack.i.h.bf16 %v4065_v23 }
 0x3d0   : > { %1279 = vmatpush.msrb.mxu3 %v4047_v6  ;;  %1295 = vmatpush.msrb.mxu0 %v4046_v58  ;;  %v5534_v6 = vpop.permute.xlu0 %1348 }
 0x3d2   : > { %1280 = vmatpush.msrb.mxu3 %v4052_v18  ;;  %1296 = vmatpush.msrb.mxu0 %v4051_v14 }
 0x3d3   : > { %1697 = vrot.lane.b32.xlu2 %v5087_v22, %s4705_s10 }
 0x3d4   : > { %1281 = vmatpush.msrb.mxu3 %v4057_v17  ;;  %1297 = vmatpush.msrb.mxu0 %v4056_v35 }
 0x3d5   : > { %v5522_v45 = vpop.permute.xlu2 %1352 }
 0x3d6   : > { %1282 = vmatpush.msrb.mxu3 %v4062_v2  ;;  %1298 = vmatpush.msrb.mxu0 %v4061_v25  ;;  %v7150_v25 = vld [vmem:[#allocation34_spill] sm:$0xff] }
 0x3d8   : > { %1283 = vmatpush.msrb.mxu3 %v4067_v54  ;;  %1299 = vmatpush.msrb.mxu0 %v4066_v20  ;;  %v4075_v17 = vpop.permute.xlu0 %4074 }
 0x3d9   : > { %v4077_v2 = vunpack.i.h.bf16 %v4075_v17 }
 0x3da   : > { %3713 = vmatpush.xpose.msk.msra.mxu3 %vm723_vm1, %v5440_v56 }
 0x3db   : > { %1659 = vrot.lane.b32.xlu2 %v4920_v37, %s4705_s10 }
 0x3dd   : > { %v1317_v14 = vpop.permute.xlu2 %1316 }
 0x3de   : > { %3714 = vmatpush.xpose.msk.msra.mxu3 %vm723_vm1, %v5382_v42  ;;  %v932_v18 = vpop.f32.mrf.mxu0 }
 0x3e2   : > { %3715 = vmatpush.xpose.msk.msra.mxu3 %vm723_vm1, %v5388_v19 }
 0x3e3   : > { %1691 = vrot.lane.b32.xlu2 %v7132_v24, %s4705_s10 }
 0x3e4   : > { %v912_v35 = vpop.f32.mrf.mxu3 }
 0x3e5   : > { %v5536_v20 = vadd.f32 %v932_v18, %v912_v35  ;;  %v1351_v56 = vpop.permute.xlu2 %1350  ;;  %v7152_v35 = vld [vmem:[#allocation16_spill] sm:$0xff] }
 0x3e6   : > { %3716 = vmatpush.xpose.msk.msra.mxu3 %vm723_vm1, %v5396_v9  ;;  %v1104_v42 = vpop.f32.mrf.mxu0 }
 0x3e7   : > { %7134 = vst [vmem:[#allocation74_spill] sm:$0xff] %v5536_v20  ;;  %v5544_v59 = vmul.f32 0.5, %v1104_v42  ;;  %v7154_v42 = vld [vmem:[#allocation26_spill] sm:$0xff] }
 0x3ea   : > { %3717 = vmatpush.xpose.msk.msra.mxu3 %vm723_vm1, %v5402_v16  ;;  %v4076_v16 = vunpack.i.l.bf16 %v4075_v17 }
 0x3eb   : > { %1653 = vrot.lane.b32.xlu2 %v4905_v31, %s4705_s10  ;;  %v7176_v31 = vld [vmem:[#allocation53_spill] sm:$0xff] }
 0x3ec   : > { %v1084_v19 = vpop.f32.mrf.mxu3 }
 0x3ed   : > { %v5546_v15 = vmul.f32 0.5, %v1084_v19  ;;  %v4070_v58 = vpop.permute.xlu2 %4069 }
 0x3ee   : > { %3718 = vmatpush.xpose.msk.msra.mxu3 %vm723_vm1, %v5406_v49  ;;  %v4071_v61 = vunpack.i.l.bf16 %v4070_v58  ;;  %v4072_v23 = vunpack.i.h.bf16 %v4070_v58  ;;  %v5578_v49 = vpack.i.bf16 %v5000_v1, %v5130_v38  ;;  %v1315_v1 = vpop.permute.xlu1 %1314  ;;  %v7156_v58 = vld [vmem:[#allocation41_spill] sm:$0xff] }
 0x3ef   : > { %v1109_v9 = vmax.f32 %v5546_v15, %v5544_v59 }
 0x3f0   : > { %1300 = vmatpush.msrb.mxu0 %v4071_v61  ;;  %v7157_v61 = vld [vmem:[#allocation17_spill] sm:$0xff] }
 0x3f1   : > { %1110 = vmax.xlane.f32.xlu1 %v1109_v9  ;;  %v5712_v17 = vpack.i.bf16 %v7157_v61, %v7156_v58 }
 0x3f2   : > { %3719 = vmatpush.xpose.msk.msra.mxu3 %vm723_vm1, %v5418_v11  ;;  %1301 = vmatpush.msrb.mxu0 %v4072_v23  ;;  %v5564_v11 = vpack.i.bf16 %v5020_v7, %v5143_v0  ;;  %v5591_v7 = vpack.i.bf16 %v7126_v3, %v5122_v30  ;;  %v5605_v30 = vpack.i.bf16 %v7128_v4, %v5112_v27  ;;  %v1311_v0 = vpop.permute.xlu0 %1310  ;;  %v7159_v23 = vld [vmem:[#allocation12_spill] sm:$0xff] }
 0x3f3   : > { %1685 = vrot.lane.b32.xlu2 %v5033_v10, %s4705_s10  ;;  %v5618_v3 = vpack.i.bf16 %v4955_v50, %v5082_v21  ;;  %v5630_v27 = vpack.i.bf16 %v4937_v44, %v4946_v47  ;;  %v7139_v44 = vld [vmem:[#allocation14_spill] sm:$0xff]  ;;  %v7141_v47 = vld [vmem:[#allocation39_spill] sm:$0xff]  ;;  %v7143_v21 = vld [vmem:[#allocation33_spill] sm:$0xff] }
 0x3f4   : > { %1302 = vmatpush.msrb.mxu0 %v4076_v16  ;;  %7135 = vst [vmem:[#allocation75_spill] sm:$0xff] %v5591_v7  ;;  %v7142_v50 = vld [vmem:[#allocation11_spill] sm:$0xff] }
 0x3f5   : > { %v1313_v38 = vpop.permute.xlu2 %1312  ;;  %7136 = vst [vmem:[#allocation76_spill] sm:$0xff] %v5605_v30 }
 0x3f6   : > { %3720 = vmatpush.xpose.msk.msra.mxu3 %vm723_vm1, %v5492_v39  ;;  %1303 = vmatpush.msrb.mxu0 %v4077_v2  ;;  %7137 = vst [vmem:[#allocation77_spill] sm:$0xff] %v5618_v3  ;;  %v7146_v39 = vld [vmem:[#allocation57_spill] sm:$0xff] }
 0x3f7   : > { %7138 = vst [vmem:[#allocation78_spill] sm:$0xff] %v5630_v27  ;;  %v7160_v2 = vld [vmem:[#allocation37_spill] sm:$0xff] }
 0x3f8   : > { %3730 = vmatpush.xpose.msk.msra.mxu0 %vm723_vm1, %v5454_v40 }
 0x3fa   : > { %3721 = vmatpush.xpose.msk.msra.mxu3 %vm723_vm1, %v5514_v8  ;;  %v7149_v8 = vld [vmem:[#allocation55_spill] sm:$0xff] }
 0x3fb   : > { %4114 = vrot.lane.b32.xlu2 %v5564_v11, %s4704_s13  ;;  %v5689_v54 = vpack.i.bf16 %v7150_v25, %v7149_v8  ;;  %v7168_v8 = vld [vmem:[#allocation58_spill] sm:$0xff] }
 0x3fc   : > { %3731 = vmatpush.xpose.msk.msra.mxu0 %vm723_vm1, %v5464_v36 }
 0x3fd   : > { %7151 = vst [vmem:[#allocation33_spill] sm:$0xff] %v5689_v54 }
 0x3fe   : > { %3722 = vmatpush.xpose.msk.msra.mxu3 %vm723_vm1, %v5490_v32  ;;  %v7145_v32 = vld [vmem:[#allocation28_spill] sm:$0xff] }
 0x400   : > { %3732 = vmatpush.xpose.msk.msra.mxu0 %vm723_vm1, %v5468_v57 }
 0x402   : > { %3723 = vmatpush.xpose.msk.msra.mxu3 %vm723_vm1, %v5502_v29 }
 0x403   : > { %4124 = vrot.lane.b32.xlu2 %v5578_v49, %s4704_s13 }
 0x404   : > { %3733 = vmatpush.xpose.msk.msra.mxu0 %vm723_vm1, %v5472_v13  ;;  %v7144_v13 = vld [vmem:[#allocation8_spill] sm:$0xff] }
 0x406   : > { %3724 = vmatpush.xpose.msk.msra.mxu3 %vm723_vm1, %v5512_v52  ;;  %v5685_v52 = vpop.permute.xlu2 %1679 }
 0x408   : > { %3734 = vmatpush.xpose.msk.msra.mxu0 %vm723_vm1, %v5476_v53 }
 0x40a   : > { %3725 = vmatpush.xpose.msk.msra.mxu3 %vm723_vm1, %v1317_v14  ;;  %1681 = vrot.lane.b32.xlu1 %v5011_v5, %s4705_s10  ;;  %v5691_v14 = vpop.permute.xlu0 %1308 }
 0x40b   : > { %4129 = vrot.lane.b32.xlu2 %v5591_v7, %s4704_s13 }
 0x40c   : > { %3735 = vmatpush.xpose.msk.msra.mxu0 %vm723_vm1, %v5486_v34 }
 0x40e   : > { %3726 = vmatpush.xpose.msk.msra.mxu3 %vm723_vm1, %v1315_v1  ;;  %v7161_v1 = vld [vmem:[#allocation50_spill] sm:$0xff] }
 0x410   : > { %3736 = vmatpush.xpose.msk.msra.mxu0 %vm723_vm1, %v5496_v41  ;;  %v7147_v41 = vld [vmem:[#allocation38_spill] sm:$0xff] }
 0x411   : > { %7158 = vst [vmem:[#allocation38_spill] sm:$0xff] %v5712_v17 }
 0x412   : > { %3727 = vmatpush.xpose.msk.msra.mxu3 %vm723_vm1, %v1313_v38  ;;  %1346 = vrot.lane.b32.xlu1 %v5042_v12, %s4704_s13 }
 0x413   : > { %4134 = vrot.lane.b32.xlu2 %v5605_v30, %s4704_s13 }
 0x414   : > { %3737 = vmatpush.xpose.msk.msra.mxu0 %vm723_vm1, %v5482_v46 }
 0x416   : > { %3728 = vmatpush.xpose.msk.msra.mxu3 %vm723_vm1, %v1311_v0  ;;  %v7162_v0 = vld [vmem:[#allocation10_spill] sm:$0xff] }
 0x418   : > { %3738 = vmatpush.xpose.msk.msra.mxu0 %vm723_vm1, %v5498_v48  ;;  %v5679_v48 = vpack.i.bf16 %v7147_v41, %v7146_v39  ;;  %v7167_v41 = vld [vmem:[#allocation59_spill] sm:$0xff] }
 0x419   : > { %v5750_v25 = vpack.i.bf16 %v7168_v8, %v7167_v41  ;;  %v7174_v41 = vld [vmem:[#allocation54_spill] sm:$0xff]  ;;  %v7175_v8 = vld [vmem:[#allocation32_spill] sm:$0xff] }
 0x41a   : > { %1713 = vrot.lane.b32.xlu1 %v5153_v62, %s4705_s10  ;;  %7148 = vst [vmem:[#allocation39_spill] sm:$0xff] %v5679_v48  ;;  %v5770_v20 = vpack.i.bf16 %v7175_v8, %v7174_v41  ;;  %v7178_v8 = vld [vmem:[#allocation51_spill] sm:$0xff] }
 0x41b   : > { %4149 = vrot.lane.b32.xlu2 %v5618_v3, %s4704_s13  ;;  %7169 = vst [vmem:[#allocation55_spill] sm:$0xff] %v5750_v25 }
 0x41c   : > { %3739 = vmatpush.xpose.msk.msra.mxu0 %vm723_vm1, %v5506_v33 }
 0x420   : > { %3740 = vmatpush.xpose.msk.msra.mxu0 %vm723_vm1, %v5522_v45  ;;  %v7140_v45 = vld [vmem:[#allocation42_spill] sm:$0xff] }
 0x422   : > { %1677 = vrot.lane.b32.xlu1 %v4993_v63, %s4705_s10 }
 0x423   : > { %4154 = vrot.lane.b32.xlu2 %v5630_v27, %s4704_s13 }
 0x424   : > { %3741 = vmatpush.xpose.msk.msra.mxu0 %vm723_vm1, %v1351_v56  ;;  %v7153_v56 = vld [vmem:[#allocation48_spill] sm:$0xff] }
 0x425   : > { %v5700_v19 = vpack.i.bf16 %v7154_v42, %v7153_v56  ;;  %v7171_v56 = vld [vmem:[#allocation56_spill] sm:$0xff] }
 0x426   : > { %v7172_v42 = vld [vmem:[#allocation36_spill] sm:$0xff] }
 0x427   : > { %7155 = vst [vmem:[#allocation57_spill] sm:$0xff] %v5700_v19 }
 0x428   : > { %3742 = vmatpush.xpose.msk.msra.mxu0 %vm723_vm1, %v5534_v6  ;;  %v1345_v6 = vpop.permute.xlu2 %1344 }
 0x42a   : > { %1675 = vrot.lane.b32.xlu1 %v4984_v60, %s4705_s10 }
 0x42b   : > { %2050 = vrot.lane.b32.xlu2 %v5138_v55, %s4706_s18 }
 0x430   : > { %v1712_v58 = vpop.permute.xlu2 %1711 }
 0x432   : > { %1707 = vrot.lane.b32.xlu1 %v5132_v43, %s4705_s10 }
 0x433   : > { %2018 = vrot.lane.b32.xlu2 %v4993_v63, %s4706_s18 }
 0x43a   : > { %1669 = vrot.lane.b32.xlu1 %v4957_v51, %s4705_s10 }
 0x43b   : > { %2044 = vrot.lane.b32.xlu2 %v5115_v28, %s4706_s18  ;;  %v7179_v28 = vld [vmem:[#allocation29_spill] sm:$0xff] }
 0x442   : > { %1701 = vrot.lane.b32.xlu1 %v5105_v26, %s4705_s10 }
 0x443   : > { %2042 = vrot.lane.b32.xlu2 %v5105_v26, %s4706_s18  ;;  %v7177_v26 = vld [vmem:[#allocation31_spill] sm:$0xff] }
 0x44a   : > { %1663 = vrot.lane.b32.xlu1 %v7139_v44, %s4705_s10 }
 0x44b   : > { %2040 = vrot.lane.b32.xlu2 %v7140_v45, %s4706_s18 }
 0x452   : > { %1695 = vrot.lane.b32.xlu1 %v7141_v47, %s4705_s10 }
 0x45a   : > { %1657 = vrot.lane.b32.xlu1 %v7142_v50, %s4705_s10 }
 0x462   : > { %1689 = vrot.lane.b32.xlu1 %v7143_v21, %s4705_s10 }
 0x464   : > { %v1111_v4 = vpop.xlane.xlu1 %1110 }
 0x465   : > { %v1112_v40 = vsub.f32 %v5546_v15, %v1111_v4  ;;  %v1113_v33 = vsub.f32 %v5544_v59, %v1111_v4  ;;  %v1343_v59 = vpop.permute.xlu0 %1342  ;;  %v7163_v4 = vld [vmem:[#allocation25_spill] sm:$0xff] }
 0x467   : > { %v1114_v36 = vmul.f32 1.442695, %v1112_v40  ;;  %v1116_v57 = vmul.f32 1.442695, %v1113_v33  ;;  %v7164_v33 = vld [vmem:[#allocation46_spill] sm:$0xff] }
 0x469   : > { %4565 = vpow2.f32 %v1114_v36 }
 0x46a   : > { %4567 = vpow2.f32 %v1116_v57  ;;  %1651 = vrot.lane.b32.xlu1 %v7144_v13, %s4705_s10  ;;  %v7165_v57 = vld [vmem:[#allocation13_spill] sm:$0xff] }
 0x46f   : > { %v5669_v53 = vpop.eup %4565 }
 0x470   : > { %v5671_v46 = vpop.eup %4567 }
 0x471   : > { %v1118_v34 = vadd.f32 %v5671_v46, %v5669_v53 }
 0x472   : > { %1683 = vrot.lane.b32.xlu1 %v7145_v32, %s4705_s10 }
 0x473   : > { %1119 = vadd.xlane.f32.xlu0 %v1118_v34  ;;  %v7166_v34 = vld [vmem:[#allocation20_spill] sm:$0xff] }
 0x47a   : > { %4084 = vrot.lane.b32.xlu1 %v5679_v48, %s4704_s13 }
 0x47c   : > { %v5683_v29 = vpop.permute.xlu1 %1681 }
 0x482   : > { %4094 = vrot.lane.b32.xlu1 %v5689_v54, %s4704_s13 }
 0x484   : > { %v1347_v18 = vpop.permute.xlu1 %1346 }
 0x485   : > { %3743 = vmatpush.xpose.msk.msra.mxu0 %vm723_vm1, %v1347_v18  ;;  %v7170_v18 = vld [vmem:[#allocation18_spill] sm:$0xff] }
 0x487   : > { %1667 = vrot.lane.b32.xlu0 %v7152_v35, %s4705_s10 }
 0x489   : > { %3744 = vmatpush.xpose.msk.msra.mxu0 %vm723_vm1, %v1345_v6 }
 0x48a   : > { %4119 = vrot.lane.b32.xlu1 %v5700_v19, %s4704_s13 }
 0x48c   : > { %v5705_v15 = vpop.permute.xlu1 %1713 }
 0x48d   : > { %3745 = vmatpush.xpose.msk.msra.mxu0 %vm723_vm1, %v1343_v59  ;;  %v5760_v59 = vpack.i.bf16 %v7172_v42, %v7171_v56  ;;  %v1674_v56 = vpop.permute.xlu0 %1673 }
 0x48f   : > { %1699 = vrot.lane.b32.xlu0 %v7140_v45, %s4705_s10  ;;  %7173 = vst [vmem:[#allocation34_spill] sm:$0xff] %v5760_v59  ;;  %v1710_v45 = vpop.permute.xlu2 %1709 }
 0x492   : > { %4144 = vrot.lane.b32.xlu1 %v5712_v17, %s4704_s13 }
 0x494   : > { %v5716_v9 = vpop.permute.xlu1 %1677 }
 0x497   : > { %1661 = vrot.lane.b32.xlu0 %v7159_v23, %s4705_s10 }
 0x49a   : > { %2054 = vrot.lane.b32.xlu1 %v5153_v62, %s4706_s18 }
 0x49c   : > { %v5722_v16 = vpop.permute.xlu1 %1675 }
 0x49f   : > { %1693 = vrot.lane.b32.xlu0 %v7160_v2, %s4705_s10 }
 0x4a2   : > { %2052 = vrot.lane.b32.xlu1 %v7161_v1, %s4706_s18 }
 0x4a4   : > { %v5728_v38 = vpop.permute.xlu1 %1707 }
 0x4a7   : > { %1655 = vrot.lane.b32.xlu0 %v7162_v0, %s4705_s10 }
 0x4aa   : > { %2020 = vrot.lane.b32.xlu1 %v7163_v4, %s4706_s18 }
 0x4ac   : > { %v5734_v40 = vpop.permute.xlu1 %1669 }
 0x4af   : > { %1687 = vrot.lane.b32.xlu0 %v5042_v12, %s4705_s10 }
 0x4b2   : > { %2046 = vrot.lane.b32.xlu1 %v7164_v33, %s4706_s18  ;;  %v5790_v33 = vpack.i.bf16 %v7179_v28, %v7178_v8 }
 0x4b4   : > { %v5740_v36 = vpop.permute.xlu1 %1701 }
 0x4b7   : > { %1649 = vrot.lane.b32.xlu0 %v7165_v57, %s4705_s10 }
 0x4ba   : > { %2014 = vrot.lane.b32.xlu1 %v7166_v34, %s4706_s18  ;;  %v7181_v34 = vld [vmem:[#allocation19_spill] sm:$0xff] }
 0x4bc   : > { %v5746_v39 = vpop.permute.xlu1 %1663 }
 0x4bf   : > { %4079 = vrot.lane.b32.xlu0 %v5750_v25, %s4704_s13 }
 0x4c2   : > { %2012 = vrot.lane.b32.xlu1 %v7170_v18, %s4706_s18  ;;  %v1672_v18 = vpop.permute.xlu2 %1671 }
 0x4c4   : > { %v5756_v6 = vpop.permute.xlu1 %1695 }
 0x4c7   : > { %4089 = vrot.lane.b32.xlu0 %v5760_v59, %s4704_s13 }
 0x4ca   : > { %4169 = vrot.lane.b32.xlu1 %v5760_v59, %s4705_s10  ;;  %v5780_v59 = vpack.i.bf16 %v7177_v26, %v7176_v31  ;;  %v7180_v26 = vld [vmem:[#allocation43_spill] sm:$0xff]  ;;  %v1704_v28 = vpop.permute.xlu2 %1703 }
 0x4cb   : > { %v5800_v27 = vpack.i.bf16 %v7181_v34, %v7180_v26 }
 0x4cc   : > { %v5766_v61 = vpop.permute.xlu1 %1657 }
 0x4cd   : > { %7182 = vst [vmem:[#allocation48_spill] sm:$0xff] %v5800_v27 }
 0x4cf   : > { %4099 = vrot.lane.b32.xlu0 %v5770_v20, %s4704_s13 }
 0x4d2   : > { %2038 = vrot.lane.b32.xlu1 %v5087_v22, %s4706_s18  ;;  %v1706_v22 = vpop.permute.xlu0 %1705  ;;  %v1666_v4 = vpop.permute.xlu2 %1665 }
 0x4d4   : > { %v5776_v42 = vpop.permute.xlu1 %1689 }
 0x4d7   : > { %4104 = vrot.lane.b32.xlu0 %v5780_v59, %s4704_s13 }
 0x4da   : > { %2002 = vrot.lane.b32.xlu1 %v7159_v23, %s4706_s18 }
 0x4dc   : > { %v5786_v41 = vpop.permute.xlu1 %1651 }
 0x4df   : > { %4109 = vrot.lane.b32.xlu0 %v5790_v33, %s4704_s13 }
 0x4e2   : > { %4229 = vrot.lane.b32.xlu1 %v5618_v3, %s4705_s10 }
 0x4e4   : > { %v5796_v31 = vpop.permute.xlu1 %1683 }
 0x4e6   : > { %v1120_v23 = vpop.xlane.xlu0 %1119 }
 0x4e7   : > { %4569 = vrcp.f32 %v1120_v23  ;;  %4139 = vrot.lane.b32.xlu0 %v5800_v27, %s4704_s13  ;;  %v1132_v62 = vand.u32 2147483648, %v1120_v23  ;;  %v1130_v26 = vand.u32 2147483647, %v1120_v23  ;;  %vm1126_vm7 = vweird.f32 %v1120_v23  ;;  %s4714_s13 = smov 12  }
 0x4e9   : > { %v1133_v57 = vor.u32 1.1754944e-38, %v1132_v62  ;;  %vm1131_vm9 = vcmp.eq.f32.partialorder %v1130_v26, 8.507059e+37  ;;  %v1698_v62 = vpop.permute.xlu2 %1697 }
 0x4ec   : > { %v5804_v8 = vpop.permute.xlu1 %4084 }
 0x4ed   : > { %v4570_v55 = vpop.eup %4569  ;;  %v4087_v1 = vunpack.i.h.bf16 %v5804_v8 }
 0x4ee   : > { %v1122_v63 = vmul.f32 %v4570_v55, %v1120_v23  ;;  %vm1127_vm6 = vweird.f32 %v4570_v55 }
 0x4ef   : > { %2022 = vrot.lane.b32.xlu0 %v5011_v5, %s4706_s18  ;;  %1609 = vmatpush.msrb.mxu1 %v4087_v1  ;;  %vm1128_vm8 = vmor %vm1126_vm7, %vm1127_vm6 }
 0x4f0   : > { %v1123_v3 = vsub.f32 1.0, %v1122_v63 }
 0x4f2   : > { %v1124_v34 = vmul.f32 %v4570_v55, %v1123_v3  ;;  %v1660_v3 = vpop.permute.xlu2 %1659 }
 0x4f4   : > { %v1125_v13 = vadd.f32 %v4570_v55, %v1124_v34 }
 0x4f6   : > { %v1129_v32 = vsel %vm1128_vm8, %v4570_v55, %v1125_v13 }
 0x4f7   : > { %2048 = vrot.lane.b32.xlu0 %v5132_v43, %s4706_s18  ;;  %v1134_v0 = vsel %vm1131_vm9, %v1133_v57, %v1129_v32 }
 0x4f8   : > { %v1135_v1 = vmul.f32 %v5669_v53, %v1134_v0  ;;  %v1136_v63 = vmul.f32 %v5671_v46, %v1134_v0 }
 0x4f9   : > { %v1668_v5 = vpop.permute.xlu0 %1667 }
 0x4fa   : > { %3711 = vst [vmem:[%s5444_s23 + $0x10] sm:$0xff] %v1135_v1  ;;  %1284 = vmatmul.f32.vlgmr.msrb.gmra.mxu3 %v1135_v1  ;;  %1304 = vmatmul.f32.vlgmr.msrb.gmra.mxu0 %v1136_v63 }
 0x4fb   : > { %3712 = vst [vmem:[%s5444_s23 + $0x18] sm:$0xff] %v1136_v63  ;;  %3749 = vmatpush.xpose.msk.msrb.mxu3 %vm723_vm1, %v5683_v29  ;;  %3766 = vmatpush.xpose.msk.msrb.mxu0 %vm723_vm1, %v5705_v15  ;;  %v4095_v29 = vpop.permute.xlu1 %4094 }
 0x4fc   : > { %v4096_v57 = vunpack.i.l.bf16 %v4095_v29 }
 0x4ff   : > { %3750 = vmatpush.xpose.msk.msrb.mxu3 %vm723_vm1, %v5685_v52  ;;  %3767 = vmatpush.xpose.msk.msrb.mxu0 %vm723_vm1, %v1712_v58 }
 0x500   : > { %2016 = vrot.lane.b32.xlu0 %v4984_v60, %s4706_s18 }
 0x501   : > { %v1700_v55 = vpop.permute.xlu0 %1699 }
 0x502   : > { %3729 = vmatmul.msk.f32.vlgmr.msra.gmra.mxu3 %vm723_vm1, %v5691_v14  ;;  %3746 = vmatmul.msk.f32.vlgmr.msra.gmra.mxu0 %vm723_vm1, %v5691_v14 }
 0x503   : > { %3751 = vmatpush.xpose.msk.msrb.mxu3 %vm723_vm1, %v5716_v9  ;;  %3768 = vmatpush.xpose.msk.msrb.mxu0 %vm723_vm1, %v1710_v45  ;;  %v1692_v45 = vpop.permute.xlu2 %1691  ;;  %v4120_v9 = vpop.permute.xlu1 %4119 }
 0x507   : > { %3752 = vmatpush.xpose.msk.msrb.mxu3 %vm723_vm1, %v5722_v16  ;;  %3769 = vmatpush.xpose.msk.msrb.mxu0 %vm723_vm1, %v5728_v38  ;;  %v4086_v38 = vunpack.i.l.bf16 %v5804_v8 }
 0x508   : > { %4159 = vrot.lane.b32.xlu0 %v5750_v25, %s4705_s10 }
 0x509   : > { %v1662_v13 = vpop.permute.xlu0 %1661 }
 0x50b   : > { %3753 = vmatpush.xpose.msk.msrb.mxu3 %vm723_vm1, %v1674_v56  ;;  %3770 = vmatpush.xpose.msk.msrb.mxu0 %vm723_vm1, %v1706_v22  ;;  %v1654_v46 = vpop.permute.xlu2 %1653 }
 0x50f   : > { %3754 = vmatpush.xpose.msk.msrb.mxu3 %vm723_vm1, %v1672_v18  ;;  %3771 = vmatpush.xpose.msk.msrb.mxu0 %vm723_vm1, %v1704_v28  ;;  %v4097_v18 = vunpack.i.h.bf16 %v4095_v29 }
 0x510   : > { %4164 = vrot.lane.b32.xlu0 %v5679_v48, %s4705_s10 }
 0x511   : > { %v1694_v53 = vpop.permute.xlu0 %1693 }
 0x513   : > { %3755 = vmatpush.xpose.msk.msrb.mxu3 %vm723_vm1, %v5734_v40  ;;  %3772 = vmatpush.xpose.msk.msrb.mxu0 %vm723_vm1, %v5740_v36  ;;  %v1686_v32 = vpop.permute.xlu2 %1685 }
 0x517   : > { %3756 = vmatpush.xpose.msk.msrb.mxu3 %vm723_vm1, %v1668_v5  ;;  %3773 = vmatpush.xpose.msk.msrb.mxu0 %vm723_vm1, %v1700_v55 }
 0x518   : > { %2010 = vrot.lane.b32.xlu0 %v4957_v51, %s4706_s18 }
 0x519   : > { %v1656_v22 = vpop.permute.xlu0 %1655 }
 0x51b   : > { %3757 = vmatpush.xpose.msk.msrb.mxu3 %vm723_vm1, %v1666_v4  ;;  %3774 = vmatpush.xpose.msk.msrb.mxu0 %vm723_vm1, %v1698_v62  ;;  %v4115_v14 = vpop.permute.xlu2 %4114 }
 0x51c   : > { %v4116_v62 = vunpack.i.l.bf16 %v4115_v14  ;;  %v4117_v55 = vunpack.i.h.bf16 %v4115_v14 }
 0x51f   : > { %3758 = vmatpush.xpose.msk.msrb.mxu3 %vm723_vm1, %v5746_v39  ;;  %3775 = vmatpush.xpose.msk.msrb.mxu0 %vm723_vm1, %v5756_v6  ;;  %v4145_v39 = vpop.permute.xlu1 %4144 }
 0x520   : > { %4179 = vrot.lane.b32.xlu0 %v5770_v20, %s4705_s10 }
 0x521   : > { %v1688_v5 = vpop.permute.xlu0 %1687 }
 0x523   : > { %3759 = vmatpush.xpose.msk.msrb.mxu3 %vm723_vm1, %v1662_v13  ;;  %3776 = vmatpush.xpose.msk.msrb.mxu0 %vm723_vm1, %v1694_v53  ;;  %v4125_v0 = vpop.permute.xlu2 %4124  ;;  %v4122_v13 = vunpack.i.h.bf16 %v4120_v9 }
 0x524   : > { %v4126_v53 = vunpack.i.l.bf16 %v4125_v0 }
 0x527   : > { %3760 = vmatpush.xpose.msk.msrb.mxu3 %vm723_vm1, %v1660_v3  ;;  %3777 = vmatpush.xpose.msk.msrb.mxu0 %vm723_vm1, %v1692_v45  ;;  %v4121_v3 = vunpack.i.l.bf16 %v4120_v9 }
 0x528   : > { %4184 = vrot.lane.b32.xlu0 %v5780_v59, %s4705_s10 }
 0x529   : > { %v1650_v52 = vpop.permute.xlu0 %1649 }
 0x52b   : > { %3761 = vmatpush.xpose.msk.msrb.mxu3 %vm723_vm1, %v5766_v61  ;;  %3778 = vmatpush.xpose.msk.msrb.mxu0 %vm723_vm1, %v5776_v42  ;;  %v4130_v56 = vpop.permute.xlu2 %4129  ;;  %v5886_v42 = vpop.permute.xlu1 %2054 }
 0x52c   : > { %v4132_v29 = vunpack.i.h.bf16 %v4130_v56 }
 0x52f   : > { %3762 = vmatpush.xpose.msk.msrb.mxu3 %vm723_vm1, %v1656_v22  ;;  %3779 = vmatpush.xpose.msk.msrb.mxu0 %vm723_vm1, %v1688_v5  ;;  %v4127_v22 = vunpack.i.h.bf16 %v4125_v0  ;;  %v4131_v5 = vunpack.i.l.bf16 %v4130_v56 }
 0x530   : > { %4189 = vrot.lane.b32.xlu0 %v5790_v33, %s4705_s10 }
 0x531   : > { %v4080_v15 = vpop.permute.xlu0 %4079 }
 0x532   : > { %v4081_v23 = vunpack.i.l.bf16 %v4080_v15  ;;  %v4082_v16 = vunpack.i.h.bf16 %v4080_v15 }
 0x533   : > { %3763 = vmatpush.xpose.msk.msrb.mxu3 %vm723_vm1, %v1654_v46  ;;  %3780 = vmatpush.xpose.msk.msrb.mxu0 %vm723_vm1, %v1686_v32  ;;  %v4135_v8 = vpop.permute.xlu2 %4134  ;;  %v5890_v34 = vpop.permute.xlu1 %2052 }
 0x534   : > { %1629 = vmatpush.msra.mxu2 %v4081_v23  ;;  %v4137_v14 = vunpack.i.h.bf16 %v4135_v8  ;;  %v4146_v23 = vunpack.i.l.bf16 %v4145_v39 }
 0x536   : > { %1630 = vmatpush.msra.mxu2 %v4082_v16  ;;  %v4147_v16 = vunpack.i.h.bf16 %v4145_v39 }
 0x537   : > { %3764 = vmatpush.xpose.msk.msrb.mxu3 %vm723_vm1, %v5786_v41  ;;  %3781 = vmatpush.xpose.msk.msrb.mxu0 %vm723_vm1, %v5796_v31 }
 0x538   : > { %4194 = vrot.lane.b32.xlu0 %v5564_v11, %s4705_s10  ;;  %1631 = vmatpush.msra.mxu2 %v4086_v38 }
 0x539   : > { %v4090_v4 = vpop.permute.xlu0 %4089 }
 0x53a   : > { %v4091_v40 = vunpack.i.l.bf16 %v4090_v4  ;;  %3765 = vmatmul.msk.f32.vlgmr.msrb.gmra.mxu3 %vm723_vm1, %v1650_v52  ;;  %3782 = vmatmul.msk.f32.vlgmr.msrb.gmra.mxu0 %vm723_vm1, %v1650_v52  ;;  %v4092_v36 = vunpack.i.h.bf16 %v4090_v4  ;;  %v4136_v52 = vunpack.i.l.bf16 %v4135_v8 }
 0x53b   : > { %v4150_v45 = vpop.permute.xlu2 %4149  ;;  %v5892_v32 = vpop.permute.xlu1 %2020 }
 0x53c   : > { %1610 = vmatpush.msrb.mxu1 %v4092_v36  ;;  %1632 = vmatpush.msra.mxu2 %v4091_v40  ;;  %v4151_v4 = vunpack.i.l.bf16 %v4150_v45  ;;  %v4152_v40 = vunpack.i.h.bf16 %v4150_v45 }
 0x53e   : > { %1611 = vmatpush.msrb.mxu1 %v4097_v18  ;;  %1633 = vmatpush.msra.mxu2 %v4096_v57 }
 0x540   : > { %4199 = vrot.lane.b32.xlu0 %v5700_v19, %s4705_s10 }
 0x541   : > { %v4100_v6 = vpop.permute.xlu0 %4099 }
 0x542   : > { %v4101_v58 = vunpack.i.l.bf16 %v4100_v6  ;;  %v4102_v61 = vunpack.i.h.bf16 %v4100_v6 }
 0x543   : > { %v4155_v38 = vpop.permute.xlu2 %4154  ;;  %v5896_v36 = vpop.permute.xlu1 %2046 }
 0x544   : > { %1612 = vmatpush.msrb.mxu1 %v4102_v61  ;;  %1634 = vmatpush.msra.mxu2 %v4101_v58  ;;  %v4156_v57 = vunpack.i.l.bf16 %v4155_v38  ;;  %v4157_v18 = vunpack.i.h.bf16 %v4155_v38 }
 0x548   : > { %4204 = vrot.lane.b32.xlu0 %v5578_v49, %s4705_s10 }
 0x549   : > { %v4105_v41 = vpop.permute.xlu0 %4104 }
 0x54a   : > { %v4106_v31 = vunpack.i.l.bf16 %v4105_v41  ;;  %v4107_v28 = vunpack.i.h.bf16 %v4105_v41 }
 0x54b   : > { %v5900_v58 = vpop.permute.xlu1 %2014 }
 0x54c   : > { %1613 = vmatpush.msrb.mxu1 %v4107_v28  ;;  %1635 = vmatpush.msra.mxu2 %v4106_v31 }
 0x551   : > { %v4110_v26 = vpop.permute.xlu0 %4109 }
 0x552   : > { %v4111_v1 = vunpack.i.l.bf16 %v4110_v26  ;;  %v4112_v63 = vunpack.i.h.bf16 %v4110_v26 }
 0x553   : > { %v5904_v61 = vpop.permute.xlu1 %2012 }
 0x554   : > { %1614 = vmatpush.msrb.mxu1 %v4112_v63  ;;  %1636 = vmatpush.msra.mxu2 %v4111_v1 }
 0x556   : > { %1615 = vmatpush.msrb.mxu1 %v4117_v55  ;;  %1637 = vmatpush.msra.mxu2 %v4116_v62 }
 0x558   : > { %1616 = vmatpush.msrb.mxu1 %v4122_v13  ;;  %1638 = vmatpush.msra.mxu2 %v4121_v3 }
 0x559   : > { %v4140_v46 = vpop.permute.xlu0 %4139 }
 0x55a   : > { %1617 = vmatpush.msrb.mxu1 %v4127_v22  ;;  %1639 = vmatpush.msra.mxu2 %v4126_v53  ;;  %v4141_v15 = vunpack.i.l.bf16 %v4140_v46  ;;  %v4142_v9 = vunpack.i.h.bf16 %v4140_v46 }
 0x55b   : > { %v4170_v1 = vpop.permute.xlu1 %4169 }
 0x55c   : > { %1618 = vmatpush.msrb.mxu1 %v4132_v29  ;;  %1640 = vmatpush.msra.mxu2 %v4131_v5  ;;  %v4172_v13 = vunpack.i.h.bf16 %v4170_v1  ;;  %v4171_v45 = vunpack.i.l.bf16 %v4170_v1  ;;  %v7184_v29 = vld [vmem:[#allocation15_spill] sm:$0xff] }
 0x55e   : > { %1619 = vmatpush.msrb.mxu1 %v4137_v14  ;;  %1641 = vmatpush.msra.mxu2 %v4136_v52 }
 0x560   : > { %1620 = vmatpush.msrb.mxu1 %v4142_v9  ;;  %1642 = vmatpush.msra.mxu2 %v4141_v15 }
 0x561   : > { %v5894_v0 = vpop.permute.xlu0 %2022 }
 0x562   : > { %1621 = vmatpush.msrb.mxu1 %v4147_v16  ;;  %1643 = vmatpush.msra.mxu2 %v4146_v23  ;;  %v5926_v16 = vpop.permute.xlu2 %2050 }
 0x564   : > { %1622 = vmatpush.msrb.mxu1 %v4152_v40  ;;  %1644 = vmatpush.msra.mxu2 %v4151_v4 }
 0x566   : > { %1623 = vmatpush.msrb.mxu1 %v4156_v57 }
 0x568   : > { %1624 = vmatpush.msrb.mxu1 %v4157_v18 }
 0x569   : > { %v5898_v6 = vpop.permute.xlu0 %2048 }
 0x56a   : > { %v5934_v4 = vpop.permute.xlu2 %2018 }
 0x572   : > { %v5902_v39 = vpop.permute.xlu0 %2016  ;;  %v5940_v57 = vpop.permute.xlu2 %2044 }
 0x577   : > { %v1305_v56 = vpop.f32.mrf.mxu0 }
 0x57a   : > { %v4160_v41 = vpop.permute.xlu0 %4159 }
 0x57b   : > { %v4161_v31 = vunpack.i.l.bf16 %v4160_v41  ;;  %v4162_v28 = vunpack.i.h.bf16 %v4160_v41 }
 0x57d   : > { %1970 = vmatpush.msrb.mxu2 %v4161_v31  ;;  %v1285_v8 = vpop.f32.mrf.mxu3 }
 0x57e   : > { %v5906_v26 = vadd.f32 %v1305_v56, %v1285_v8  ;;  %v5948_v56 = vpop.permute.xlu2 %2042 }
 0x57f   : > { %1971 = vmatpush.msrb.mxu2 %v4162_v28  ;;  %v1477_v62 = vpop.f32.mrf.mxu0  ;;  %v7185_v28 = vld [vmem:[#allocation10_spill] sm:$0xff] }
 0x580   : > { %7183 = vst [vmem:[#allocation26_spill] sm:$0xff] %v5906_v26  ;;  %v1481_v22 = vmul.f32 0.5, %v1477_v62 }
 0x582   : > { %v4165_v63 = vpop.permute.xlu0 %4164 }
 0x583   : > { %v4167_v55 = vunpack.i.h.bf16 %v4165_v63  ;;  %v4166_v3 = vunpack.i.l.bf16 %v4165_v63  ;;  %v7186_v63 = vld [vmem:[#allocation28_spill] sm:$0xff] }
 0x585   : > { %1950 = vmatpush.msra.mxu1 %v4167_v55  ;;  %1972 = vmatpush.msrb.mxu2 %v4166_v3  ;;  %v1457_v53 = vpop.f32.mrf.mxu3 }
 0x586   : > { %v1480_v46 = vmul.f32 0.5, %v1457_v53  ;;  %v5954_v31 = vpop.permute.xlu2 %2040 }
 0x587   : > { %1951 = vmatpush.msra.mxu1 %v4172_v13  ;;  %1973 = vmatpush.msrb.mxu2 %v4171_v45  ;;  %v7187_v45 = vld [vmem:[#allocation13_spill] sm:$0xff] }
 0x588   : > { %v1482_v5 = vmax.f32 %v1480_v46, %v1481_v22 }
 0x58a   : > { %1483 = vmax.xlane.f32.xlu2 %v1482_v5  ;;  %v5930_v38 = vpop.permute.xlu0 %2010 }
 0x592   : > { %v4180_v40 = vpop.permute.xlu0 %4179 }
 0x59a   : > { %v4185_v18 = vpop.permute.xlu0 %4184 }
 0x5a2   : > { %4174 = vrot.lane.b32.xlu2 %v5689_v54, %s4705_s10  ;;  %v4190_v41 = vpop.permute.xlu0 %4189 }
 0x5aa   : > { %2008 = vrot.lane.b32.xlu2 %v7152_v35, %s4706_s18  ;;  %v4195_v8 = vpop.permute.xlu0 %4194 }
 0x5b2   : > { %2036 = vrot.lane.b32.xlu2 %v7141_v47, %s4706_s18  ;;  %v4200_v53 = vpop.permute.xlu0 %4199 }
 0x5b7   : > { %v1818_v52 = vpop.f32.mrf.mxu0 }
 0x5b8   : > { %v5916_v15 = vmul.f32 0.5, %v1818_v52  ;;  %v7188_v52 = vld [vmem:[#allocation8_spill] sm:$0xff] }
 0x5ba   : > { %2006 = vrot.lane.b32.xlu2 %v7184_v29, %s4706_s18  ;;  %v4205_v48 = vpop.permute.xlu0 %4204 }
 0x5bd   : > { %v1798_v14 = vpop.f32.mrf.mxu3 }
 0x5be   : > { %v5918_v9 = vmul.f32 0.5, %v1798_v14 }
 0x5c0   : > { %v1823_v23 = vmax.f32 %v5918_v9, %v5916_v15 }
 0x5c2   : > { %1824 = vmax.xlane.f32.xlu0 %v1823_v23  ;;  %2034 = vrot.lane.b32.xlu2 %v7160_v2, %s4706_s18 }
 0x5ca   : > { %2004 = vrot.lane.b32.xlu2 %v7139_v44, %s4706_s18 }
 0x5d2   : > { %2032 = vrot.lane.b32.xlu2 %v7132_v24, %s4706_s18 }
 0x5d6   : > { %4209 = vrot.lane.b32.xlu0 %v5591_v7, %s4705_s10  ;;  %v4196_v7 = vunpack.i.l.bf16 %v4195_v8 }
 0x5da   : > { %4214 = vrot.lane.b32.xlu2 %v5605_v30, %s4705_s10 }
 0x5de   : > { %2030 = vrot.lane.b32.xlu0 %v7143_v21, %s4706_s18 }
 0x5e2   : > { %4219 = vrot.lane.b32.xlu2 %v5800_v27, %s4705_s10  ;;  %v4201_v27 = vunpack.i.l.bf16 %v4200_v53 }
 0x5e6   : > { %2000 = vrot.lane.b32.xlu0 %v4920_v37, %s4706_s18 }
 0x5ea   : > { %4224 = vrot.lane.b32.xlu2 %v5712_v17, %s4705_s10  ;;  %v4182_v17 = vunpack.i.h.bf16 %v4180_v40 }
 0x5ee   : > { %2028 = vrot.lane.b32.xlu0 %v5042_v12, %s4706_s18 }
 0x5f2   : > { %1998 = vrot.lane.b32.xlu2 %v7142_v50, %s4706_s18 }
 0x5f6   : > { %2026 = vrot.lane.b32.xlu0 %v5033_v10, %s4706_s18 }
 0x5fa   : > { %1996 = vrot.lane.b32.xlu2 %v7185_v28, %s4706_s18 }
 0x5fd   : > { %v1484_v1 = vpop.xlane.xlu2 %1483 }
 0x5fe   : > { %2024 = vrot.lane.b32.xlu0 %v7186_v63, %s4706_s18  ;;  %v1485_v62 = vsub.f32 %v1480_v46, %v1484_v1  ;;  %v1486_v55 = vsub.f32 %v1481_v22, %v1484_v1  ;;  %v4181_v46 = vunpack.i.l.bf16 %v4180_v40  ;;  %v4187_v1 = vunpack.i.h.bf16 %v4185_v18  ;;  %v7190_v40 = vld [vmem:[#allocation25_spill] sm:$0xff] }
 0x600   : > { %v1487_v3 = vmul.f32 1.442695, %v1485_v62  ;;  %v1489_v13 = vmul.f32 1.442695, %v1486_v55  ;;  %v7189_v62 = vld [vmem:[#allocation27_spill] sm:$0xff] }
 0x602   : > { %4571 = vpow2.f32 %v1487_v3  ;;  %1990 = vrot.lane.b32.xlu2 %v7187_v45, %s4706_s18  ;;  %v4186_v3 = vunpack.i.l.bf16 %v4185_v18  ;;  %v4207_v18 = vunpack.i.h.bf16 %v4205_v48 }
 0x603   : > { %4573 = vpow2.f32 %v1489_v13  ;;  %v4192_v13 = vunpack.i.h.bf16 %v4190_v41 }
 0x605   : > { %v4175_v5 = vpop.permute.xlu2 %4174 }
 0x606   : > { %1992 = vrot.lane.b32.xlu0 %v7188_v52, %s4706_s18  ;;  %v4177_v14 = vunpack.i.h.bf16 %v4175_v5  ;;  %v4176_v23 = vunpack.i.l.bf16 %v4175_v5  ;;  %v4191_v5 = vunpack.i.l.bf16 %v4190_v41  ;;  %v4206_v41 = vunpack.i.l.bf16 %v4205_v48 }
 0x608   : > { %v5966_v26 = vpop.eup %4571  ;;  %1952 = vmatpush.msra.mxu1 %v4177_v14  ;;  %1974 = vmatpush.msrb.mxu2 %v4176_v23  ;;  %v4197_v23 = vunpack.i.h.bf16 %v4195_v8  ;;  %v7193_v8 = vld [vmem:[#allocation50_spill] sm:$0xff] }
 0x609   : > { %v5968_v22 = vpop.eup %4573 }
 0x60a   : > { %2363 = vrot.lane.b32.xlu2 %v7189_v62, %s4707_s19  ;;  %1953 = vmatpush.msra.mxu1 %v4182_v17  ;;  %v1491_v55 = vadd.f32 %v5968_v22, %v5966_v26  ;;  %v4202_v17 = vunpack.i.h.bf16 %v4200_v53  ;;  %v7196_v53 = vld [vmem:[#allocation20_spill] sm:$0xff] }
 0x60b   : > { %1975 = vmatpush.msrb.mxu2 %v4181_v46  ;;  %v7191_v46 = vld [vmem:[#allocation52_spill] sm:$0xff] }
 0x60c   : > { %1492 = vadd.xlane.f32.xlu1 %v1491_v55  ;;  %1954 = vmatpush.msra.mxu1 %v4187_v1  ;;  %v7192_v55 = vld [vmem:[#allocation24_spill] sm:$0xff] }
 0x60d   : > { %1976 = vmatpush.msrb.mxu2 %v4186_v3  ;;  %v5974_v14 = vpop.permute.xlu2 %2008 }
 0x60e   : > { %2361 = vrot.lane.b32.xlu0 %v7190_v40, %s4707_s19  ;;  %1955 = vmatpush.msra.mxu1 %v4192_v13 }
 0x60f   : > { %1977 = vmatpush.msrb.mxu2 %v4191_v5  ;;  %v7197_v5 = vld [vmem:[#allocation18_spill] sm:$0xff] }
 0x610   : > { %1956 = vmatpush.msra.mxu1 %v4197_v23  ;;  %v7198_v23 = vld [vmem:[#allocation46_spill] sm:$0xff] }
 0x611   : > { %1978 = vmatpush.msrb.mxu2 %v4196_v7  ;;  %v7194_v7 = vld [vmem:[#allocation49_spill] sm:$0xff] }
 0x612   : > { %2395 = vrot.lane.b32.xlu2 %v7191_v46, %s4707_s19  ;;  %1957 = vmatpush.msra.mxu1 %v4202_v17 }
 0x613   : > { %1979 = vmatpush.msrb.mxu2 %v4201_v27  ;;  %v7195_v27 = vld [vmem:[#allocation78_spill] sm:$0xff] }
 0x614   : > { %1958 = vmatpush.msra.mxu1 %v4207_v18 }
 0x615   : > { %1980 = vmatpush.msrb.mxu2 %v4206_v41  ;;  %v5980_v1 = vpop.permute.xlu2 %2036  ;;  %v6010_v41 = vpop.permute.xlu1 %2038 }
 0x616   : > { %2359 = vrot.lane.b32.xlu0 %v7192_v55, %s4707_s19 }
 0x61a   : > { %2393 = vrot.lane.b32.xlu2 %v7193_v8, %s4707_s19  ;;  %v7200_v8 = vld [vmem:[#allocation64_spill] sm:$0xff] }
 0x61d   : > { %v5986_v3 = vpop.permute.xlu2 %2006  ;;  %v6020_v54 = vpop.permute.xlu1 %2002 }
 0x61e   : > { %2357 = vrot.lane.b32.xlu0 %v4984_v60, %s4707_s19 }
 0x622   : > { %2391 = vrot.lane.b32.xlu2 %v7194_v7, %s4707_s19 }
 0x625   : > { %4234 = vrot.lane.b32.xlu1 %v7195_v27, %s4705_s10  ;;  %v5994_v48 = vpop.permute.xlu2 %2034  ;;  %v7199_v27 = vld [vmem:[#allocation45_spill] sm:$0xff]  ;;  %s4715_s10 = smov 24  }
 0x626   : > { %2355 = vrot.lane.b32.xlu0 %v7196_v53, %s4707_s19 }
 0x62a   : > { %2389 = vrot.lane.b32.xlu2 %v5132_v43, %s4707_s19 }
 0x62d   : > { %v6000_v13 = vpop.permute.xlu2 %2004 }
 0x62e   : > { %2353 = vrot.lane.b32.xlu0 %v7197_v5, %s4707_s19 }
 0x632   : > { %2387 = vrot.lane.b32.xlu2 %v7198_v23, %s4707_s19 }
 0x635   : > { %v6006_v17 = vpop.permute.xlu2 %2032  ;;  %v1825_v18 = vpop.xlane.xlu0 %1824 }
 0x636   : > { %2351 = vrot.lane.b32.xlu0 %v4957_v51, %s4707_s19  ;;  %v1826_v30 = vsub.f32 %v5918_v9, %v1825_v18  ;;  %v1827_v43 = vsub.f32 %v5916_v15, %v1825_v18 }
 0x638   : > { %v1828_v23 = vmul.f32 1.442695, %v1826_v30  ;;  %v1830_v63 = vmul.f32 1.442695, %v1827_v43  ;;  %v7202_v43 = vld [vmem:[#allocation44_spill] sm:$0xff] }
 0x63a   : > { %2385 = vrot.lane.b32.xlu2 %v7199_v27, %s4707_s19  ;;  %4575 = vpow2.f32 %v1828_v23  ;;  %v7201_v27 = vld [vmem:[#allocation65_spill] sm:$0xff] }
 0x63b   : > { %4577 = vpow2.f32 %v1830_v63 }
 0x63d   : > { %v4215_v7 = vpop.permute.xlu2 %4214 }
 0x63e   : > { %4244 = vrot.lane.b32.xlu0 %v7200_v8, %s4706_s18  ;;  %v4217_v30 = vunpack.i.h.bf16 %v4215_v7  ;;  %v4216_v8 = vunpack.i.l.bf16 %v4215_v7 }
 0x640   : > { %v6024_v25 = vpop.eup %4575 }
 0x641   : > { %v6026_v60 = vpop.eup %4577 }
 0x642   : > { %2349 = vrot.lane.b32.xlu2 %v7152_v35, %s4707_s19  ;;  %v4230_v35 = vpop.permute.xlu1 %4229 }
 0x645   : > { %v4220_v5 = vpop.permute.xlu2 %4219 }
 0x646   : > { %4249 = vrot.lane.b32.xlu0 %v7201_v27, %s4706_s18  ;;  %v4222_v23 = vunpack.i.h.bf16 %v4220_v5  ;;  %v1832_v27 = vadd.f32 %v6026_v60, %v6024_v25  ;;  %v4221_v55 = vunpack.i.l.bf16 %v4220_v5 }
 0x648   : > { %v4210_v9 = vpop.permute.xlu0 %4209 }
 0x649   : > { %v4212_v15 = vunpack.i.h.bf16 %v4210_v9  ;;  %v4211_v18 = vunpack.i.l.bf16 %v4210_v9 }
 0x64a   : > { %2383 = vrot.lane.b32.xlu2 %v7202_v43, %s4707_s19 }
 0x64b   : > { %1959 = vmatpush.msra.mxu1 %v4212_v15  ;;  %1981 = vmatpush.msrb.mxu2 %v4211_v18  ;;  %v4232_v15 = vunpack.i.h.bf16 %v4230_v35  ;;  %v4231_v18 = vunpack.i.l.bf16 %v4230_v35 }
 0x64d   : > { %1960 = vmatpush.msra.mxu1 %v4217_v30  ;;  %1982 = vmatpush.msrb.mxu2 %v4216_v8  ;;  %v4225_v63 = vpop.permute.xlu2 %4224  ;;  %v7203_v8 = vld [vmem:[#allocation69_spill] sm:$0xff]  ;;  %v7204_v30 = vld [vmem:[#allocation66_spill] sm:$0xff] }
 0x64e   : > { %2347 = vrot.lane.b32.xlu0 %v7184_v29, %s4707_s19  ;;  %v4227_v9 = vunpack.i.h.bf16 %v4225_v63  ;;  %v4226_v40 = vunpack.i.l.bf16 %v4225_v63 }
 0x64f   : > { %1833 = vadd.xlane.f32.xlu1 %v1832_v27  ;;  %1961 = vmatpush.msra.mxu1 %v4222_v23 }
 0x650   : > { %1983 = vmatpush.msrb.mxu2 %v4221_v55  ;;  %v6034_v7 = vpop.permute.xlu0 %2030  ;;  %v7205_v55 = vld [vmem:[#allocation70_spill] sm:$0xff] }
 0x651   : > { %1962 = vmatpush.msra.mxu1 %v4227_v9  ;;  %v7207_v9 = vld [vmem:[#allocation9_spill] sm:$0xff] }
 0x652   : > { %1984 = vmatpush.msrb.mxu2 %v4226_v40  ;;  %4259 = vrot.lane.b32.xlu2 %v7203_v8, %s4706_s18  ;;  %v7206_v40 = vld [vmem:[#allocation71_spill] sm:$0xff] }
 0x653   : > { %1963 = vmatpush.msra.mxu1 %v4232_v15 }
 0x654   : > { %1985 = vmatpush.msrb.mxu2 %v4231_v18  ;;  %v7208_v18 = vld [vmem:[#allocation23_spill] sm:$0xff] }
 0x655   : > { %v6038_v5 = vpop.permute.xlu2 %1998 }
 0x656   : > { %4289 = vrot.lane.b32.xlu0 %v7204_v30, %s4706_s18  ;;  %v7211_v30 = vld [vmem:[#allocation21_spill] sm:$0xff] }
 0x658   : > { %v6042_v63 = vpop.permute.xlu0 %2000 }
 0x65a   : > { %4264 = vrot.lane.b32.xlu2 %v7205_v55, %s4706_s18 }
 0x65d   : > { %v6046_v27 = vpop.permute.xlu2 %1996 }
 0x65e   : > { %2337 = vrot.lane.b32.xlu0 %v7185_v28, %s4707_s19 }
 0x660   : > { %v6050_v35 = vpop.permute.xlu0 %2028 }
 0x662   : > { %4269 = vrot.lane.b32.xlu2 %v7206_v40, %s4706_s18  ;;  %v7210_v40 = vld [vmem:[#allocation60_spill] sm:$0xff] }
 0x665   : > { %v6054_v23 = vpop.permute.xlu2 %1990 }
 0x666   : > { %2335 = vrot.lane.b32.xlu0 %v7207_v9, %s4707_s19 }
 0x668   : > { %v6058_v15 = vpop.permute.xlu0 %2026  ;;  %1994 = vrot.lane.b32.xlu1 %v7207_v9, %s4706_s18  ;;  %v7213_v9 = vld [vmem:[#allocation61_spill] sm:$0xff] }
 0x66a   : > { %4274 = vrot.lane.b32.xlu2 %v7208_v18, %s4706_s18  ;;  %v7214_v18 = vld [vmem:[#allocation72_spill] sm:$0xff] }
 0x66d   : > { %v6064_v55 = vpop.permute.xlu2 %2363 }
 0x66e   : > { %7209 = vst [vmem:[#allocation41_spill] sm:$0xff] %v6064_v55  ;;  %2333 = vrot.lane.b32.xlu0 %v7188_v52, %s4707_s19 }
 0x670   : > { %v6068_v8 = vpop.permute.xlu0 %2024  ;;  %4239 = vrot.lane.b32.xlu1 %v7210_v40, %s4706_s18  ;;  %v7217_v40 = vld [vmem:[#allocation42_spill] sm:$0xff] }
 0x672   : > { %4279 = vrot.lane.b32.xlu2 %v7211_v30, %s4706_s18 }
 0x675   : > { %v6074_v28 = vpop.permute.xlu2 %2395 }
 0x676   : > { %7212 = vst [vmem:[#allocation17_spill] sm:$0xff] %v6074_v28 }
 0x678   : > { %v6076_v43 = vpop.permute.xlu0 %1992  ;;  %4254 = vrot.lane.b32.xlu1 %v7213_v9, %s4706_s18 }
 0x67a   : > { %4284 = vrot.lane.b32.xlu2 %v7214_v18, %s4706_s18 }
 0x67d   : > { %v6082_v29 = vpop.permute.xlu2 %2393 }
 0x67e   : > { %7215 = vst [vmem:[#allocation59_spill] sm:$0xff] %v6082_v29 }
 0x67f   : > { %v1493_v52 = vpop.xlane.xlu1 %1492 }
 0x680   : > { %4579 = vrcp.f32 %v1493_v52  ;;  %v6084_v55 = vpop.permute.xlu0 %2361  ;;  %2381 = vrot.lane.b32.xlu1 %v7217_v40, %s4707_s19  ;;  %v1505_v29 = vand.u32 2147483648, %v1493_v52  ;;  %v1503_v40 = vand.u32 2147483647, %v1493_v52  ;;  %vm1499_vm11 = vweird.f32 %v1493_v52 }
 0x681   : > { %7216 = vst [vmem:[#allocation58_spill] sm:$0xff] %v6084_v55 }
 0x682   : > { %2375 = vrot.lane.b32.xlu2 %v7160_v2, %s4707_s19  ;;  %vm1504_vm13 = vcmp.eq.f32.partialorder %v1503_v40, 8.507059e+37 }
 0x685   : > { %v6090_v28 = vpop.permute.xlu2 %2391 }
 0x686   : > { %v4580_v30 = vpop.eup %4579  ;;  %7218 = vst [vmem:[#allocation56_spill] sm:$0xff] %v6090_v28  ;;  %v1506_v28 = vor.u32 1.1754944e-38, %v1505_v29 }
 0x687   : > { %v1495_v62 = vmul.f32 %v4580_v30, %v1493_v52  ;;  %vm1500_vm10 = vweird.f32 %v4580_v30 }
 0x688   : > { %v6092_v9 = vpop.permute.xlu0 %2359  ;;  %2345 = vrot.lane.b32.xlu1 %v7139_v44, %s4707_s19  ;;  %vm1501_vm12 = vmor %vm1499_vm11, %vm1500_vm10 }
 0x689   : > { %7219 = vst [vmem:[#allocation36_spill] sm:$0xff] %v6092_v9  ;;  %v1496_v18 = vsub.f32 1.0, %v1495_v62  ;;  %v7220_v62 = vld [vmem:[#allocation40_spill] sm:$0xff] }
 0x68a   : > { %2339 = vrot.lane.b32.xlu2 %v7142_v50, %s4707_s19 }
 0x68b   : > { %v1497_v55 = vmul.f32 %v4580_v30, %v1496_v18 }
 0x68d   : > { %v1498_v2 = vadd.f32 %v4580_v30, %v1497_v55  ;;  %v6098_v9 = vpop.permute.xlu2 %2389 }
 0x68f   : > { %v1502_v46 = vsel %vm1501_vm12, %v4580_v30, %v1498_v2 }
 0x690   : > { %v6100_v45 = vpop.permute.xlu0 %2357  ;;  %2379 = vrot.lane.b32.xlu1 %v7220_v62, %s4707_s19  ;;  %v1507_v44 = vsel %vm1504_vm13, %v1506_v28, %v1502_v46 }
 0x691   : > { %v1508_v18 = vmul.f32 %v5966_v26, %v1507_v44  ;;  %v1509_v50 = vmul.f32 %v5968_v22, %v1507_v44  ;;  %v7221_v26 = vld [vmem:[#allocation12_spill] sm:$0xff]  ;;  %v7222_v22 = vld [vmem:[#allocation73_spill] sm:$0xff] }
 0x692   : > { %2373 = vrot.lane.b32.xlu2 %v7132_v24, %s4707_s19 }
 0x693   : > { %3747 = vst [vmem:[%s5444_s23 + $0x20] sm:$0xff] %v1508_v18  ;;  %1625 = vmatmul.f32.vlgmr.msrb.gmra.mxu1 %v1508_v18  ;;  %1645 = vmatmul.f32.vlgmr.msra.gmra.mxu2 %v1509_v50 }
 0x694   : > { %3748 = vst [vmem:[%s5444_s23 + $0x28] sm:$0xff] %v1509_v50  ;;  %3802 = vmatpush.xpose.msk.msra.mxu2 %vm723_vm1, %v5886_v42  ;;  %v7223_v42 = vld [vmem:[#allocation68_spill] sm:$0xff] }
 0x695   : > { %v6118_v44 = vpop.permute.xlu2 %2387 }
 0x697   : > { %v4235_v2 = vpop.permute.xlu1 %4234 }
 0x698   : > { %v4236_v29 = vunpack.i.l.bf16 %v4235_v2  ;;  %3803 = vmatpush.xpose.msk.msra.mxu2 %vm723_vm1, %v5890_v34  ;;  %v6114_v28 = vpop.permute.xlu0 %2355  ;;  %2343 = vrot.lane.b32.xlu1 %v7221_v26, %s4707_s19  ;;  %v4237_v52 = vunpack.i.h.bf16 %v4235_v2 }
 0x69a   : > { %1964 = vmatpush.msra.mxu1 %v4236_v29  ;;  %4309 = vrot.lane.b32.xlu2 %v7222_v22, %s4706_s18 }
 0x69c   : > { %3804 = vmatpush.xpose.msk.msra.mxu2 %vm723_vm1, %v5926_v16  ;;  %1965 = vmatpush.msra.mxu1 %v4237_v52 }
 0x69d   : > { %v6136_v34 = vpop.permute.xlu2 %2385 }
 0x69e   : > { %3785 = vmatpush.xpose.msk.msrb.mxu1 %vm723_vm1, %v5894_v0 }
 0x6a0   : > { %3805 = vmatpush.xpose.msk.msra.mxu2 %vm723_vm1, %v5898_v6  ;;  %v6128_v50 = vpop.permute.xlu0 %2353  ;;  %2377 = vrot.lane.b32.xlu1 %v7141_v47, %s4707_s19 }
 0x6a2   : > { %3786 = vmatpush.xpose.msk.msrb.mxu1 %vm723_vm1, %v5892_v32  ;;  %4314 = vrot.lane.b32.xlu2 %v7223_v42, %s4706_s18 }
 0x6a4   : > { %3806 = vmatpush.xpose.msk.msra.mxu2 %vm723_vm1, %v5896_v36 }
 0x6a5   : > { %v6156_v32 = vpop.permute.xlu2 %2349 }
 0x6a6   : > { %3787 = vmatpush.xpose.msk.msrb.mxu1 %vm723_vm1, %v5934_v4 }
 0x6a8   : > { %3807 = vmatpush.xpose.msk.msra.mxu2 %vm723_vm1, %v5940_v57  ;;  %v6144_v0 = vpop.permute.xlu0 %2351  ;;  %2341 = vrot.lane.b32.xlu1 %v4920_v37, %s4707_s19 }
 0x6aa   : > { %3788 = vmatpush.xpose.msk.msrb.mxu1 %vm723_vm1, %v5902_v39  ;;  %2367 = vrot.lane.b32.xlu2 %v5033_v10, %s4707_s19 }
 0x6ac   : > { %3808 = vmatpush.xpose.msk.msra.mxu2 %vm723_vm1, %v5948_v56 }
 0x6ad   : > { %v6170_v6 = vpop.permute.xlu2 %2383 }
 0x6ae   : > { %3789 = vmatpush.xpose.msk.msrb.mxu1 %vm723_vm1, %v5900_v58 }
 0x6b0   : > { %3809 = vmatpush.xpose.msk.msra.mxu2 %vm723_vm1, %v5954_v31  ;;  %v6160_v36 = vpop.permute.xlu0 %4244 }
 0x6b1   : > { %v4246_v30 = vunpack.i.l.bf16 %v6160_v36 }
 0x6b2   : > { %3790 = vmatpush.xpose.msk.msrb.mxu1 %vm723_vm1, %v5904_v61  ;;  %2696 = vrot.lane.b32.xlu2 %v7196_v53, %s4708_s20 }
 0x6b4   : > { %3810 = vmatpush.xpose.msk.msra.mxu2 %vm723_vm1, %v6010_v41 }
 0x6b5   : > { %v6189_v61 = vpop.permute.xlu2 %4259 }
 0x6b6   : > { %3791 = vmatpush.xpose.msk.msrb.mxu1 %vm723_vm1, %v5930_v38  ;;  %v4262_v18 = vunpack.i.h.bf16 %v6189_v61 }
 0x6b8   : > { %3811 = vmatpush.xpose.msk.msra.mxu2 %vm723_vm1, %v5980_v1  ;;  %v6174_v58 = vpop.permute.xlu0 %4249 }
 0x6b9   : > { %v4251_v39 = vunpack.i.l.bf16 %v6174_v58 }
 0x6ba   : > { %3792 = vmatpush.xpose.msk.msrb.mxu1 %vm723_vm1, %v5974_v14  ;;  %2692 = vrot.lane.b32.xlu2 %v4957_v51, %s4708_s20 }
 0x6bb   : > { %2311 = vmatpush.msra.mxu0 %v4251_v39 }
 0x6bc   : > { %3812 = vmatpush.xpose.msk.msra.mxu2 %vm723_vm1, %v5994_v48 }
 0x6bd   : > { %v4265_v57 = vpop.permute.xlu2 %4264 }
 0x6be   : > { %3793 = vmatpush.xpose.msk.msrb.mxu1 %vm723_vm1, %v5986_v3  ;;  %v4266_v2 = vunpack.i.l.bf16 %v4265_v57  ;;  %v4267_v29 = vunpack.i.h.bf16 %v4265_v57 }
 0x6c0   : > { %3813 = vmatpush.xpose.msk.msra.mxu2 %vm723_vm1, %v6006_v17  ;;  %v6233_v40 = vpop.permute.xlu0 %2347 }
 0x6c2   : > { %3794 = vmatpush.xpose.msk.msrb.mxu1 %vm723_vm1, %v6000_v13  ;;  %v1834_v16 = vpop.xlane.xlu1 %1833  ;;  %4339 = vrot.lane.b32.xlu2 %v5770_v20, %s4707_s19 }
 0x6c3   : > { %4581 = vrcp.f32 %v1834_v16  ;;  %v1846_v31 = vand.u32 2147483648, %v1834_v16  ;;  %v1844_v14 = vand.u32 2147483647, %v1834_v16  ;;  %vm1840_vm15 = vweird.f32 %v1834_v16 }
 0x6c4   : > { %3814 = vmatpush.xpose.msk.msra.mxu2 %vm723_vm1, %v6034_v7 }
 0x6c5   : > { %v1847_v1 = vor.u32 1.1754944e-38, %v1846_v31  ;;  %vm1845_vm3 = vcmp.eq.f32.partialorder %v1844_v14, 8.507059e+37  ;;  %v4270_v41 = vpop.permute.xlu2 %4269 }
 0x6c6   : > { %3795 = vmatpush.xpose.msk.msrb.mxu1 %vm723_vm1, %v6020_v54  ;;  %v4271_v52 = vunpack.i.l.bf16 %v4270_v41 }
 0x6c8   : > { %3815 = vmatpush.xpose.msk.msra.mxu2 %vm723_vm1, %v6050_v35 }
 0x6c9   : > { %v4582_v38 = vpop.eup %4581 }
 0x6ca   : > { %3796 = vmatpush.xpose.msk.msrb.mxu1 %vm723_vm1, %v6042_v63  ;;  %v1836_v4 = vmul.f32 %v4582_v38, %v1834_v16  ;;  %4344 = vrot.lane.b32.xlu2 %v5780_v59, %s4707_s19  ;;  %vm1841_vm14 = vweird.f32 %v4582_v38  ;;  %v4247_v63 = vunpack.i.h.bf16 %v6160_v36  ;;  %v4272_v36 = vunpack.i.h.bf16 %v4270_v41 }
 0x6cb   : > { %vm1842_vm2 = vmor %vm1840_vm15, %vm1841_vm14 }
 0x6cc   : > { %v1837_v56 = vsub.f32 1.0, %v1836_v4  ;;  %3816 = vmatpush.xpose.msk.msra.mxu2 %vm723_vm1, %v6058_v15  ;;  %v4290_v4 = vpop.permute.xlu0 %4289 }
 0x6cd   : > { %v4292_v57 = vunpack.i.h.bf16 %v4290_v4 }
 0x6ce   : > { %3797 = vmatpush.xpose.msk.msrb.mxu1 %vm723_vm1, %v6038_v5  ;;  %v1838_v54 = vmul.f32 %v4582_v38, %v1837_v56 }
 0x6d0   : > { %v1839_v46 = vadd.f32 %v4582_v38, %v1838_v54  ;;  %3817 = vmatpush.xpose.msk.msra.mxu2 %vm723_vm1, %v6068_v8 }
 0x6d2   : > { %3798 = vmatpush.xpose.msk.msrb.mxu1 %vm723_vm1, %v6046_v27  ;;  %v1843_v3 = vsel %vm1842_vm2, %v4582_v38, %v1839_v46  ;;  %4349 = vrot.lane.b32.xlu2 %v5790_v33, %s4707_s19 }
 0x6d3   : > { %v1848_v48 = vsel %vm1845_vm3, %v1847_v1, %v1843_v3 }
 0x6d4   : > { %v1849_v13 = vmul.f32 %v6024_v25, %v1848_v48  ;;  %v1850_v17 = vmul.f32 %v6026_v60, %v1848_v48  ;;  %v4275_v25 = vpop.permute.xlu2 %4274 }
 0x6d5   : > { %v4277_v16 = vunpack.i.h.bf16 %v4275_v25 }
 0x6d6   : > { %3783 = vst [vmem:[%s5444_s23 + $0x30] sm:$0xff] %v1849_v13  ;;  %1966 = vmatmul.f32.vlgmr.msra.gmra.mxu1 %v1849_v13  ;;  %1986 = vmatmul.f32.vlgmr.msrb.gmra.mxu2 %v1850_v17 }
 0x6d7   : > { %3784 = vst [vmem:[%s5444_s23 + $0x38] sm:$0xff] %v1850_v17 }
 0x6da   : > { %v1995_v7 = vpop.permute.xlu1 %1994  ;;  %4354 = vrot.lane.b32.xlu2 %v5564_v11, %s4707_s19 }
 0x6db   : > { %3799 = vmatpush.xpose.msk.msrb.mxu1 %vm723_vm1, %v1995_v7 }
 0x6dc   : > { %v4280_v55 = vpop.permute.xlu2 %4279 }
 0x6dd   : > { %v4281_v38 = vunpack.i.l.bf16 %v4280_v55  ;;  %v4282_v56 = vunpack.i.h.bf16 %v4280_v55 }
 0x6de   : > { %3818 = vmatmul.msk.f32.vlgmr.msra.gmra.mxu2 %vm723_vm1, %v6054_v23 }
 0x6df   : > { %3800 = vmatpush.xpose.msk.msrb.mxu1 %vm723_vm1, %v6076_v43  ;;  %v4252_v43 = vunpack.i.h.bf16 %v6174_v58  ;;  %v4276_v58 = vunpack.i.l.bf16 %v4275_v25 }
 0x6e2   : > { %v4240_v8 = vpop.permute.xlu1 %4239  ;;  %3801 = vmatmul.msk.f32.vlgmr.msrb.gmra.mxu1 %vm723_vm1, %v6054_v23  ;;  %4359 = vrot.lane.b32.xlu2 %v5700_v19, %s4707_s19  ;;  %v4261_v23 = vunpack.i.l.bf16 %v6189_v61  ;;  %v4291_v61 = vunpack.i.l.bf16 %v4290_v4 }
 0x6e3   : > { %v4241_v60 = vunpack.i.l.bf16 %v4240_v8  ;;  %v4242_v5 = vunpack.i.h.bf16 %v4240_v8  ;;  %v7225_v8 = vld [vmem:[#allocation62_spill] sm:$0xff] }
 0x6e4   : > { %v4285_v39 = vpop.permute.xlu2 %4284 }
 0x6e5   : > { %2291 = vmatpush.msra.mxu3 %v4241_v60  ;;  %v4286_v31 = vunpack.i.l.bf16 %v4285_v39  ;;  %v4287_v54 = vunpack.i.h.bf16 %v4285_v39  ;;  %v7226_v60 = vld [vmem:[#allocation63_spill] sm:$0xff] }
 0x6e7   : > { %2292 = vmatpush.msra.mxu3 %v4242_v5  ;;  %v7227_v5 = vld [vmem:[#allocation67_spill] sm:$0xff] }
 0x6e9   : > { %2293 = vmatpush.msra.mxu3 %v4246_v30 }
 0x6ea   : > { %v4255_v27 = vpop.permute.xlu1 %4254  ;;  %4364 = vrot.lane.b32.xlu2 %v5578_v49, %s4707_s19 }
 0x6eb   : > { %v4256_v35 = vunpack.i.l.bf16 %v4255_v27  ;;  %2294 = vmatpush.msra.mxu3 %v4247_v63  ;;  %v4257_v15 = vunpack.i.h.bf16 %v4255_v27  ;;  %v7228_v63 = vld [vmem:[#allocation13_spill] sm:$0xff]  ;;  %v7229_v27 = vld [vmem:[#allocation52_spill] sm:$0xff] }
 0x6ed   : > { %2295 = vmatpush.msra.mxu3 %v4252_v43  ;;  %2312 = vmatpush.msra.mxu0 %v4256_v35  ;;  %v7230_v35 = vld [vmem:[#allocation27_spill] sm:$0xff] }
 0x6ef   : > { %2296 = vmatpush.msra.mxu3 %v4257_v15  ;;  %2313 = vmatpush.msra.mxu0 %v4261_v23  ;;  %v7231_v15 = vld [vmem:[#allocation25_spill] sm:$0xff] }
 0x6f1   : > { %2297 = vmatpush.msra.mxu3 %v4262_v18  ;;  %2314 = vmatpush.msra.mxu0 %v4266_v2  ;;  %v7232_v2 = vld [vmem:[#allocation24_spill] sm:$0xff] }
 0x6f2   : > { %v6251_v30 = vpop.permute.xlu1 %2381 }
 0x6f3   : > { %2298 = vmatpush.msra.mxu3 %v4267_v29  ;;  %2315 = vmatpush.msra.mxu0 %v4271_v52  ;;  %v7233_v29 = vld [vmem:[#allocation22_spill] sm:$0xff] }
 0x6f5   : > { %2299 = vmatpush.msra.mxu3 %v4272_v36  ;;  %2316 = vmatpush.msra.mxu0 %v4276_v58  ;;  %v7234_v36 = vld [vmem:[#allocation55_spill] sm:$0xff] }
 0x6f7   : > { %2300 = vmatpush.msra.mxu3 %v4277_v16  ;;  %2317 = vmatpush.msra.mxu0 %v4281_v38 }
 0x6f9   : > { %2301 = vmatpush.msra.mxu3 %v4282_v56  ;;  %2318 = vmatpush.msra.mxu0 %v4286_v31  ;;  %v6279_v56 = vpop.permute.xlu2 %2375  ;;  %v7235_v31 = vld [vmem:[#allocation18_spill] sm:$0xff] }
 0x6fa   : > { %v6257_v55 = vpop.permute.xlu1 %2345 }
 0x6fb   : > { %2302 = vmatpush.msra.mxu3 %v4287_v54  ;;  %2319 = vmatpush.msra.mxu0 %v4291_v61 }
 0x6fd   : > { %2303 = vmatpush.msra.mxu3 %v4292_v57 }
 0x702   : > { %v6261_v43 = vpop.permute.xlu1 %2379 }
 0x70a   : > { %v6265_v23 = vpop.permute.xlu1 %2343 }
 0x710   : > { %v6237_v14 = vpop.f32.mrf.mxu1 }
 0x712   : > { %v6269_v18 = vpop.permute.xlu1 %2377 }
 0x716   : > { %v6239_v46 = vpop.f32.mrf.mxu2 }
 0x71a   : > { %v6275_v52 = vpop.permute.xlu1 %2341 }
 0x753   : > { %v1967_v1 = vpop.f32.mrf.mxu1 }
 0x759   : > { %v1987_v3 = vpop.f32.mrf.mxu2 }
 0x75a   : > { %v6241_v48 = vadd.f32 %v1987_v3, %v1967_v1  ;;  %v7236_v1 = vld [vmem:[#allocation42_spill] sm:$0xff]  ;;  %v6291_v3 = vpop.permute.xlu2 %2339 }
 0x75c   : > { %7224 = vst [vmem:[#allocation54_spill] sm:$0xff] %v6241_v48  ;;  %v7239_v48 = vld [vmem:[#allocation28_spill] sm:$0xff] }
 0x75f   : > { %v2139_v13 = vpop.f32.mrf.mxu1 }
 0x760   : > { %v2162_v41 = vmul.f32 0.5, %v2139_v13  ;;  %v7237_v13 = vld [vmem:[#allocation33_spill] sm:$0xff] }
 0x761   : > { %v2159_v17 = vpop.f32.mrf.mxu2 }
 0x762   : > { %v2163_v7 = vmul.f32 0.5, %v2159_v17 }
 0x764   : > { %v2164_v25 = vmax.f32 %v2162_v41, %v2163_v7 }
 0x766   : > { %2165 = vmax.xlane.f32.xlu1 %v2164_v25 }
 0x77f   : > { %4294 = vrot.lane.b32.xlu1 %v7225_v8, %s4706_s18 }
 0x787   : > { %4299 = vrot.lane.b32.xlu1 %v7226_v60, %s4706_s18 }
 0x78f   : > { %4304 = vrot.lane.b32.xlu1 %v7227_v5, %s4706_s18 }
 0x797   : > { %2371 = vrot.lane.b32.xlu1 %v7143_v21, %s4707_s19 }
 0x79f   : > { %2369 = vrot.lane.b32.xlu1 %v5042_v12, %s4707_s19 }
 0x7a7   : > { %2331 = vrot.lane.b32.xlu1 %v7228_v63, %s4707_s19 }
 0x7af   : > { %2736 = vrot.lane.b32.xlu1 %v7229_v27, %s4708_s20 }
 0x7b7   : > { %2704 = vrot.lane.b32.xlu1 %v7230_v35, %s4708_s20 }
 0x7bf   : > { %2702 = vrot.lane.b32.xlu1 %v7231_v15, %s4708_s20 }
 0x7c7   : > { %2700 = vrot.lane.b32.xlu1 %v7232_v2, %s4708_s20 }
 0x7cf   : > { %2698 = vrot.lane.b32.xlu1 %v7233_v29, %s4708_s20 }
 0x7d7   : > { %4319 = vrot.lane.b32.xlu1 %v7234_v36, %s4707_s19 }
 0x7d9   : > { %v2166_v58 = vpop.xlane.xlu1 %2165 }
 0x7da   : > { %v2167_v39 = vsub.f32 %v2162_v41, %v2166_v58  ;;  %v2168_v16 = vsub.f32 %v2163_v7, %v2166_v58  ;;  %v6295_v41 = vpop.permute.xlu2 %2373  ;;  %v7238_v58 = vld [vmem:[#allocation16_spill] sm:$0xff] }
 0x7dc   : > { %v2169_v38 = vmul.f32 1.442695, %v2167_v39  ;;  %v2171_v4 = vmul.f32 1.442695, %v2168_v16 }
 0x7de   : > { %4583 = vpow2.f32 %v2169_v38 }
 0x7df   : > { %4585 = vpow2.f32 %v2171_v4  ;;  %2694 = vrot.lane.b32.xlu1 %v7235_v31, %s4708_s20 }
 0x7e2   : > { %v4310_v4 = vpop.permute.xlu2 %4309 }
 0x7e3   : > { %v4312_v42 = vunpack.i.h.bf16 %v4310_v4 }
 0x7e4   : > { %v6283_v61 = vpop.eup %4583 }
 0x7e5   : > { %v6285_v54 = vpop.eup %4585 }
 0x7e6   : > { %v2173_v57 = vadd.f32 %v6285_v54, %v6283_v61 }
 0x7e7   : > { %2722 = vrot.lane.b32.xlu1 %v7236_v1, %s4708_s20 }
 0x7e8   : > { %2174 = vadd.xlane.f32.xlu0 %v2173_v57 }
 0x7ef   : > { %4334 = vrot.lane.b32.xlu1 %v7237_v13, %s4707_s19  ;;  %v7241_v13 = vld [vmem:[#allocation41_spill] sm:$0xff] }
 0x7f1   : > { %v4295_v17 = vpop.permute.xlu1 %4294 }
 0x7f2   : > { %v4297_v7 = vunpack.i.h.bf16 %v4295_v17  ;;  %v4296_v25 = vunpack.i.l.bf16 %v4295_v17 }
 0x7f4   : > { %2304 = vmatpush.msra.mxu3 %v4297_v7  ;;  %2320 = vmatpush.msra.mxu0 %v4296_v25  ;;  %v7240_v7 = vld [vmem:[#allocation50_spill] sm:$0xff]  ;;  %v4311_v25 = vunpack.i.l.bf16 %v4310_v4  ;;  %v7247_v4 = vld [vmem:[#allocation37_spill] sm:$0xff] }
 0x7f7   : > { %2690 = vrot.lane.b32.xlu1 %v7238_v58, %s4708_s20  ;;  %v7243_v58 = vld [vmem:[#allocation58_spill] sm:$0xff] }
 0x7f9   : > { %v4300_v39 = vpop.permute.xlu1 %4299 }
 0x7fa   : > { %v4302_v16 = vunpack.i.h.bf16 %v4300_v39  ;;  %v4301_v38 = vunpack.i.l.bf16 %v4300_v39  ;;  %v4315_v39 = vpop.permute.xlu2 %4314 }
 0x7fc   : > { %2365 = vrot.lane.b32.xlu0 %v7239_v48, %s4707_s19  ;;  %2305 = vmatpush.msra.mxu3 %v4302_v16  ;;  %v7242_v16 = vld [vmem:[#allocation15_spill] sm:$0xff] }
 0x7fd   : > { %2321 = vmatpush.msra.mxu0 %v4301_v38  ;;  %v4316_v38 = vunpack.i.l.bf16 %v4315_v39 }
 0x7ff   : > { %2718 = vrot.lane.b32.xlu1 %v7141_v47, %s4708_s20 }
 0x801   : > { %v4305_v57 = vpop.permute.xlu1 %4304 }
 0x802   : > { %v4307_v19 = vunpack.i.h.bf16 %v4305_v57  ;;  %v4306_v17 = vunpack.i.l.bf16 %v4305_v57  ;;  %v4317_v57 = vunpack.i.h.bf16 %v4315_v39  ;;  %v7250_v39 = vld [vmem:[#allocation56_spill] sm:$0xff] }
 0x804   : > { %2734 = vrot.lane.b32.xlu0 %v7240_v7, %s4708_s20  ;;  %2306 = vmatpush.msra.mxu3 %v4307_v19  ;;  %v7244_v19 = vld [vmem:[#allocation49_spill] sm:$0xff] }
 0x805   : > { %2322 = vmatpush.msra.mxu0 %v4306_v17  ;;  %v7245_v17 = vld [vmem:[#allocation36_spill] sm:$0xff] }
 0x806   : > { %3821 = vmatpush.xpose.msk.msrb.mxu3 %vm723_vm1, %v7241_v13  ;;  %v7246_v13 = vld [vmem:[#allocation17_spill] sm:$0xff] }
 0x807   : > { %2323 = vmatpush.msra.mxu0 %v4311_v25  ;;  %2688 = vrot.lane.b32.xlu1 %v7242_v16, %s4708_s20  ;;  %v7249_v25 = vld [vmem:[#allocation47_spill] sm:$0xff] }
 0x809   : > { %2324 = vmatpush.msra.mxu0 %v4312_v42  ;;  %v2372_v22 = vpop.permute.xlu1 %2371 }
 0x80a   : > { %3822 = vmatpush.xpose.msk.msrb.mxu3 %vm723_vm1, %v7243_v58  ;;  %v7248_v58 = vld [vmem:[#allocation59_spill] sm:$0xff] }
 0x80b   : > { %2325 = vmatpush.msra.mxu0 %v4316_v38  ;;  %v7251_v38 = vld [vmem:[#allocation14_spill] sm:$0xff] }
 0x80c   : > { %2732 = vrot.lane.b32.xlu0 %v7244_v19, %s4708_s20 }
 0x80d   : > { %2326 = vmatpush.msra.mxu0 %v4317_v57 }
 0x80e   : > { %3823 = vmatpush.xpose.msk.msrb.mxu3 %vm723_vm1, %v7245_v17  ;;  %v7260_v17 = vld [vmem:[#allocation8_spill] sm:$0xff] }
 0x80f   : > { %3838 = vmatpush.xpose.msk.msrb.mxu0 %vm723_vm1, %v7246_v13  ;;  %2716 = vrot.lane.b32.xlu1 %v7247_v4, %s4708_s20 }
 0x811   : > { %v2370_v42 = vpop.permute.xlu1 %2369 }
 0x812   : > { %3824 = vmatpush.xpose.msk.msrb.mxu3 %vm723_vm1, %v6100_v45  ;;  %v7252_v45 = vld [vmem:[#allocation46_spill] sm:$0xff] }
 0x813   : > { %3839 = vmatpush.xpose.msk.msrb.mxu0 %vm723_vm1, %v7248_v58 }
 0x814   : > { %2730 = vrot.lane.b32.xlu0 %v7249_v25, %s4708_s20 }
 0x816   : > { %3825 = vmatpush.xpose.msk.msrb.mxu3 %vm723_vm1, %v6114_v28 }
 0x817   : > { %3840 = vmatpush.xpose.msk.msrb.mxu0 %vm723_vm1, %v7250_v39  ;;  %2686 = vrot.lane.b32.xlu1 %v7251_v38, %s4708_s20 }
 0x819   : > { %v6331_v57 = vpop.permute.xlu1 %2331 }
 0x81a   : > { %3826 = vmatpush.xpose.msk.msrb.mxu3 %vm723_vm1, %v6128_v50 }
 0x81b   : > { %3841 = vmatpush.xpose.msk.msrb.mxu0 %vm723_vm1, %v6098_v9  ;;  %v7253_v9 = vld [vmem:[#allocation45_spill] sm:$0xff] }
 0x81c   : > { %2728 = vrot.lane.b32.xlu0 %v7252_v45, %s4708_s20 }
 0x81e   : > { %3827 = vmatpush.xpose.msk.msrb.mxu3 %vm723_vm1, %v6144_v0  ;;  %v7255_v0 = vld [vmem:[#allocation44_spill] sm:$0xff] }
 0x81f   : > { %3842 = vmatpush.xpose.msk.msrb.mxu0 %vm723_vm1, %v6118_v44  ;;  %2714 = vrot.lane.b32.xlu1 %v7132_v24, %s4708_s20  ;;  %v7254_v44 = vld [vmem:[#allocation76_spill] sm:$0xff] }
 0x821   : > { %v6345_v28 = vpop.permute.xlu1 %2736 }
 0x822   : > { %3828 = vmatpush.xpose.msk.msrb.mxu3 %vm723_vm1, %v6156_v32  ;;  %v7256_v32 = vld [vmem:[#allocation48_spill] sm:$0xff] }
 0x823   : > { %3843 = vmatpush.xpose.msk.msrb.mxu0 %vm723_vm1, %v6136_v34  ;;  %v2338_v34 = vpop.permute.xlu0 %2337 }
 0x824   : > { %2726 = vrot.lane.b32.xlu0 %v7253_v9, %s4708_s20 }
 0x826   : > { %3829 = vmatpush.xpose.msk.msrb.mxu3 %vm723_vm1, %v6233_v40  ;;  %v7257_v40 = vld [vmem:[#allocation39_spill] sm:$0xff] }
 0x827   : > { %3844 = vmatpush.xpose.msk.msrb.mxu0 %vm723_vm1, %v6170_v6  ;;  %4374 = vrot.lane.b32.xlu1 %v7254_v44, %s4707_s19 }
 0x829   : > { %v6359_v50 = vpop.permute.xlu1 %2704 }
 0x82a   : > { %3830 = vmatpush.xpose.msk.msrb.mxu3 %vm723_vm1, %v6257_v55 }
 0x82b   : > { %3845 = vmatpush.xpose.msk.msrb.mxu0 %vm723_vm1, %v6251_v30  ;;  %v2336_v30 = vpop.permute.xlu0 %2335 }
 0x82c   : > { %2724 = vrot.lane.b32.xlu0 %v7255_v0, %s4708_s20 }
 0x82e   : > { %3831 = vmatpush.xpose.msk.msrb.mxu3 %vm723_vm1, %v6265_v23 }
 0x82f   : > { %3846 = vmatpush.xpose.msk.msrb.mxu0 %vm723_vm1, %v6261_v43  ;;  %4379 = vrot.lane.b32.xlu1 %v7256_v32, %s4707_s19  ;;  %v7258_v43 = vld [vmem:[#allocation34_spill] sm:$0xff] }
 0x831   : > { %v6373_v6 = vpop.permute.xlu1 %2702 }
 0x832   : > { %3832 = vmatpush.xpose.msk.msrb.mxu3 %vm723_vm1, %v6275_v52  ;;  %v2368_v52 = vpop.permute.xlu2 %2367 }
 0x833   : > { %3847 = vmatpush.xpose.msk.msrb.mxu0 %vm723_vm1, %v6269_v18  ;;  %v2334_v23 = vpop.permute.xlu0 %2333 }
 0x834   : > { %4324 = vrot.lane.b32.xlu0 %v7257_v40, %s4707_s19 }
 0x836   : > { %3833 = vmatpush.xpose.msk.msrb.mxu3 %vm723_vm1, %v6291_v3 }
 0x837   : > { %3848 = vmatpush.xpose.msk.msrb.mxu0 %vm723_vm1, %v6279_v56  ;;  %2710 = vrot.lane.b32.xlu1 %v5042_v12, %s4708_s20 }
 0x839   : > { %v6387_v55 = vpop.permute.xlu1 %2700 }
 0x83a   : > { %3834 = vmatpush.xpose.msk.msrb.mxu3 %vm723_vm1, %v2338_v34  ;;  %v7262_v34 = vld [vmem:[#allocation11_spill] sm:$0xff] }
 0x83b   : > { %3849 = vmatpush.xpose.msk.msrb.mxu0 %vm723_vm1, %v6295_v41  ;;  %v7259_v41 = vld [vmem:[#allocation75_spill] sm:$0xff] }
 0x83c   : > { %4329 = vrot.lane.b32.xlu0 %v7258_v43, %s4707_s19 }
 0x83e   : > { %3835 = vmatpush.xpose.msk.msrb.mxu3 %vm723_vm1, %v2336_v30 }
 0x83f   : > { %3850 = vmatpush.xpose.msk.msrb.mxu0 %vm723_vm1, %v2372_v22  ;;  %2708 = vrot.lane.b32.xlu1 %v5033_v10, %s4708_s20 }
 0x841   : > { %v6398_v18 = vpop.permute.xlu1 %2698 }
 0x842   : > { %3836 = vmatpush.xpose.msk.msrb.mxu3 %vm723_vm1, %v2334_v23 }
 0x843   : > { %3851 = vmatpush.xpose.msk.msrb.mxu0 %vm723_vm1, %v2370_v42  ;;  %v7261_v42 = vld [vmem:[#allocation38_spill] sm:$0xff] }
 0x844   : > { %2720 = vrot.lane.b32.xlu0 %v7220_v62, %s4708_s20 }
 0x847   : > { %3852 = vmatpush.xpose.msk.msrb.mxu0 %vm723_vm1, %v2368_v52  ;;  %2706 = vrot.lane.b32.xlu1 %v7239_v48, %s4708_s20 }
 0x849   : > { %v4320_v22 = vpop.permute.xlu1 %4319 }
 0x84a   : > { %v4321_v56 = vunpack.i.l.bf16 %v4320_v22  ;;  %v4322_v3 = vunpack.i.h.bf16 %v4320_v22  ;;  %v7263_v22 = vld [vmem:[#allocation10_spill] sm:$0xff] }
 0x84c   : > { %4369 = vrot.lane.b32.xlu0 %v7259_v41, %s4707_s19  ;;  %2652 = vmatpush.msrb.mxu2 %v4321_v56 }
 0x84e   : > { %2653 = vmatpush.msrb.mxu2 %v4322_v3 }
 0x84f   : > { %2674 = vrot.lane.b32.xlu1 %v7260_v17, %s4708_s20 }
 0x851   : > { %v6411_v13 = vpop.permute.xlu1 %2694 }
 0x854   : > { %4384 = vrot.lane.b32.xlu0 %v7261_v42, %s4707_s19 }
 0x857   : > { %3043 = vrot.lane.b32.xlu1 %v7231_v15, %s4709_s21 }
 0x859   : > { %v6417_v58 = vpop.permute.xlu1 %2722 }
 0x85b   : > { %v2175_v39 = vpop.xlane.xlu0 %2174 }
 0x85c   : > { %4587 = vrcp.f32 %v2175_v39  ;;  %2680 = vrot.lane.b32.xlu0 %v7262_v34, %s4708_s20  ;;  %v2187_v3 = vand.u32 2147483648, %v2175_v39  ;;  %v2185_v44 = vand.u32 2147483647, %v2175_v39  ;;  %vm2181_vm5 = vweird.f32 %v2175_v39 }
 0x85e   : > { %v2188_v40 = vor.u32 1.1754944e-38, %v2187_v3  ;;  %vm2186_vm7 = vcmp.eq.f32.partialorder %v2185_v44, 8.507059e+37 }
 0x85f   : > { %3041 = vrot.lane.b32.xlu1 %v7232_v2, %s4709_s21 }
 0x861   : > { %v6423_v30 = vpop.permute.xlu1 %4334 }
 0x862   : > { %v4588_v23 = vpop.eup %4587 }
 0x863   : > { %v2177_v52 = vmul.f32 %v4588_v23, %v2175_v39  ;;  %vm2182_vm4 = vweird.f32 %v4588_v23  ;;  %v6440_v39 = vpop.permute.xlu2 %2696 }
 0x864   : > { %2678 = vrot.lane.b32.xlu0 %v7263_v22, %s4708_s20  ;;  %vm2183_vm6 = vmor %vm2181_vm5, %vm2182_vm4 }
 0x865   : > { %v2178_v56 = vsub.f32 1.0, %v2177_v52 }
 0x867   : > { %v2179_v15 = vmul.f32 %v4588_v23, %v2178_v56  ;;  %3039 = vrot.lane.b32.xlu1 %v7233_v29, %s4709_s21 }
 0x869   : > { %v2180_v32 = vadd.f32 %v4588_v23, %v2179_v15  ;;  %v6429_v2 = vpop.permute.xlu1 %2690 }
 0x86b   : > { %v2184_v48 = vsel %vm2183_vm6, %v4588_v23, %v2180_v32  ;;  %v7269_v23 = vld [vmem:[#allocation65_spill] sm:$0xff]  ;;  %vm3383_vm6 = vcmask 64512  }
 0x86c   : > { %v2189_v17 = vsel %vm2186_vm7, %v2188_v40, %v2184_v48  ;;  %v6452_v48 = vpop.permute.xlu2 %2692  ;;  %vm3385_vm7 = vcmask 97280  }
 0x86d   : > { %v2190_v52 = vmul.f32 %v6283_v61, %v2189_v17  ;;  %v2191_v10 = vmul.f32 %v6285_v54, %v2189_v17  ;;  %v7265_v61 = vld [vmem:[#allocation60_spill] sm:$0xff] }
 0x86e   : > { %v2366_v56 = vpop.permute.xlu0 %2365  ;;  %v7267_v17 = vld [vmem:[#allocation64_spill] sm:$0xff] }
 0x86f   : > { %3819 = vst [vmem:[%s5444_s23 + $0x40] sm:$0xff] %v2190_v52  ;;  %2307 = vmatmul.f32.vlgmr.msra.gmra.mxu3 %v2190_v52  ;;  %2327 = vmatmul.f32.vlgmr.msra.gmra.mxu0 %v2191_v10 }
 0x870   : > { %3820 = vst [vmem:[%s5444_s23 + $0x48] sm:$0xff] %v2191_v10  ;;  %3853 = vmatpush.xpose.msk.msrb.mxu0 %vm723_vm1, %v2366_v56  ;;  %3037 = vrot.lane.b32.xlu1 %v7196_v53, %s4709_s21  ;;  %v7271_v56 = vld [vmem:[#allocation61_spill] sm:$0xff] }
 0x871   : > { %v6438_v29 = vpop.permute.xlu1 %2718 }
 0x874   : > { %v4340_v40 = vpop.permute.xlu2 %4339 }
 0x876   : > { %v6442_v44 = vpop.permute.xlu0 %2734 }
 0x877   : > { %3837 = vmatmul.msk.f32.vlgmr.msrb.gmra.mxu3 %vm723_vm1, %v6331_v57  ;;  %3854 = vmatmul.msk.f32.vlgmr.msrb.gmra.mxu0 %vm723_vm1, %v6331_v57 }
 0x878   : > { %3035 = vrot.lane.b32.xlu1 %v7235_v31, %s4709_s21 }
 0x879   : > { %v6450_v10 = vpop.permute.xlu1 %2688 }
 0x87a   : > { %7264 = vst [vmem:[#allocation32_spill] sm:$0xff] %v6450_v10 }
 0x87c   : > { %v4345_v15 = vpop.permute.xlu2 %4344 }
 0x87e   : > { %v6454_v53 = vpop.permute.xlu0 %2732 }
 0x880   : > { %4399 = vrot.lane.b32.xlu1 %v7265_v61, %s4708_s20 }
 0x881   : > { %v6458_v54 = vpop.permute.xlu1 %2716 }
 0x882   : > { %7266 = vst [vmem:[#allocation53_spill] sm:$0xff] %v6458_v54  ;;  %v4336_v54 = vunpack.i.l.bf16 %v6423_v30 }
 0x884   : > { %v4350_v24 = vpop.permute.xlu2 %4349 }
 0x885   : > { %v4352_v25 = vunpack.i.h.bf16 %v4350_v24 }
 0x886   : > { %v6460_v32 = vpop.permute.xlu0 %2730 }
 0x888   : > { %4404 = vrot.lane.b32.xlu1 %v7267_v17, %s4708_s20 }
 0x889   : > { %v6464_v57 = vpop.permute.xlu1 %2686 }
 0x88a   : > { %7268 = vst [vmem:[#allocation31_spill] sm:$0xff] %v6464_v57 }
 0x88c   : > { %v4355_v4 = vpop.permute.xlu2 %4354 }
 0x88e   : > { %v6466_v31 = vpop.permute.xlu0 %2728 }
 0x890   : > { %4409 = vrot.lane.b32.xlu1 %v7269_v23, %s4708_s20 }
 0x891   : > { %v6470_v3 = vpop.permute.xlu1 %2714 }
 0x892   : > { %7270 = vst [vmem:[#allocation51_spill] sm:$0xff] %v6470_v3 }
 0x894   : > { %v4360_v10 = vpop.permute.xlu2 %4359 }
 0x896   : > { %v6472_v52 = vpop.permute.xlu0 %2726 }
 0x898   : > { %4414 = vrot.lane.b32.xlu1 %v7271_v56, %s4708_s20 }
 0x899   : > { %v6476_v61 = vpop.permute.xlu1 %4374 }
 0x89e   : > { %v6478_v34 = vpop.permute.xlu0 %2724 }
 0x8a0   : > { %3063 = vrot.lane.b32.xlu1 %v7236_v1, %s4709_s21  ;;  %v4337_v1 = vunpack.i.h.bf16 %v6423_v30  ;;  %v4357_v30 = vunpack.i.h.bf16 %v4355_v4 }
 0x8a1   : > { %v6482_v17 = vpop.permute.xlu1 %4379 }
 0x8a6   : > { %v4325_v23 = vpop.permute.xlu0 %4324 }
 0x8a7   : > { %v4327_v0 = vunpack.i.h.bf16 %v4325_v23  ;;  %v4326_v9 = vunpack.i.l.bf16 %v4325_v23 }
 0x8a8   : > { %3027 = vrot.lane.b32.xlu1 %v7251_v38, %s4709_s21  ;;  %v4342_v38 = vunpack.i.h.bf16 %v4340_v40 }
 0x8a9   : > { %2632 = vmatpush.msra.mxu1 %v4327_v0  ;;  %2654 = vmatpush.msrb.mxu2 %v4326_v9  ;;  %v6486_v56 = vpop.permute.xlu1 %2710  ;;  %v4341_v0 = vunpack.i.l.bf16 %v4340_v40  ;;  %v4347_v9 = vunpack.i.h.bf16 %v4345_v15 }
 0x8aa   : > { %7272 = vst [vmem:[#allocation29_spill] sm:$0xff] %v6486_v56  ;;  %v4346_v56 = vunpack.i.l.bf16 %v4345_v15  ;;  %v4361_v15 = vunpack.i.l.bf16 %v4360_v10 }
 0x8ae   : > { %v4330_v45 = vpop.permute.xlu0 %4329 }
 0x8af   : > { %v4332_v57 = vunpack.i.h.bf16 %v4330_v45  ;;  %v4331_v3 = vunpack.i.l.bf16 %v4330_v45 }
 0x8b0   : > { %3061 = vrot.lane.b32.xlu1 %v7220_v62, %s4709_s21  ;;  %v4351_v62 = vunpack.i.l.bf16 %v4350_v24 }
 0x8b1   : > { %2633 = vmatpush.msra.mxu1 %v4332_v57  ;;  %2655 = vmatpush.msrb.mxu2 %v4331_v3  ;;  %v6492_v23 = vpop.permute.xlu1 %2708  ;;  %v4356_v57 = vunpack.i.l.bf16 %v4355_v4  ;;  %v4362_v3 = vunpack.i.h.bf16 %v4360_v10  ;;  %v4377_v4 = vunpack.i.h.bf16 %v6476_v61 }
 0x8b3   : > { %2634 = vmatpush.msra.mxu1 %v4337_v1  ;;  %2656 = vmatpush.msrb.mxu2 %v4336_v54  ;;  %v4365_v54 = vpop.permute.xlu2 %4364 }
 0x8b4   : > { %v4367_v1 = vunpack.i.h.bf16 %v4365_v54 }
 0x8b5   : > { %2635 = vmatpush.msra.mxu1 %v4342_v38  ;;  %2657 = vmatpush.msrb.mxu2 %v4341_v0  ;;  %v4366_v38 = vunpack.i.l.bf16 %v4365_v54 }
 0x8b6   : > { %v6494_v45 = vpop.permute.xlu0 %2720 }
 0x8b7   : > { %2636 = vmatpush.msra.mxu1 %v4347_v9  ;;  %2658 = vmatpush.msrb.mxu2 %v4346_v56  ;;  %v4382_v9 = vunpack.i.h.bf16 %v6482_v17 }
 0x8b8   : > { %3025 = vrot.lane.b32.xlu1 %v7221_v26, %s4709_s21 }
 0x8b9   : > { %2637 = vmatpush.msra.mxu1 %v4352_v25  ;;  %2659 = vmatpush.msrb.mxu2 %v4351_v62  ;;  %v6498_v40 = vpop.permute.xlu1 %2706  ;;  %v4376_v25 = vunpack.i.l.bf16 %v6476_v61  ;;  %v4381_v62 = vunpack.i.l.bf16 %v6482_v17 }
 0x8bb   : > { %2638 = vmatpush.msra.mxu1 %v4357_v30  ;;  %2660 = vmatpush.msrb.mxu2 %v4356_v57 }
 0x8bd   : > { %2639 = vmatpush.msra.mxu1 %v4362_v3  ;;  %2661 = vmatpush.msrb.mxu2 %v4361_v15 }
 0x8be   : > { %v4370_v24 = vpop.permute.xlu0 %4369 }
 0x8bf   : > { %v4372_v56 = vunpack.i.h.bf16 %v4370_v24  ;;  %v4371_v0 = vunpack.i.l.bf16 %v4370_v24  ;;  %2640 = vmatpush.msra.mxu1 %v4367_v1  ;;  %2662 = vmatpush.msrb.mxu2 %v4366_v38 }
 0x8c0   : > { %3059 = vrot.lane.b32.xlu1 %v7141_v47, %s4709_s21 }
 0x8c1   : > { %2641 = vmatpush.msra.mxu1 %v4372_v56  ;;  %2663 = vmatpush.msrb.mxu2 %v4371_v0  ;;  %v6504_v10 = vpop.permute.xlu1 %2674 }
 0x8c3   : > { %2642 = vmatpush.msra.mxu1 %v4377_v4  ;;  %2664 = vmatpush.msrb.mxu2 %v4376_v25 }
 0x8c5   : > { %2643 = vmatpush.msra.mxu1 %v4382_v9  ;;  %2665 = vmatpush.msrb.mxu2 %v4381_v62 }
 0x8c6   : > { %v4385_v30 = vpop.permute.xlu0 %4384 }
 0x8c7   : > { %v4387_v57 = vunpack.i.h.bf16 %v4385_v30  ;;  %v4386_v54 = vunpack.i.l.bf16 %v4385_v30 }
 0x8c8   : > { %3023 = vrot.lane.b32.xlu1 %v4920_v37, %s4709_s21 }
 0x8c9   : > { %2644 = vmatpush.msra.mxu1 %v4387_v57  ;;  %2666 = vmatpush.msrb.mxu2 %v4386_v54  ;;  %v6510_v47 = vpop.permute.xlu1 %3043 }
 0x8d0   : > { %4454 = vrot.lane.b32.xlu1 %v7225_v8, %s4708_s20 }
 0x8d1   : > { %v6514_v61 = vpop.permute.xlu1 %3041 }
 0x8d8   : > { %4459 = vrot.lane.b32.xlu1 %v7226_v60, %s4708_s20 }
 0x8d9   : > { %v6518_v17 = vpop.permute.xlu1 %3039 }
 0x8e0   : > { %4464 = vrot.lane.b32.xlu1 %v7227_v5, %s4708_s20 }
 0x8e2   : > { %v6522_v3 = vpop.permute.xlu1 %3037 }
 0x8e8   : > { %3053 = vrot.lane.b32.xlu1 %v7143_v21, %s4709_s21 }
 0x8ea   : > { %v6526_v15 = vpop.permute.xlu1 %3035 }
 0x8ec   : > { %v2328_v1 = vpop.f32.mrf.mxu0 }
 0x8f0   : > { %3051 = vrot.lane.b32.xlu1 %v5042_v12, %s4709_s21 }
 0x8f2   : > { %v4400_v8 = vpop.permute.xlu1 %4399  ;;  %v2308_v38 = vpop.f32.mrf.mxu3 }
 0x8f3   : > { %v4401_v24 = vunpack.i.l.bf16 %v4400_v8  ;;  %v6530_v60 = vadd.f32 %v2328_v1, %v2308_v38  ;;  %v4402_v56 = vunpack.i.h.bf16 %v4400_v8 }
 0x8f4   : > { %v2500_v5 = vpop.f32.mrf.mxu0 }
 0x8f5   : > { %2973 = vmatpush.msra.mxu3 %v4401_v24  ;;  %v2504_v25 = vmul.f32 0.5, %v2500_v5 }
 0x8f7   : > { %2974 = vmatpush.msra.mxu3 %v4402_v56 }
 0x8f8   : > { %3013 = vrot.lane.b32.xlu1 %v7228_v63, %s4709_s21 }
 0x8fa   : > { %v4405_v0 = vpop.permute.xlu1 %4404  ;;  %v2480_v4 = vpop.f32.mrf.mxu3 }
 0x8fb   : > { %v4406_v9 = vunpack.i.l.bf16 %v4405_v0  ;;  %v2503_v62 = vmul.f32 0.5, %v2480_v4  ;;  %v4407_v30 = vunpack.i.h.bf16 %v4405_v0 }
 0x8fd   : > { %v2505_v57 = vmax.f32 %v2503_v62, %v2504_v25  ;;  %2975 = vmatpush.msra.mxu3 %v4406_v9 }
 0x8ff   : > { %2976 = vmatpush.msra.mxu3 %v4407_v30  ;;  %2506 = vmax.xlane.f32.xlu2 %v2505_v57  ;;  %v7289_v30 = vld [vmem:[#allocation71_spill] sm:$0xff] }
 0x900   : > { %4479 = vrot.lane.b32.xlu1 %v7234_v36, %s4709_s21 }
 0x902   : > { %v4410_v12 = vpop.permute.xlu1 %4409 }
 0x903   : > { %v4412_v54 = vunpack.i.h.bf16 %v4410_v12  ;;  %v4411_v1 = vunpack.i.l.bf16 %v4410_v12 }
 0x905   : > { %2977 = vmatpush.msra.mxu3 %v4412_v54  ;;  %2993 = vmatpush.msra.mxu0 %v4411_v1  ;;  %v7290_v54 = vld [vmem:[#allocation23_spill] sm:$0xff] }
 0x908   : > { %4489 = vrot.lane.b32.xlu1 %v7258_v43, %s4709_s21 }
 0x90a   : > { %v4415_v8 = vpop.permute.xlu1 %4414 }
 0x90b   : > { %v4417_v38 = vunpack.i.h.bf16 %v4415_v8  ;;  %v4416_v24 = vunpack.i.l.bf16 %v4415_v8 }
 0x90d   : > { %2978 = vmatpush.msra.mxu3 %v4417_v38  ;;  %2994 = vmatpush.msra.mxu0 %v4416_v24 }
 0x910   : > { %4499 = vrot.lane.b32.xlu1 %v5770_v20, %s4709_s21  ;;  %v7273_v20 = vld [vmem:[#allocation77_spill] sm:$0xff] }
 0x917   : > { %2684 = vrot.lane.b32.xlu2 %v7221_v26, %s4708_s20 }
 0x918   : > { %4504 = vrot.lane.b32.xlu1 %v5780_v59, %s4709_s21  ;;  %v7274_v59 = vld [vmem:[#allocation78_spill] sm:$0xff] }
 0x91f   : > { %2712 = vrot.lane.b32.xlu2 %v7143_v21, %s4708_s20  ;;  %v7275_v21 = vld [vmem:[#allocation9_spill] sm:$0xff] }
 0x920   : > { %4509 = vrot.lane.b32.xlu1 %v5790_v33, %s4709_s21 }
 0x927   : > { %2682 = vrot.lane.b32.xlu2 %v4920_v37, %s4708_s20  ;;  %v1647_v37 = vadd.f32 %v6239_v46, %v6237_v14 }
 0x928   : > { %4514 = vrot.lane.b32.xlu1 %v5564_v11, %s4709_s21  ;;  %v7276_v11 = vld [vmem:[#allocation66_spill] sm:$0xff] }
 0x92f   : > { %4389 = vrot.lane.b32.xlu2 %v7273_v20, %s4707_s19 }
 0x930   : > { %4524 = vrot.lane.b32.xlu1 %v5578_v49, %s4709_s21 }
 0x937   : > { %4394 = vrot.lane.b32.xlu2 %v7274_v59, %s4707_s19 }
 0x938   : > { %4529 = vrot.lane.b32.xlu1 %v7259_v41, %s4709_s21 }
 0x93f   : > { %2676 = vrot.lane.b32.xlu2 %v7275_v21, %s4708_s20 }
 0x940   : > { %4544 = vrot.lane.b32.xlu1 %v7261_v42, %s4709_s21 }
 0x947   : > { %3033 = vrot.lane.b32.xlu2 %v4957_v51, %s4709_s21 }
 0x948   : > { %4554 = vrot.lane.b32.xlu1 %v7274_v59, %s4709_s21 }
 0x94f   : > { %3029 = vrot.lane.b32.xlu2 %v7242_v16, %s4709_s21 }
 0x950   : > { %3359 = vrot.lane.b32.xlu1 %v1647_v37, %s4710_s22  ;;  %s3433_s22 = scalar_lea.sflag [#allocation5], %s5434_s12 }
 0x957   : > { %4449 = vrot.lane.b32.xlu2 %v7276_v11, %s4708_s20 }
 0x95f   : > { %3019 = vrot.lane.b32.xlu2 %v7263_v22, %s4709_s21  ;;  %v6584_v22 = vpop.permute.xlu1 %3063 }
 0x967   : > { %3017 = vrot.lane.b32.xlu2 %v7275_v21, %s4709_s21  ;;  %v6588_v4 = vpop.permute.xlu1 %3027 }
 0x972   : > { %v2507_v51 = vpop.xlane.xlu2 %2506 }
 0x973   : > { %v2508_v49 = vsub.f32 %v2503_v62, %v2507_v51  ;;  %v2509_v33 = vsub.f32 %v2504_v25, %v2507_v51 }
 0x975   : > { %v2510_v26 = vmul.f32 1.442695, %v2508_v49  ;;  %v2512_v36 = vmul.f32 1.442695, %v2509_v33  ;;  %v7291_v49 = vld [vmem:[#allocation21_spill] sm:$0xff] }
 0x977   : > { %4589 = vpow2.f32 %v2510_v26 }
 0x978   : > { %4591 = vpow2.f32 %v2512_v36 }
 0x97a   : > { %v2685_v14 = vpop.permute.xlu2 %2684 }
 0x97d   : > { %v6578_v46 = vpop.eup %4589 }
 0x97e   : > { %v6580_v16 = vpop.eup %4591 }
 0x97f   : > { %v2514_v43 = vadd.f32 %v6580_v16, %v6578_v46 }
 0x981   : > { %2515 = vadd.xlane.f32.xlu0 %v2514_v43 }
 0x982   : > { %v2713_v41 = vpop.permute.xlu2 %2712 }
 0x98a   : > { %v2683_v42 = vpop.permute.xlu2 %2682 }
 0x992   : > { %v4390_v56 = vpop.permute.xlu2 %4389 }
 0x993   : > { %v4392_v5 = vunpack.i.h.bf16 %v4390_v56  ;;  %v4391_v0 = vunpack.i.l.bf16 %v4390_v56  ;;  %v7294_v56 = vld [vmem:[#allocation11_spill] sm:$0xff] }
 0x995   : > { %2672 = vrot.lane.b32.xlu0 %v7228_v63, %s4708_s20  ;;  %2645 = vmatpush.msra.mxu1 %v4392_v5  ;;  %v6598_v63 = vpop.permute.xlu1 %3061 }
 0x996   : > { %2667 = vmatpush.msrb.mxu2 %v4391_v0  ;;  %v7295_v0 = vld [vmem:[#allocation35_spill] sm:$0xff] }
 0x998   : > { %3874 = vmatpush.xpose.msk.msra.mxu2 %vm723_vm1, %v6345_v28 }
 0x99a   : > { %v4395_v25 = vpop.permute.xlu2 %4394 }
 0x99b   : > { %v4396_v9 = vunpack.i.l.bf16 %v4395_v25  ;;  %v4397_v62 = vunpack.i.h.bf16 %v4395_v25 }
 0x99c   : > { %3875 = vmatpush.xpose.msk.msra.mxu2 %vm723_vm1, %v6442_v44  ;;  %v7285_v44 = vld [vmem:[#allocation16_spill] sm:$0xff] }
 0x99d   : > { %3045 = vrot.lane.b32.xlu0 %v7230_v35, %s4709_s21  ;;  %2646 = vmatpush.msra.mxu1 %v4396_v9  ;;  %v6612_v35 = vpop.permute.xlu1 %3025  ;;  %v7296_v9 = vld [vmem:[#allocation73_spill] sm:$0xff] }
 0x99f   : > { %2647 = vmatpush.msra.mxu1 %v4397_v62 }
 0x9a0   : > { %3876 = vmatpush.xpose.msk.msra.mxu2 %vm723_vm1, %v6454_v53 }
 0x9a1   : > { %3857 = vmatpush.xpose.msk.msrb.mxu1 %vm723_vm1, %v6359_v50  ;;  %v7278_v50 = vld [vmem:[#allocation53_spill] sm:$0xff] }
 0x9a4   : > { %3877 = vmatpush.xpose.msk.msra.mxu2 %vm723_vm1, %v6460_v32  ;;  %v7286_v32 = vld [vmem:[#allocation44_spill] sm:$0xff] }
 0x9a5   : > { %3858 = vmatpush.xpose.msk.msrb.mxu1 %vm723_vm1, %v6373_v6  ;;  %3077 = vrot.lane.b32.xlu0 %v7229_v27, %s4709_s21  ;;  %v6626_v27 = vpop.permute.xlu1 %3059  ;;  %v7280_v6 = vld [vmem:[#allocation51_spill] sm:$0xff] }
 0x9a8   : > { %3878 = vmatpush.xpose.msk.msra.mxu2 %vm723_vm1, %v6466_v31  ;;  %v7287_v31 = vld [vmem:[#allocation69_spill] sm:$0xff] }
 0x9a9   : > { %3859 = vmatpush.xpose.msk.msrb.mxu1 %vm723_vm1, %v6387_v55  ;;  %v7281_v55 = vld [vmem:[#allocation31_spill] sm:$0xff] }
 0x9ac   : > { %3879 = vmatpush.xpose.msk.msra.mxu2 %vm723_vm1, %v6472_v52 }
 0x9ad   : > { %3860 = vmatpush.xpose.msk.msrb.mxu1 %vm723_vm1, %v6398_v18  ;;  %3075 = vrot.lane.b32.xlu0 %v7240_v7, %s4709_s21  ;;  %v7277_v7 = vld [vmem:[#allocation47_spill] sm:$0xff]  ;;  %v6642_v28 = vpop.permute.xlu1 %3023  ;;  %v7282_v18 = vld [vmem:[#allocation46_spill] sm:$0xff] }
 0x9b0   : > { %3880 = vmatpush.xpose.msk.msra.mxu2 %vm723_vm1, %v6478_v34  ;;  %v7283_v34 = vld [vmem:[#allocation29_spill] sm:$0xff] }
 0x9b1   : > { %3861 = vmatpush.xpose.msk.msrb.mxu1 %vm723_vm1, %v6440_v39 }
 0x9b4   : > { %3881 = vmatpush.xpose.msk.msra.mxu2 %vm723_vm1, %v6417_v58  ;;  %v2681_v58 = vpop.permute.xlu0 %2680 }
 0x9b5   : > { %3862 = vmatpush.xpose.msk.msrb.mxu1 %vm723_vm1, %v6411_v13  ;;  %3073 = vrot.lane.b32.xlu0 %v7244_v19, %s4709_s21  ;;  %v7279_v19 = vld [vmem:[#allocation32_spill] sm:$0xff]  ;;  %v6655_v13 = vpop.permute.xlu1 %4454 }
 0x9b8   : > { %3882 = vmatpush.xpose.msk.msra.mxu2 %vm723_vm1, %v6494_v45 }
 0x9b9   : > { %3863 = vmatpush.xpose.msk.msrb.mxu1 %vm723_vm1, %v6452_v48  ;;  %v2677_v48 = vpop.permute.xlu2 %2676 }
 0x9bc   : > { %3883 = vmatpush.xpose.msk.msra.mxu2 %vm723_vm1, %v6438_v29  ;;  %v2679_v39 = vpop.permute.xlu0 %2678 }
 0x9bd   : > { %3864 = vmatpush.xpose.msk.msrb.mxu1 %vm723_vm1, %v6429_v2  ;;  %3071 = vrot.lane.b32.xlu0 %v7277_v7, %s4709_s21  ;;  %v7284_v2 = vld [vmem:[#allocation45_spill] sm:$0xff]  ;;  %v6666_v29 = vpop.permute.xlu1 %4459  ;;  %v7297_v7 = vld [vmem:[#allocation68_spill] sm:$0xff] }
 0x9c0   : > { %3884 = vmatpush.xpose.msk.msra.mxu2 %vm723_vm1, %v7278_v50 }
 0x9c1   : > { %3865 = vmatpush.xpose.msk.msrb.mxu1 %vm723_vm1, %v7279_v19  ;;  %v7298_v19 = vld [vmem:[#allocation30_spill] sm:$0xff] }
 0x9c4   : > { %3885 = vmatpush.xpose.msk.msra.mxu2 %vm723_vm1, %v7280_v6 }
 0x9c5   : > { %3866 = vmatpush.xpose.msk.msrb.mxu1 %vm723_vm1, %v7281_v55  ;;  %3069 = vrot.lane.b32.xlu0 %v7282_v18, %s4709_s21  ;;  %v6674_v53 = vpop.permute.xlu1 %4464 }
 0x9c8   : > { %3886 = vmatpush.xpose.msk.msra.mxu2 %vm723_vm1, %v2713_v41  ;;  %v7292_v41 = vld [vmem:[#allocation72_spill] sm:$0xff] }
 0x9c9   : > { %3867 = vmatpush.xpose.msk.msrb.mxu1 %vm723_vm1, %v2685_v14 }
 0x9cc   : > { %3887 = vmatpush.xpose.msk.msra.mxu2 %vm723_vm1, %v7283_v34 }
 0x9cd   : > { %3868 = vmatpush.xpose.msk.msrb.mxu1 %vm723_vm1, %v2683_v42  ;;  %3067 = vrot.lane.b32.xlu0 %v7284_v2, %s4709_s21  ;;  %v6682_v52 = vpop.permute.xlu1 %3053 }
 0x9d0   : > { %3888 = vmatpush.xpose.msk.msra.mxu2 %vm723_vm1, %v6492_v23  ;;  %v7288_v23 = vld [vmem:[#allocation70_spill] sm:$0xff] }
 0x9d1   : > { %3869 = vmatpush.xpose.msk.msrb.mxu1 %vm723_vm1, %v2681_v58 }
 0x9d4   : > { %3889 = vmatpush.xpose.msk.msra.mxu2 %vm723_vm1, %v6498_v40 }
 0x9d5   : > { %3870 = vmatpush.xpose.msk.msrb.mxu1 %vm723_vm1, %v2679_v39  ;;  %3031 = vrot.lane.b32.xlu0 %v7285_v44, %s4709_s21  ;;  %v6686_v45 = vpop.permute.xlu1 %3051 }
 0x9d9   : > { %3871 = vmatpush.xpose.msk.msrb.mxu1 %vm723_vm1, %v2677_v48 }
 0x9dd   : > { %3872 = vmatpush.xpose.msk.msrb.mxu1 %vm723_vm1, %v6504_v10  ;;  %3065 = vrot.lane.b32.xlu0 %v7286_v32, %s4709_s21  ;;  %v6690_v57 = vpop.permute.xlu1 %3013 }
 0x9e5   : > { %4419 = vrot.lane.b32.xlu0 %v7287_v31, %s4708_s20  ;;  %v4480_v37 = vpop.permute.xlu1 %4479 }
 0x9e6   : > { %v4481_v36 = vunpack.i.l.bf16 %v4480_v37  ;;  %v4482_v43 = vunpack.i.h.bf16 %v4480_v37 }
 0x9ed   : > { %4424 = vrot.lane.b32.xlu0 %v7288_v23, %s4708_s20 }
 0x9f4   : > { %v2516_v40 = vpop.xlane.xlu0 %2515 }
 0x9f5   : > { %4593 = vrcp.f32 %v2516_v40  ;;  %4429 = vrot.lane.b32.xlu0 %v7289_v30, %s4708_s20  ;;  %v2528_v8 = vand.u32 2147483648, %v2516_v40  ;;  %v2526_v24 = vand.u32 2147483647, %v2516_v40  ;;  %vm2522_vm9 = vweird.f32 %v2516_v40 }
 0x9f7   : > { %v2529_v21 = vor.u32 1.1754944e-38, %v2528_v8  ;;  %vm2527_vm11 = vcmp.eq.f32.partialorder %v2526_v24, 8.507059e+37 }
 0x9fb   : > { %v4594_v10 = vpop.eup %4593 }
 0x9fc   : > { %v2518_v12 = vmul.f32 %v4594_v10, %v2516_v40  ;;  %vm2523_vm8 = vweird.f32 %v4594_v10  ;;  %v3034_v40 = vpop.permute.xlu2 %3033 }
 0x9fd   : > { %4434 = vrot.lane.b32.xlu0 %v7290_v54, %s4708_s20  ;;  %vm2524_vm10 = vmor %vm2522_vm9, %vm2523_vm8  ;;  %vm3387_vm8 = vcmask 130048   ;;  %vm3389_vm9 = vcmask 162816  }
 0x9fe   : > { %v2519_v1 = vsub.f32 1.0, %v2518_v12 }
 0xa00   : > { %v2520_v38 = vmul.f32 %v4594_v10, %v2519_v1 }
 0xa02   : > { %v2521_v59 = vadd.f32 %v4594_v10, %v2520_v38 }
 0xa04   : > { %v2525_v11 = vsel %vm2524_vm10, %v4594_v10, %v2521_v59  ;;  %v3030_v54 = vpop.permute.xlu2 %3029  ;;  %vm3391_vm10 = vcmask 195584  }
 0xa05   : > { %v2530_v51 = vsel %vm2527_vm11, %v2529_v21, %v2525_v11  ;;  %4439 = vrot.lane.b32.xlu0 %v7291_v49, %s4708_s20  ;;  %v4457_v49 = vunpack.i.h.bf16 %v6655_v13  ;;  %vm3393_vm11 = vcmask 228352  }
 0xa06   : > { %v2531_v33 = vmul.f32 %v6578_v46, %v2530_v51  ;;  %v2532_v26 = vmul.f32 %v6580_v16, %v2530_v51  ;;  %v7293_v46 = vld [vmem:[#allocation37_spill] sm:$0xff] }
 0xa07   : > { %v2673_v14 = vpop.permute.xlu0 %2672 }
 0xa08   : > { %3855 = vst [vmem:[%s5444_s23 + $0x50] sm:$0xff] %v2531_v33  ;;  %2648 = vmatmul.f32.vlgmr.msra.gmra.mxu1 %v2531_v33  ;;  %2668 = vmatmul.f32.vlgmr.msrb.gmra.mxu2 %v2532_v26  ;;  %v4456_v33 = vunpack.i.l.bf16 %v6655_v13 }
 0xa09   : > { %3856 = vst [vmem:[%s5444_s23 + $0x58] sm:$0xff] %v2532_v26  ;;  %3334 = vmatpush.msrb.mxu2 %v4481_v36  ;;  %v4462_v26 = vunpack.i.h.bf16 %v6666_v29  ;;  %v4461_v36 = vunpack.i.l.bf16 %v6666_v29 }
 0xa0b   : > { %3335 = vmatpush.msrb.mxu2 %v4482_v43 }
 0xa0c   : > { %v4450_v24 = vpop.permute.xlu2 %4449 }
 0xa0d   : > { %4444 = vrot.lane.b32.xlu0 %v7292_v41, %s4708_s20  ;;  %v4452_v11 = vunpack.i.h.bf16 %v4450_v24  ;;  %v4451_v51 = vunpack.i.l.bf16 %v4450_v24  ;;  %v4467_v41 = vunpack.i.h.bf16 %v6674_v53 }
 0xa0f   : > { %v6702_v42 = vpop.permute.xlu0 %3045 }
 0xa10   : > { %3873 = vmatmul.msk.f32.vlgmr.msrb.gmra.mxu1 %vm723_vm1, %v2673_v14  ;;  %3890 = vmatmul.msk.f32.vlgmr.msra.gmra.mxu2 %vm723_vm1, %v2673_v14 }
 0xa15   : > { %3057 = vrot.lane.b32.xlu0 %v7293_v46, %s4709_s21  ;;  %v4466_v46 = vunpack.i.l.bf16 %v6674_v53 }
 0xa17   : > { %v6708_v16 = vpop.permute.xlu0 %3077 }
 0xa1d   : > { %3021 = vrot.lane.b32.xlu0 %v7294_v56, %s4709_s21 }
 0xa1f   : > { %v6712_v5 = vpop.permute.xlu0 %3075 }
 0xa25   : > { %3055 = vrot.lane.b32.xlu0 %v7295_v0, %s4709_s21 }
 0xa27   : > { %v6716_v25 = vpop.permute.xlu0 %3073 }
 0xa2d   : > { %4469 = vrot.lane.b32.xlu0 %v7296_v9, %s4708_s20 }
 0xa2f   : > { %v6720_v62 = vpop.permute.xlu0 %3071 }
 0xa35   : > { %4474 = vrot.lane.b32.xlu0 %v7297_v7, %s4708_s20  ;;  %s3459_s20 = sshll.u32 %s5444_s23, 4  ;;  %s3460_s20 = int_to_ptr.vmem [resolvable:$true] %s3459_s20 }
 0xa37   : > { %v6724_v50 = vpop.permute.xlu0 %3069 }
 0xa3d   : > { %3049 = vrot.lane.b32.xlu0 %v7298_v19, %s4709_s21 }
 0xa3f   : > { %v6728_v6 = vpop.permute.xlu0 %3067 }
 0xa47   : > { %v6730_v55 = vpop.permute.xlu0 %3031 }
 0xa4f   : > { %v6732_v18 = vpop.permute.xlu0 %3065 }
 0xa57   : > { %v4420_v58 = vpop.permute.xlu0 %4419 }
 0xa58   : > { %v4422_v34 = vunpack.i.h.bf16 %v4420_v58  ;;  %v4421_v2 = vunpack.i.l.bf16 %v4420_v58 }
 0xa5a   : > { %2979 = vmatpush.msra.mxu3 %v4422_v34  ;;  %2995 = vmatpush.msra.mxu0 %v4421_v2 }
 0xa5f   : > { %v4425_v39 = vpop.permute.xlu0 %4424 }
 0xa60   : > { %v4427_v44 = vunpack.i.h.bf16 %v4425_v39  ;;  %v4426_v48 = vunpack.i.l.bf16 %v4425_v39 }
 0xa62   : > { %2980 = vmatpush.msra.mxu3 %v4427_v44  ;;  %2996 = vmatpush.msra.mxu0 %v4426_v48 }
 0xa67   : > { %v4430_v32 = vpop.permute.xlu0 %4429 }
 0xa68   : > { %v4432_v31 = vunpack.i.h.bf16 %v4430_v32  ;;  %v4431_v23 = vunpack.i.l.bf16 %v4430_v32 }
 0xa6a   : > { %2981 = vmatpush.msra.mxu3 %v4432_v31  ;;  %2997 = vmatpush.msra.mxu0 %v4431_v23 }
 0xa6f   : > { %v4435_v30 = vpop.permute.xlu0 %4434 }
 0xa70   : > { %v4437_v10 = vunpack.i.h.bf16 %v4435_v30  ;;  %v4436_v12 = vunpack.i.l.bf16 %v4435_v30 }
 0xa72   : > { %2982 = vmatpush.msra.mxu3 %v4437_v10  ;;  %2998 = vmatpush.msra.mxu0 %v4436_v12 }
 0xa77   : > { %v4440_v1 = vpop.permute.xlu0 %4439 }
 0xa78   : > { %v4442_v8 = vunpack.i.h.bf16 %v4440_v1  ;;  %v4441_v38 = vunpack.i.l.bf16 %v4440_v1 }
 0xa7a   : > { %2983 = vmatpush.msra.mxu3 %v4442_v8  ;;  %2999 = vmatpush.msra.mxu0 %v4441_v38 }
 0xa7f   : > { %v4445_v59 = vpop.permute.xlu0 %4444 }
 0xa80   : > { %v4447_v21 = vunpack.i.h.bf16 %v4445_v59  ;;  %v4446_v37 = vunpack.i.l.bf16 %v4445_v59 }
 0xa82   : > { %2984 = vmatpush.msra.mxu3 %v4447_v21  ;;  %3000 = vmatpush.msra.mxu0 %v4446_v37 }
 0xa84   : > { %2985 = vmatpush.msra.mxu3 %v4452_v11  ;;  %3001 = vmatpush.msra.mxu0 %v4451_v51 }
 0xa85   : > { %v2649_v14 = vpop.f32.mrf.mxu1 }
 0xa86   : > { %2986 = vmatpush.msra.mxu3 %v4457_v49  ;;  %3002 = vmatpush.msra.mxu0 %v4456_v33 }
 0xa87   : > { %v3058_v43 = vpop.permute.xlu0 %3057 }
 0xa88   : > { %2987 = vmatpush.msra.mxu3 %v4462_v26  ;;  %3003 = vmatpush.msra.mxu0 %v4461_v36 }
 0xa8a   : > { %2988 = vmatpush.msra.mxu3 %v4467_v41  ;;  %3004 = vmatpush.msra.mxu0 %v4466_v46 }
 0xa8b   : > { %v2669_v56 = vpop.f32.mrf.mxu2 }
 0xa8c   : > { %3893 = vmatpush.xpose.msk.msrb.mxu3 %vm723_vm1, %v6702_v42  ;;  %v2670_v13 = vadd.f32 %v2669_v56, %v2649_v14 }
 0xa8d   : > { %v2821_v0 = vpop.f32.mrf.mxu1 }
 0xa8e   : > { %3371 = vrot.lane.b32.xlu1 %v2670_v13, %s4711_s24  ;;  %v2844_v53 = vmul.f32 0.5, %v2821_v0 }
 0xa8f   : > { %v3022_v29 = vpop.permute.xlu0 %3021 }
 0xa90   : > { %3894 = vmatpush.xpose.msk.msrb.mxu3 %vm723_vm1, %v6510_v47 }
 0xa93   : > { %v2841_v9 = vpop.f32.mrf.mxu2 }
 0xa94   : > { %3895 = vmatpush.xpose.msk.msrb.mxu3 %vm723_vm1, %v6514_v61  ;;  %v2845_v7 = vmul.f32 0.5, %v2841_v9 }
 0xa96   : > { %v2846_v19 = vmax.f32 %v2844_v53, %v2845_v7 }
 0xa97   : > { %v3056_v58 = vpop.permute.xlu0 %3055 }
 0xa98   : > { %3896 = vmatpush.xpose.msk.msrb.mxu3 %vm723_vm1, %v6518_v17  ;;  %2847 = vmax.xlane.f32.xlu2 %v2846_v19 }
 0xa9c   : > { %3897 = vmatpush.xpose.msk.msrb.mxu3 %vm723_vm1, %v6522_v3  ;;  %v7299_v3 = vld [vmem:[#allocation8_spill] sm:$0xff] }
 0xa9f   : > { %v4470_v42 = vpop.permute.xlu0 %4469 }
 0xaa0   : > { %3898 = vmatpush.xpose.msk.msrb.mxu3 %vm723_vm1, %v6526_v15  ;;  %v4471_v47 = vunpack.i.l.bf16 %v4470_v42  ;;  %v4472_v34 = vunpack.i.h.bf16 %v4470_v42  ;;  %v3020_v15 = vpop.permute.xlu2 %3019 }
 0xaa2   : > { %3005 = vmatpush.msra.mxu0 %v4471_v47 }
 0xaa4   : > { %3899 = vmatpush.xpose.msk.msrb.mxu3 %vm723_vm1, %v3034_v40  ;;  %3006 = vmatpush.msra.mxu0 %v4472_v34 }
 0xaa7   : > { %v4475_v61 = vpop.permute.xlu0 %4474 }
 0xaa8   : > { %3900 = vmatpush.xpose.msk.msrb.mxu3 %vm723_vm1, %v6730_v55  ;;  %v4476_v2 = vunpack.i.l.bf16 %v4475_v61  ;;  %v4477_v17 = vunpack.i.h.bf16 %v4475_v61  ;;  %v4490_v55 = vpop.permute.xlu1 %4489  ;;  %v7303_v61 = vld [vmem:[#allocation57_spill] sm:$0xff] }
 0xaa9   : > { %v4492_v11 = vunpack.i.h.bf16 %v4490_v55  ;;  %v4491_v51 = vunpack.i.l.bf16 %v4490_v55  ;;  %v7307_v55 = vld [vmem:[#allocation54_spill] sm:$0xff] }
 0xaaa   : > { %3007 = vmatpush.msra.mxu0 %v4476_v2  ;;  %v7304_v2 = vld [vmem:[#allocation48_spill] sm:$0xff] }
 0xaac   : > { %3901 = vmatpush.xpose.msk.msrb.mxu3 %vm723_vm1, %v3030_v54  ;;  %3008 = vmatpush.msra.mxu0 %v4477_v17  ;;  %v7305_v17 = vld [vmem:[#allocation26_spill] sm:$0xff] }
 0xaae   : > { %3910 = vmatpush.xpose.msk.msrb.mxu0 %vm723_vm1, %v6708_v16 }
 0xab0   : > { %3902 = vmatpush.xpose.msk.msrb.mxu3 %vm723_vm1, %v6588_v4  ;;  %3015 = vrot.lane.b32.xlu2 %v7299_v3, %s4709_s21  ;;  %v3018_v4 = vpop.permute.xlu2 %3017 }
 0xab2   : > { %3911 = vmatpush.xpose.msk.msrb.mxu0 %vm723_vm1, %v6712_v5 }
 0xab4   : > { %3903 = vmatpush.xpose.msk.msrb.mxu3 %vm723_vm1, %v6612_v35  ;;  %v3050_v35 = vpop.permute.xlu0 %3049 }
 0xab6   : > { %3912 = vmatpush.xpose.msk.msrb.mxu0 %vm723_vm1, %v6716_v25 }
 0xab8   : > { %3904 = vmatpush.xpose.msk.msrb.mxu3 %vm723_vm1, %v6642_v28 }
 0xaba   : > { %3913 = vmatpush.xpose.msk.msrb.mxu0 %vm723_vm1, %v6720_v62 }
 0xabc   : > { %3905 = vmatpush.xpose.msk.msrb.mxu3 %vm723_vm1, %v3022_v29 }
 0xabe   : > { %3914 = vmatpush.xpose.msk.msrb.mxu0 %vm723_vm1, %v6724_v50 }
 0xac0   : > { %3906 = vmatpush.xpose.msk.msrb.mxu3 %vm723_vm1, %v3020_v15 }
 0xac2   : > { %3915 = vmatpush.xpose.msk.msrb.mxu0 %vm723_vm1, %v6728_v6  ;;  %v7302_v6 = vld [vmem:[#allocation33_spill] sm:$0xff] }
 0xac4   : > { %3907 = vmatpush.xpose.msk.msrb.mxu3 %vm723_vm1, %v3018_v4 }
 0xac6   : > { %3916 = vmatpush.xpose.msk.msrb.mxu0 %vm723_vm1, %v6732_v18  ;;  %v4500_v18 = vpop.permute.xlu1 %4499 }
 0xac7   : > { %v4502_v14 = vunpack.i.h.bf16 %v4500_v18 }
 0xaca   : > { %3917 = vmatpush.xpose.msk.msrb.mxu0 %vm723_vm1, %v6584_v22 }
 0xace   : > { %3918 = vmatpush.xpose.msk.msrb.mxu0 %vm723_vm1, %v6598_v63  ;;  %v4505_v31 = vpop.permute.xlu1 %4504 }
 0xacf   : > { %v4507_v41 = vunpack.i.h.bf16 %v4505_v31  ;;  %v4506_v46 = vunpack.i.l.bf16 %v4505_v31 }
 0xad2   : > { %3919 = vmatpush.xpose.msk.msrb.mxu0 %vm723_vm1, %v6626_v27 }
 0xad6   : > { %3920 = vmatpush.xpose.msk.msrb.mxu0 %vm723_vm1, %v3058_v43  ;;  %v4510_v49 = vpop.permute.xlu1 %4509  ;;  %v4501_v43 = vunpack.i.l.bf16 %v4500_v18 }
 0xad7   : > { %v4512_v13 = vunpack.i.h.bf16 %v4510_v49  ;;  %v4511_v29 = vunpack.i.l.bf16 %v4510_v49 }
 0xada   : > { %3921 = vmatpush.xpose.msk.msrb.mxu0 %vm723_vm1, %v3056_v58 }
 0xade   : > { %3922 = vmatpush.xpose.msk.msrb.mxu0 %vm723_vm1, %v6682_v52  ;;  %v7300_v52 = vld [vmem:[#allocation28_spill] sm:$0xff]  ;;  %v4515_v56 = vpop.permute.xlu1 %4514 }
 0xadf   : > { %v4517_v0 = vunpack.i.h.bf16 %v4515_v56  ;;  %v4516_v9 = vunpack.i.l.bf16 %v4515_v56  ;;  %v3397_v56 = vld [vmem:[%s6900_s5 + $0x10] sm:$0xff] }
 0xae2   : > { %3923 = vmatpush.xpose.msk.msrb.mxu0 %vm723_vm1, %v6686_v45  ;;  %v7301_v45 = vld [vmem:[#allocation39_spill] sm:$0xff] }
 0xae6   : > { %3924 = vmatpush.xpose.msk.msrb.mxu0 %vm723_vm1, %v3050_v35 }
 0xb0b   : > { %v2848_v22 = vpop.xlane.xlu2 %2847 }
 0xb0c   : > { %v2849_v28 = vsub.f32 %v2844_v53, %v2848_v22  ;;  %v2850_v16 = vsub.f32 %v2845_v7, %v2848_v22 }
 0xb0e   : > { %v2851_v63 = vmul.f32 1.442695, %v2849_v28  ;;  %v2853_v5 = vmul.f32 1.442695, %v2850_v16  ;;  %v4525_v16 = vpop.permute.xlu1 %4524 }
 0xb10   : > { %4595 = vpow2.f32 %v2851_v63 }
 0xb11   : > { %4597 = vpow2.f32 %v2853_v5 }
 0xb13   : > { %v3016_v27 = vpop.permute.xlu2 %3015 }
 0xb14   : > { %3908 = vmatpush.xpose.msk.msrb.mxu3 %vm723_vm1, %v3016_v27 }
 0xb16   : > { %v4596_v25 = vpop.eup %4595 }
 0xb17   : > { %v4598_v62 = vpop.eup %4597 }
 0xb18   : > { %v2855_v50 = vadd.f32 %v4598_v62, %v4596_v25 }
 0xb1a   : > { %2856 = vadd.xlane.f32.xlu2 %v2855_v50  ;;  %v4527_v50 = vunpack.i.h.bf16 %v4525_v16 }
 0xb32   : > { %3047 = vrot.lane.b32.xlu2 %v7300_v52, %s4709_s21 }
 0xb3a   : > { %4484 = vrot.lane.b32.xlu2 %v7301_v45, %s4709_s21 }
 0xb42   : > { %4494 = vrot.lane.b32.xlu2 %v7302_v6, %s4709_s21  ;;  %v7306_v6 = vld [vmem:[#allocation76_spill] sm:$0xff] }
 0xb8d   : > { %v2857_v39 = vpop.xlane.xlu2 %2856 }
 0xb8e   : > { %4599 = vrcp.f32 %v2857_v39  ;;  %v2869_v40 = vand.u32 2147483648, %v2857_v39  ;;  %v2867_v10 = vand.u32 2147483647, %v2857_v39  ;;  %vm2863_vm13 = vweird.f32 %v2857_v39 }
 0xb90   : > { %v2870_v54 = vor.u32 1.1754944e-38, %v2869_v40  ;;  %vm2868_vm15 = vcmp.eq.f32.partialorder %v2867_v10, 8.507059e+37 }
 0xb94   : > { %v4600_v44 = vpop.eup %4599 }
 0xb95   : > { %v2859_v48 = vmul.f32 %v4600_v44, %v2857_v39  ;;  %v3048_v32 = vpop.permute.xlu2 %3047  ;;  %vm2864_vm12 = vweird.f32 %v4600_v44 }
 0xb96   : > { %3925 = vmatpush.xpose.msk.msrb.mxu0 %vm723_vm1, %v3048_v32  ;;  %vm2865_vm14 = vmor %vm2863_vm13, %vm2864_vm12 }
 0xb97   : > { %v2860_v23 = vsub.f32 1.0, %v2859_v48 }
 0xb99   : > { %v2861_v30 = vmul.f32 %v4600_v44, %v2860_v23 }
 0xb9b   : > { %v2862_v12 = vadd.f32 %v4600_v44, %v2861_v30 }
 0xb9d   : > { %v4485_v1 = vpop.permute.xlu2 %4484  ;;  %v2866_v8 = vsel %vm2865_vm14, %v4600_v44, %v2862_v12 }
 0xb9e   : > { %v4487_v38 = vunpack.i.h.bf16 %v4485_v1  ;;  %v4486_v24 = vunpack.i.l.bf16 %v4485_v1  ;;  %v2871_v59 = vsel %vm2868_vm15, %v2870_v54, %v2866_v8 }
 0xb9f   : > { %v2872_v21 = vmul.f32 %v4596_v25, %v2871_v59  ;;  %v2873_v37 = vmul.f32 %v4598_v62, %v2871_v59  ;;  %v4530_v62 = vpop.permute.xlu1 %4529 }
 0xba0   : > { %3314 = vmatpush.msra.mxu1 %v4487_v38  ;;  %3336 = vmatpush.msrb.mxu2 %v4486_v24  ;;  %v4532_v52 = vunpack.i.h.bf16 %v4530_v62  ;;  %v4531_v45 = vunpack.i.l.bf16 %v4530_v62 }
 0xba1   : > { %3891 = vst [vmem:[%s5444_s23 + $0x60] sm:$0xff] %v2872_v21  ;;  %2989 = vmatmul.f32.vlgmr.msra.gmra.mxu3 %v2872_v21  ;;  %3009 = vmatmul.f32.vlgmr.msra.gmra.mxu0 %v2873_v37 }
 0xba2   : > { %3892 = vst [vmem:[%s5444_s23 + $0x68] sm:$0xff] %v2873_v37  ;;  %3315 = vmatpush.msra.mxu1 %v4492_v11  ;;  %3337 = vmatpush.msrb.mxu2 %v4491_v51 }
 0xba5   : > { %v4495_v33 = vpop.permute.xlu2 %4494 }
 0xba6   : > { %v4497_v26 = vunpack.i.h.bf16 %v4495_v33  ;;  %v4496_v36 = vunpack.i.l.bf16 %v4495_v33 }
 0xba7   : > { %v4545_v44 = vpop.permute.xlu1 %4544 }
 0xba8   : > { %3316 = vmatpush.msra.mxu1 %v4497_v26  ;;  %3338 = vmatpush.msrb.mxu2 %v4496_v36  ;;  %v4547_v24 = vunpack.i.h.bf16 %v4545_v44  ;;  %v4546_v59 = vunpack.i.l.bf16 %v4545_v44 }
 0xba9   : > { %3909 = vmatmul.msk.f32.vlgmr.msrb.gmra.mxu3 %vm723_vm1, %v6690_v57  ;;  %3926 = vmatmul.msk.f32.vlgmr.msrb.gmra.mxu0 %vm723_vm1, %v6690_v57 }
 0xbaa   : > { %3317 = vmatpush.msra.mxu1 %v4502_v14  ;;  %3339 = vmatpush.msrb.mxu2 %v4501_v43 }
 0xbac   : > { %3318 = vmatpush.msra.mxu1 %v4507_v41  ;;  %3340 = vmatpush.msrb.mxu2 %v4506_v46  ;;  %v3398_v46 = vld [vmem:[%s6900_s5 + $0x18] sm:$0xff] }
 0xbae   : > { %3319 = vmatpush.msra.mxu1 %v4512_v13  ;;  %3341 = vmatpush.msrb.mxu2 %v4511_v29  ;;  %v3396_v13 = vld [vmem:[%s6900_s5 + $0x8] sm:$0xff]  ;;  %v3395_v29 = vld [vmem:[%s6900_s5] sm:$0xff] }
 0xbaf   : > { %v4555_v21 = vpop.permute.xlu1 %4554 }
 0xbb0   : > { %3320 = vmatpush.msra.mxu1 %v4517_v0  ;;  %3342 = vmatpush.msrb.mxu2 %v4516_v9  ;;  %v4556_v26 = vunpack.i.l.bf16 %v4555_v21  ;;  %v4557_v41 = vunpack.i.h.bf16 %v4555_v21 }
 0xc1e   : > { %v3010_v53 = vpop.f32.mrf.mxu0 }
 0xc24   : > { %v2990_v7 = vpop.f32.mrf.mxu3 }
 0xc25   : > { %v3011_v19 = vadd.f32 %v3010_v53, %v2990_v7 }
 0xc26   : > { %v3182_v58 = vpop.f32.mrf.mxu0 }
 0xc27   : > { %v3186_v42 = vmul.f32 0.5, %v3182_v58  ;;  %v7308_v58 = vld [vmem:[#allocation74_spill] sm:$0xff] }
 0xc2c   : > { %v3162_v57 = vpop.f32.mrf.mxu3 }
 0xc2d   : > { %v3185_v47 = vmul.f32 0.5, %v3162_v57 }
 0xc2f   : > { %v3187_v34 = vmax.f32 %v3185_v47, %v3186_v42 }
 0xc31   : > { %3188 = vmax.xlane.f32.xlu0 %v3187_v34 }
 0xc45   : > { %4519 = vrot.lane.b32.xlu0 %v7303_v61, %s4709_s21 }
 0xc4d   : > { %4539 = vrot.lane.b32.xlu0 %v7304_v2, %s4709_s21 }
 0xc55   : > { %4549 = vrot.lane.b32.xlu0 %v7273_v20, %s4709_s21 }
 0xc5d   : > { %3355 = vrot.lane.b32.xlu0 %v7305_v17, %s4712_s25 }
 0xc65   : > { %3367 = vrot.lane.b32.xlu0 %v6530_v60, %s7053_s26  ;;  %v4526_v60 = vunpack.i.l.bf16 %v4525_v16 }
 0xca4   : > { %v3189_v3 = vpop.xlane.xlu0 %3188 }
 0xca5   : > { %v3190_v15 = vsub.f32 %v3185_v47, %v3189_v3  ;;  %v3191_v4 = vsub.f32 %v3186_v42, %v3189_v3  ;;  %v3360_v42 = vpop.permute.xlu1 %3359 }
 0xca7   : > { %v3192_v35 = vmul.f32 1.442695, %v3190_v15  ;;  %v3194_v22 = vmul.f32 1.442695, %v3191_v4 }
 0xca9   : > { %4601 = vpow2.f32 %v3192_v35 }
 0xcaa   : > { %4603 = vpow2.f32 %v3194_v22 }
 0xcad   : > { %v3372_v3 = vpop.permute.xlu1 %3371 }
 0xcaf   : > { %v6817_v28 = vpop.eup %4601 }
 0xcb0   : > { %v4604_v63 = vpop.eup %4603 }
 0xcb1   : > { %v3196_v20 = vadd.f32 %v4604_v63, %v6817_v28 }
 0xcb3   : > { %3197 = vadd.xlane.f32.xlu2 %v3196_v20 }
 0xcb7   : > { %v4520_v5 = vpop.permute.xlu0 %4519 }
 0xcb8   : > { %v4522_v27 = vunpack.i.h.bf16 %v4520_v5  ;;  %v4521_v25 = vunpack.i.l.bf16 %v4520_v5 }
 0xcba   : > { %3321 = vmatpush.msra.mxu1 %v4522_v27  ;;  %3343 = vmatpush.msrb.mxu2 %v4521_v25 }
 0xcbc   : > { %3322 = vmatpush.msra.mxu1 %v4527_v50  ;;  %3344 = vmatpush.msrb.mxu2 %v4526_v60 }
 0xcbe   : > { %3323 = vmatpush.msra.mxu1 %v4532_v52  ;;  %3345 = vmatpush.msrb.mxu2 %v4531_v45 }
 0xcbf   : > { %v4540_v39 = vpop.permute.xlu0 %4539 }
 0xcc0   : > { %v4542_v10 = vunpack.i.h.bf16 %v4540_v39  ;;  %v4541_v12 = vunpack.i.l.bf16 %v4540_v39 }
 0xcc7   : > { %v4550_v1 = vpop.permute.xlu0 %4549 }
 0xcc8   : > { %v4552_v11 = vunpack.i.h.bf16 %v4550_v1  ;;  %v4551_v51 = vunpack.i.l.bf16 %v4550_v1 }
 0xccb   : > { %4534 = vrot.lane.b32.xlu2 %v7306_v6, %s4709_s21 }
 0xccf   : > { %v3356_v7 = vpop.permute.xlu0 %3355 }
 0xcd0   : > { %v3382_v57 = vsel %vm723_vm1, %v7308_v58, %v3356_v7 }
 0xcd1   : > { %v3384_v34 = vsel %vm3383_vm6, %v3382_v57, %v3360_v42 }
 0xcd3   : > { %3363 = vrot.lane.b32.xlu2 %v7307_v55, %s4714_s13  ;;  %s4716_s13 = smov 28  }
 0xcd7   : > { %v3368_v47 = vpop.permute.xlu0 %3367 }
 0xcdb   : > { %3375 = vrot.lane.b32.xlu2 %v3011_v19, %s4715_s10  ;;  %s3938_s10 = sshll.u32 %s4784_s9, 7 }
 0xcdc   : > { %s3458_s19 = scalar_lea.hbm %s6903_s8, %s3938_s10 }
 0xcdd   : > { %s3461_s21 = sshll.u32 %s3458_s19, 4  ;;  %s3462_s21 = int_to_ptr.hbm [resolvable:$true] %s3461_s21 }
 0xcde   : > { %s4621_s24 = sshra.s32 %s3462_s21, 4  ;;  %s4622_s24 = int_to_ptr.hbm [resolvable:$true] %s4621_s24 }
 0xcdf   : > { %s4623_s25 = scalar_lea.hbm %s4622_s24, 128  ;;  %p4628_p0 = scmp.lt.s32.totalorder %s4622_s24, %s6903_s8 }
 0xce0   : > { %p4624_p11 = scmp.ne.s32.totalorder %s4622_s24, %s4623_s25  ;;  %p4629_p1 = scmp.lt.s32.totalorder %s4627_s0, %s4623_s25 }
 0xce2   : > { %p4625_p12 = pnand %p4624_p11, %p4801_p5  ;;  %p4630_p2 = por %p4629_p1, %p4628_p0 }
 0xce4   : > { %p4626_p13 = pneg %p4625_p12 }
 0xce6   : > { %p4631_p3 = pnand %p4630_p2, %p4626_p13 }
 0xd26   : > { %v3198_v18 = vpop.xlane.xlu2 %3197 }
 0xd27   : > { %4605 = vrcp.f32 %v3198_v18  ;;  %v3210_v54 = vand.u32 2147483648, %v3198_v18  ;;  %v3208_v38 = vand.u32 2147483647, %v3198_v18  ;;  %vm3204_vm3 = vweird.f32 %v3198_v18 }
 0xd29   : > { %v3211_v49 = vor.u32 1.1754944e-38, %v3210_v54  ;;  %vm3209_vm5 = vcmp.eq.f32.partialorder %v3208_v38, 8.507059e+37 }
 0xd2d   : > { %v4606_v48 = vpop.eup %4605 }
 0xd2e   : > { %v3200_v32 = vmul.f32 %v4606_v48, %v3198_v18  ;;  %v4535_v31 = vpop.permute.xlu2 %4534  ;;  %vm3205_vm2 = vweird.f32 %v4606_v48 }
 0xd2f   : > { %v4537_v23 = vunpack.i.h.bf16 %v4535_v31  ;;  %v4536_v40 = vunpack.i.l.bf16 %v4535_v31  ;;  %vm3206_vm4 = vmor %vm3204_vm3, %vm3205_vm2 }
 0xd30   : > { %v3201_v30 = vsub.f32 1.0, %v3200_v32 }
 0xd31   : > { %3324 = vmatpush.msra.mxu1 %v4537_v23  ;;  %3346 = vmatpush.msrb.mxu2 %v4536_v40 }
 0xd32   : > { %v3202_v8 = vmul.f32 %v4606_v48, %v3201_v30 }
 0xd33   : > { %3325 = vmatpush.msra.mxu1 %v4542_v10  ;;  %3347 = vmatpush.msrb.mxu2 %v4541_v12 }
 0xd34   : > { %v3203_v37 = vadd.f32 %v4606_v48, %v3202_v8 }
 0xd35   : > { %3326 = vmatpush.msra.mxu1 %v4547_v24  ;;  %3348 = vmatpush.msrb.mxu2 %v4546_v59 }
 0xd36   : > { %v3207_v33 = vsel %vm3206_vm4, %v4606_v48, %v3203_v37  ;;  %v3364_v19 = vpop.permute.xlu2 %3363 }
 0xd37   : > { %v3212_v36 = vsel %vm3209_vm5, %v3211_v49, %v3207_v33  ;;  %3327 = vmatpush.msra.mxu1 %v4552_v11  ;;  %3349 = vmatpush.msrb.mxu2 %v4551_v51  ;;  %v3386_v61 = vsel %vm3385_vm7, %v3384_v34, %v3364_v19 }
 0xd38   : > { %v3214_v14 = vmul.f32 %v4604_v63, %v3212_v36  ;;  %v3213_v43 = vmul.f32 %v6817_v28, %v3212_v36  ;;  %v3388_v2 = vsel %vm3387_vm8, %v3386_v61, %v3368_v47 }
 0xd39   : > { %3328 = vmatpush.msra.mxu1 %v4556_v26  ;;  %v3390_v15 = vsel %vm3389_vm9, %v3388_v2, %v3372_v3 }
 0xd3a   : > { %3928 = vst [vmem:[%s5444_s23 + $0x78] sm:$0xff] %v3214_v14  ;;  %3350 = vmatmul.f32.vlgmr.msrb.gmra.mxu2 %v3214_v14 }
 0xd3b   : > { %3329 = vmatpush.msra.mxu1 %v4557_v41  ;;  %3927 = vst [vmem:[%s5444_s23 + $0x70] sm:$0xff] %v3213_v43 }
 0xd3c   : > { %3330 = vmatmul.f32.vlgmr.msra.gmra.mxu1 %v3213_v43 }
 0xd3d   : > { %3418 = vmatpush.msrb.mxu1 %v3398_v46 }
 0xd3e   : > { %v3376_v17 = vpop.permute.xlu2 %3375 }
 0xd3f   : > { %3419 = vmatpush.msrb.mxu1 %v3397_v56  ;;  %v3392_v4 = vsel %vm3391_vm10, %v3390_v15, %v3376_v17 }
 0xd41   : > { %3420 = vmatpush.msrb.mxu1 %v3396_v13 }
 0xd43   : > { %3421 = vmatpush.msrb.mxu1 %v3395_v29 }
 0xdb9   : > { %v3331_v0 = vpop.f32.mrf.mxu1 }
 0xdbd   : > { %v3351_v9 = vpop.f32.mrf.mxu2 }
 0xdbe   : > { %v3352_v53 = vadd.f32 %v3351_v9, %v3331_v0 }
 0xdc0   : > { %3379 = vrot.lane.b32.xlu0 %v3352_v53, %s4716_s13 }
 0xe32   : > { %v3380_v35 = vpop.permute.xlu0 %3379 }
 0xe33   : > { %v3394_v22 = vsel %vm3393_vm11, %v3392_v4, %v3380_v35 }
 0xe34   : > { %3929 = vmatmul.msk.f32.vlgmr.msrb.gmra.mxu1 %vm377_vm0, %v3394_v22 }
 0xe35   : > { %4634 = shalt.err (!%p4631_p3)
}
 0xe36   : > { %s4717_s23 = smov 256   ;;  %s7309_s10 = smov 16   ;;  %v4558_v28 = vld [vmem:[%s6901_s6] ss:$0 sm:$0xff] }
 0xe37   : > { %3940 = dma.vmem_to_hbm [thread:$0]  (%p4801_p5), %s3460_s20, 2048, %s3462_s21, %s3433_s22, %s4717_s23, %s4717_s23, %s7309_s10  }
 0xe38   : > { %s3573_s17 = sshll.u32 %s5434_s12, 3  ;;  %s3932_s18 = sshll.u32 %s4784_s9, 3 }
 0xe39   : > { %s3443_s1 = scalar_lea.hbm %s6902_s7, %s3932_s18  ;;  %s315_s24 = scalar_lea.vmem [#allocation2], %s3573_s17 }
 0xe3a   : > { %s3445_s25 = sshll.u32 %s315_s24, 4  ;;  %s3447_s13 = sshll.u32 %s3443_s1, 4  ;;  %s3446_s25 = int_to_ptr.vmem [resolvable:$true] %s3445_s25  ;;  %s3448_s13 = int_to_ptr.hbm [resolvable:$true] %s3447_s13 }
 0xe3b   : > { %s3428_s20 = scalar_lea.sflag [#allocation3], %s5434_s12  ;;  %s4649_s9 = sshra.s32 %s3448_s13, 4  ;;  %s4650_s9 = int_to_ptr.hbm [resolvable:$true] %s4649_s9 }
 0xe3c   : > { %s4651_s21 = scalar_lea.hbm %s4650_s9, 8  ;;  %s4655_s10 = scalar_lea.hbm %s6902_s7, 16 }
 0xe3d   : > { %p4652_p4 = scmp.ne.s32.totalorder %s4650_s9, %s4651_s21  ;;  %p4656_p9 = scmp.lt.s32.totalorder %s4650_s9, %s6902_s7 }
 0xe3e   : > { %p4657_p10 = scmp.lt.s32.totalorder %s4655_s10, %s4651_s21 }
 0xe3f   : > { %p4653_p7 = pnand %p4652_p4, %p4801_p5 }
 0xe40   : > { %p4658_p11 = por %p4657_p10, %p4656_p9 }
 0xe41   : > { %p4654_p8 = pneg %p4653_p7 }
 0xe43   : > { %p4659_p12 = pnand %p4658_p11, %p4654_p8 }
 0xeb1   : > { %v3423_v16 = vpop.f32.mrf.mxu1 }
 0xeb2   : > { %v3424_v63 = vadd.f32 %v4558_v28, %v3423_v16 }
 0xeb4   : > { %3426 = vst.msk [vmem:[%s315_s24] sm:$0xff] %vm377_vm0, %v3424_v63 }
 0xeb5   : > { %4662 = shalt.err (!%p4659_p12)
}
 0xeb6   : > { %3939 = dma.vmem_to_hbm [thread:$0]  (%p4801_p5), %s3446_s25, 128, %s3448_s13, %s3428_s20  }
 0xeb7 PF: > { %p3950_p13 = scmp.ge.s32.totalorder %s4701_s30, 2  ;;  %s3476_s12 = sand.u32 1, %s4689_s27  }
 0xeb8   : > { %s3477_s26 = scalar_lea.sflag [#allocation3], %s3476_s12 }
 0xeb9   : > { %p3944_p0 = pnand %p3950_p13, %p4805_p6 }
 0xebb   : > { %p3945_p1 = pneg %p3944_p0 }
 0xebd   : > { %4680 = dma.done.wait (%p3945_p1), %s3477_s26, 128  }
 0xebe   : > { %4682 = vsyncadd (%p3945_p1), %s3477_s26, 4294967168  ;;  %s3487_s19 = scalar_lea.sflag [#allocation5], %s3476_s12 }
 0xebf   : > { %4684 = dma.done.wait (%p3945_p1), %s3487_s19, 2048  }
 0xec0   : > { %4686 = vsyncadd (%p3945_p1), %s3487_s19, 4294965248  ;;  %p22_p5 = scmp.ge.s32.totalorder %s4788_s11, 4   ;;  %s7310_s27 = smov %s4693_s28 }
 0xec1   : > { %s7311_s28 = smov %s4697_s29  ;;  %s7312_s29 = smov %s4799_s14 }
 0xec2   : > { %s7313_s30 = smov %s4788_s11  ;;  %24 = sbr.rel (!%p22_p5) target bundleno = 9 (0x9), region = 110 }
 0xec7   :  { %3493 = vsyncpa [#allocation3], 1 }
 0xec8   :  { %3495 = vsyncpa [#allocation3 + $0x1], 1 }
 0xec9   :  { %3496 = vsyncpa [#allocation5], 1 }
 0xeca   :  { %3498 = vsyncpa [#allocation5 + $0x1], 1 }

</bundles_post_ra>
